<compile_context>
chip_gen: v7x
topology: tpu7x:2x2x1
jax: 0.10.0
libtpu: 0.0.40
codegen_flags: <defaults>
</compile_context>

<pallas_src>
import jax
import jax.numpy as jnp
from jax.experimental import pallas as pl
from jax.experimental.pallas import tpu as pltpu

# ----- tiny synthetic "BERT" config (mirrors the shapes the module implies) --
BATCH = 2
SEQ = 8
HIDDEN = 32
NUM_HEADS = 2
HEAD_DIM = HIDDEN // NUM_HEADS
FFN = 4 * HIDDEN          # 128
NUM_LAYERS = 2
VOCAB = 100
TYPE_VOCAB = 2
MAX_POS = 16
LN_EPS = 1e-12
POOLING = "mean"          # SimKGC default pooling mode
CLASS_NUM = 8             # args.class_num (classifier heads, unused in forward)
REL_NUM = 4               # args.rel_num

NUM_ENCODERS = 2          # grid steps: 0 = hr_bert, 1 = tail_bert
ROWS = 2 * BATCH          # sequences per grid step: [hr, hr] / [tail, head]

# rows of the consolidated (L, 6, H) per-layer vector pack
_V_BO, _V_LN1G, _V_LN1B, _V_B2, _V_LN2G, _V_LN2B = range(6)


def _layer_norm(x, gamma, beta):
    mu = jnp.mean(x, axis=-1, keepdims=True)
    var = jnp.mean((x - mu) ** 2, axis=-1, keepdims=True)
    return (x - mu) * jax.lax.rsqrt(var + LN_EPS) * gamma + beta


def _recip(x):
    """EUP approximate reciprocal + one Newton-Raphson step (~exact f32 divide)."""
    r = pl.reciprocal(x, approx=True)
    return r * (2.0 - x * r)


def bert_encode_kernel(emb_ref, mask_ref, emb_ln_ref,
                       wqkv_ref, bqkv_ref, wo_ref, w1_ref, b1_ref, w2_ref,
                       vech_ref, out_ref):
    """Full encoder + masked mean pooling for one encoder's 2*B sequences."""
    BB, S, H, HD, NH = ROWS, SEQ, HIDDEN, HEAD_DIM, NUM_HEADS
    R = BB * S

    x = emb_ref[...]                                       # (BB, S, H) f32
    mask = mask_ref[...]                                    # (BB, S)    f32

    # Embedding LayerNorm (BERT embeddings.LayerNorm)
    x = _layer_norm(x, emb_ln_ref[0], emb_ln_ref[1])
    x2 = x.reshape(R, H)                                    # flattened activations

    # Extended attention mask: additive -10000 on padded keys.  (BB, 1, S)
    attn_bias = (1.0 - mask)[:, None, :] * -10000.0

    for l in range(NUM_LAYERS):                             # static unroll (L=2)
        # ---- multi-head self-attention -----------------------------------
        # Head separation lives in the weight layout: per-head (H, HD)
        # projections selected by static ref indexing (free), so activations
        # are never lane-sliced below 128 lanes and never concatenated.
        xb = x2.astype(jnp.bfloat16)                        # MXU operand only
        attn_out = jnp.zeros((R, H), jnp.float32)
        for h in range(NUM_HEADS):                          # static unroll (NH=2)
            qi = (l * 3 + 0) * NH + h
            ki = (l * 3 + 1) * NH + h
            vi = (l * 3 + 2) * NH + h
            # 1/sqrt(HD) is pre-folded into the Q weights/bias.
            q = jnp.dot(xb, wqkv_ref[qi],
                        preferred_element_type=jnp.float32) + bqkv_ref[qi]
            k = jnp.dot(xb, wqkv_ref[ki],
                        preferred_element_type=jnp.float32) + bqkv_ref[ki]
            v = jnp.dot(xb, wqkv_ref[vi],
                        preferred_element_type=jnp.float32) + bqkv_ref[vi]
            q = q.reshape(BB, S, HD)
            k = k.reshape(BB, S, HD)
            v = v.reshape(BB, S, HD)
            s = jnp.einsum('bqd,bkd->bqk', q, k,
                           preferred_element_type=jnp.float32) + attn_bias
            s = s - jnp.max(s, axis=-1, keepdims=True)
            p = jnp.exp(s)
            p = p * _recip(jnp.sum(p, axis=-1, keepdims=True))
            ctx = jnp.einsum('bqk,bkd->bqd', p, v,
                             preferred_element_type=jnp.float32)   # (BB, S, HD)
            attn_out = attn_out + jnp.dot(
                ctx.reshape(R, HD).astype(jnp.bfloat16), wo_ref[l * NH + h],
                preferred_element_type=jnp.float32)
        attn_out = attn_out + vech_ref[l, _V_BO]
        x2 = _layer_norm(x2 + attn_out, vech_ref[l, _V_LN1G], vech_ref[l, _V_LN1B])

        # ---- feed-forward block -------------------------------------------
        xb = x2.astype(jnp.bfloat16)
        h1 = jnp.dot(xb, w1_ref[l],
                     preferred_element_type=jnp.float32) + b1_ref[l]
        # TODO(synk): HF BERT uses exact erf GELU; tanh approximation used here.
        h1 = jax.nn.gelu(h1, approximate=True)
        h2 = jnp.dot(h1.astype(jnp.bfloat16), w2_ref[l],
                     preferred_element_type=jnp.float32) + vech_ref[l, _V_B2]
        x2 = _layer_norm(x2 + h2, vech_ref[l, _V_LN2G], vech_ref[l, _V_LN2B])

    # ---- _pool_output(pooling='mean'): masked mean over sequence -----------
    x3 = x2.reshape(BB, S, H)
    m = mask[:, :, None]                                    # (BB, S, 1)
    summed = jnp.sum(x3 * m, axis=1)                        # (BB, H)
    denom = jnp.maximum(jnp.sum(m, axis=1), 1e-4)           # clamp(min=1e-4)
    out_ref[...] = summed * _recip(denom)


def make_bert_params(key):
    """Deterministic synthetic BERT encoder params (stands in for AutoModel)."""
    # TODO(synk): real pretrained checkpoint weights; synthetic init used here.
    ks = jax.random.split(key, 10)

    def xavier(k, shape):
        fan_in, fan_out = shape[-2], shape[-1]
        lim = jnp.sqrt(6.0 / (fan_in + fan_out))
        return jax.random.uniform(k, shape, jnp.float32, -lim, lim)

    L, H = NUM_LAYERS, HIDDEN
    ones_h = jnp.ones((L, H), jnp.float32)
    zeros_h = jnp.zeros((L, H), jnp.float32)
    # Packed per-layer H-wide vectors: [bo, ln1_g, ln1_b, b2, ln2_g, ln2_b]
    vech = jnp.stack([zeros_h, ones_h, zeros_h, zeros_h, ones_h, zeros_h], axis=1)

    wq = xavier(ks[3], (L, H, H))
    wk = xavier(ks[4], (L, H, H))
    wv = xavier(ks[5], (L, H, H))

    return dict(
        word_emb=0.02 * jax.random.normal(ks[0], (VOCAB, H), jnp.float32),
        pos_emb=0.02 * jax.random.normal(ks[1], (MAX_POS, H), jnp.float32),
        type_emb=0.02 * jax.random.normal(ks[2], (TYPE_VOCAB, H), jnp.float32),
        emb_ln=jnp.stack([jnp.ones((H,), jnp.float32),
                          jnp.zeros((H,), jnp.float32)], axis=0),     # (2, H)
        wqkv=jnp.concatenate([wq, wk, wv], axis=-1),                  # (L, H, 3H)
        bqkv=jnp.zeros((L, 3 * H), jnp.float32),
        wo=xavier(ks[6], (L, H, H)),
        w1=xavier(ks[7], (L, H, FFN)),
        b1=jnp.zeros((L, FFN), jnp.float32),
        w2=xavier(ks[8], (L, FFN, H)),
        vech=vech,                                                    # (L, 6, H)
    )


def make_unused_head_params(key):
    """Mirror the remaining __init__ params (unused in forward())."""
    ks = jax.random.split(key, 8)
    t = 0.05
    lim1 = jnp.sqrt(6.0 / (CLASS_NUM + CLASS_NUM))
    return dict(
        log_inv_t=jnp.log(jnp.float32(1.0 / t)),
        possibility_log_inv_t=jnp.log(jnp.float32(1.0 / t)),
        pre_batch_vectors=jax.random.normal(ks[0], (BATCH, HIDDEN), jnp.float32),
        hr_cns_classifier=[jax.random.normal(ks[1], (HIDDEN, 2 * HIDDEN)) * 0.02,
                           jax.random.normal(ks[2], (2 * HIDDEN, 2 * HIDDEN)) * 0.02,
                           jax.random.normal(ks[3], (2 * HIDDEN, CLASS_NUM)) * 0.02],
        tail_cns_classifier=[jax.random.normal(ks[4], (HIDDEN, 2 * HIDDEN)) * 0.02,
                             jax.random.normal(ks[5], (2 * HIDDEN, 2 * HIDDEN)) * 0.02,
                             jax.random.normal(ks[6], (2 * HIDDEN, CLASS_NUM)) * 0.02],
        possibility_codebook=jax.random.uniform(
            ks[7], (REL_NUM * 2, CLASS_NUM, CLASS_NUM), jnp.float32, -lim1, lim1),
    )


def stack_encoder_params(hr_params, tail_params):
    """One-time (outside jit) weight re-layout: per-head split, scale fold,
    bf16 cast, and stacking of the two encoder sets on a leading axis."""
    L, H, NH, HD = NUM_LAYERS, HIDDEN, NUM_HEADS, HEAD_DIM

    def one(p):
        wqkv = p['wqkv'].reshape(L, H, 3, NH, HD)            # cols: [Q|K|V] x head
        bqkv = p['bqkv'].reshape(L, 3, NH, HD)
        scale = 1.0 / jnp.sqrt(jnp.float32(HD))
        wqkv = wqkv.at[:, :, 0].multiply(scale)              # fold 1/sqrt(HD) into Q
        bqkv = bqkv.at[:, 0].multiply(scale)
        wqkv_h = jnp.transpose(wqkv, (0, 2, 3, 1, 4)).reshape(L * 3 * NH, H, HD)
        bqkv_h = bqkv.reshape(L * 3 * NH, HD)
        wo_h = p['wo'].reshape(L, NH, HD, H).reshape(L * NH, HD, H)
        return dict(
            emb_ln=p['emb_ln'],
            wqkv_h=wqkv_h.astype(jnp.bfloat16),
            bqkv_h=bqkv_h,
            wo_h=wo_h.astype(jnp.bfloat16),
            w1=p['w1'].astype(jnp.bfloat16),
            b1=p['b1'],
            w2=p['w2'].astype(jnp.bfloat16),
            vech=p['vech'],
        )

    a, b = one(hr_params), one(tail_params)
    return jax.tree_util.tree_map(lambda x, y: jnp.stack([x, y], axis=0), a, b)


def _act3(e): return (e, 0, 0)
def _act4(e): return (e, 0, 0, 0)


@jax.jit
def custom_bert_forward(enc, hr_tabs, tail_tabs,
                        hr_token_ids, hr_mask, hr_token_type_ids,
                        tail_token_ids, tail_mask, tail_token_type_ids,
                        head_token_ids, head_mask, head_token_type_ids):
    """CustomBertModel.forward (only_ent_embedding=False): one fused kernel."""
    L, H, NH, HD = NUM_LAYERS, HIDDEN, NUM_HEADS, HEAD_DIM

    def embed(tabs, ids, types):
        pos = tabs['pos_emb'][:SEQ][None, :, :]
        return tabs['word_emb'][ids] + pos + tabs['type_emb'][types]  # (B, S, H)

    # NOTE: head is encoded with tail_bert, exactly as in the PyTorch module.
    hr_e = embed(hr_tabs, hr_token_ids, hr_token_type_ids)
    tail_e = embed(tail_tabs, tail_token_ids, tail_token_type_ids)
    head_e = embed(tail_tabs, head_token_ids, head_token_type_ids)

    # Balanced 2-point grid: step 0 = hr_bert on [hr, hr] (duplicate rows keep
    # the block shape uniform), step 1 = tail_bert on [tail, head].
    emb = jnp.stack([jnp.concatenate([hr_e, hr_e], axis=0),
                     jnp.concatenate([tail_e, head_e], axis=0)],
                    axis=0)                                           # (2, 2B, S, H)
    mask = jnp.stack([jnp.concatenate([hr_mask, hr_mask], axis=0),
                      jnp.concatenate([tail_mask, head_mask], axis=0)],
                     axis=0).astype(jnp.float32)                      # (2, 2B, S)

    in_specs = [
        pl.BlockSpec((None, ROWS, SEQ, H), _act4),                    # emb
        pl.BlockSpec((None, ROWS, SEQ), _act3),                       # mask
        pl.BlockSpec((None, 2, H), _act3),                            # emb_ln
        pl.BlockSpec((None, L * 3 * NH, H, HD), _act4),               # wqkv_h (bf16)
        pl.BlockSpec((None, L * 3 * NH, HD), _act3),                  # bqkv_h
        pl.BlockSpec((None, L * NH, HD, H), _act4),                   # wo_h   (bf16)
        pl.BlockSpec((None, L, H, FFN), _act4),                       # w1     (bf16)
        pl.BlockSpec((None, L, FFN), _act3),                          # b1
        pl.BlockSpec((None, L, FFN, H), _act4),                       # w2     (bf16)
        pl.BlockSpec((None, L, 6, H), _act4),                         # vech
    ]

    pooled = pl.pallas_call(
        bert_encode_kernel,
        out_shape=jax.ShapeDtypeStruct((NUM_ENCODERS, ROWS, H), jnp.float32),
        grid=(NUM_ENCODERS,),
        in_specs=in_specs,
        out_specs=pl.BlockSpec((None, ROWS, H), _act3),
        compiler_params=pltpu.CompilerParams(
            dimension_semantics=("parallel",),
            vmem_limit_bytes=32 * 1024 * 1024),
    )(emb, mask, enc['emb_ln'], enc['wqkv_h'], enc['bqkv_h'], enc['wo_h'],
      enc['w1'], enc['b1'], enc['w2'], enc['vech'])                   # (2, 2B, H)

    return {'hr_vector': pooled[0, :BATCH],
            'tail_vector': pooled[1, :BATCH],
            'head_vector': pooled[1, BATCH:]}


if __name__ == "__main__":
    root = jax.random.PRNGKey(0)
    k_par, k_heads, k_hr, k_t, k_h = jax.random.split(root, 5)

    hr_params = make_bert_params(k_par)
    # tail_bert = deepcopy(hr_bert): identical initial weights.
    tail_params = jax.tree_util.tree_map(jnp.copy, hr_params)
    _ = make_unused_head_params(k_heads)   # classifiers/codebook: not in forward

    # Pre-stack / re-layout / bf16-cast the two encoder weight sets ONCE.
    enc_params = stack_encoder_params(hr_params, tail_params)
    hr_tabs = {k: hr_params[k] for k in ('word_emb', 'pos_emb', 'type_emb')}
    tail_tabs = {k: tail_params[k] for k in ('word_emb', 'pos_emb', 'type_emb')}

    def make_inputs(key, valid_lens):
        ids = jax.random.randint(key, (BATCH, SEQ), 0, VOCAB, dtype=jnp.int32)
        pos = jnp.arange(SEQ)[None, :]
        mask = (pos < jnp.asarray(valid_lens)[:, None]).astype(jnp.int32)
        type_ids = jnp.zeros((BATCH, SEQ), jnp.int32)
        return ids, mask, type_ids

    hr_ids, hr_mask, hr_types = make_inputs(k_hr, [SEQ, 5])
    tl_ids, tl_mask, tl_types = make_inputs(k_t, [6, SEQ])
    hd_ids, hd_mask, hd_types = make_inputs(k_h, [SEQ, SEQ])

    out = custom_bert_forward(enc_params, hr_tabs, tail_tabs,
                              hr_ids, hr_mask, hr_types,
                              tl_ids, tl_mask, tl_types,
                              hd_ids, hd_mask, hd_types)
    jax.block_until_ready(out)

    assert out['hr_vector'].shape == (BATCH, HIDDEN)
    assert out['tail_vector'].shape == (BATCH, HIDDEN)
    assert out['head_vector'].shape == (BATCH, HIDDEN)
    assert all(bool(jnp.all(jnp.isfinite(v))) for v in out.values())
    print("KERNEL_OK")
</pallas_src>

<mosaic_0001>
module attributes {stable_mosaic.version = 11 : i64} {
  func.func @bert_encode_kernel(%arg0: i32, %arg1: memref<1x4x8x32xf32, #tpu.memory_space<vmem>>, %arg2: memref<1x4x8xf32, #tpu.memory_space<vmem>>, %arg3: memref<1x2x32xf32, #tpu.memory_space<vmem>>, %arg4: memref<1x12x32x16xbf16, #tpu.memory_space<vmem>>, %arg5: memref<1x12x16xf32, #tpu.memory_space<vmem>>, %arg6: memref<1x4x16x32xbf16, #tpu.memory_space<vmem>>, %arg7: memref<1x2x32x128xbf16, #tpu.memory_space<vmem>>, %arg8: memref<1x2x128xf32, #tpu.memory_space<vmem>>, %arg9: memref<1x2x128x32xbf16, #tpu.memory_space<vmem>>, %arg10: memref<1x2x6x32xf32, #tpu.memory_space<vmem>>, %arg11: memref<1x4x32xf32, #tpu.memory_space<vmem>>) attributes {dimension_semantics = [#tpu.dimension_semantics<parallel>], iteration_bounds = array<i64: 2>, scalar_prefetch = 0 : i64, scratch_operands = 0 : i64, tpu.core_type = #tpu.core_type<tc>, window_params = [{transform_indices = @transform_0, window_bounds = array<i64: 1, 4, 8, 32>}, {transform_indices = @transform_1, window_bounds = array<i64: 1, 4, 8>}, {transform_indices = @transform_2, window_bounds = array<i64: 1, 2, 32>}, {transform_indices = @transform_3, window_bounds = array<i64: 1, 12, 32, 16>}, {transform_indices = @transform_4, window_bounds = array<i64: 1, 12, 16>}, {transform_indices = @transform_5, window_bounds = array<i64: 1, 4, 16, 32>}, {transform_indices = @transform_6, window_bounds = array<i64: 1, 2, 32, 128>}, {transform_indices = @transform_7, window_bounds = array<i64: 1, 2, 128>}, {transform_indices = @transform_8, window_bounds = array<i64: 1, 2, 128, 32>}, {transform_indices = @transform_9, window_bounds = array<i64: 1, 2, 6, 32>}, {transform_indices = @transform_10, window_bounds = array<i64: 1, 4, 32>}]} {
    %c0 = arith.constant 0 : index
    %c0_0 = arith.constant 0 : index
    %c0_1 = arith.constant 0 : index
    %c0_2 = arith.constant 0 : index
    %0 = vector.load %arg1[%c0, %c0_0, %c0_1, %c0_2] : memref<1x4x8x32xf32, #tpu.memory_space<vmem>>, vector<1x4x8x32xf32>
    %1 = vector.shape_cast %0 : vector<1x4x8x32xf32> to vector<4x8x32xf32>
    %c0_3 = arith.constant 0 : index
    %c0_4 = arith.constant 0 : index
    %c0_5 = arith.constant 0 : index
    %2 = vector.load %arg2[%c0_3, %c0_4, %c0_5] : memref<1x4x8xf32, #tpu.memory_space<vmem>>, vector<1x4x8xf32>
    %3 = vector.shape_cast %2 : vector<1x4x8xf32> to vector<4x8xf32>
    %c0_6 = arith.constant 0 : index
    %c0_7 = arith.constant 0 : index
    %c0_8 = arith.constant 0 : index
    %4 = vector.load %arg3[%c0_6, %c0_7, %c0_8] : memref<1x2x32xf32, #tpu.memory_space<vmem>>, vector<1x1x32xf32>
    %5 = vector.shape_cast %4 : vector<1x1x32xf32> to vector<32xf32>
    %c0_9 = arith.constant 0 : index
    %c1 = arith.constant 1 : index
    %c0_10 = arith.constant 0 : index
    %6 = vector.load %arg3[%c0_9, %c1, %c0_10] : memref<1x2x32xf32, #tpu.memory_space<vmem>>, vector<1x1x32xf32>
    %7 = vector.shape_cast %6 : vector<1x1x32xf32> to vector<32xf32>
    %cst = arith.constant dense<0.000000e+00> : vector<4x8xf32>
    %8 = vector.multi_reduction <add>, %1, %cst [2] : vector<4x8x32xf32> to vector<4x8xf32>
    %9 = vector.shape_cast %8 : vector<4x8xf32> to vector<4x8x1xf32>
    %cst_11 = arith.constant 3.200000e+01 : f32
    %10 = vector.broadcast %cst_11 : f32 to vector<4x8x1xf32>
    %11 = arith.divf %9, %10 : vector<4x8x1xf32>
    %12 = vector.broadcast %11 : vector<4x8x1xf32> to vector<4x8x32xf32>
    %13 = arith.subf %1, %12 : vector<4x8x32xf32>
    %14 = arith.mulf %13, %13 : vector<4x8x32xf32>
    %cst_12 = arith.constant dense<0.000000e+00> : vector<4x8xf32>
    %15 = vector.multi_reduction <add>, %14, %cst_12 [2] : vector<4x8x32xf32> to vector<4x8xf32>
    %16 = vector.shape_cast %15 : vector<4x8xf32> to vector<4x8x1xf32>
    %cst_13 = arith.constant 3.200000e+01 : f32
    %17 = vector.broadcast %cst_13 : f32 to vector<4x8x1xf32>
    %18 = arith.divf %16, %17 : vector<4x8x1xf32>
    %19 = vector.broadcast %11 : vector<4x8x1xf32> to vector<4x8x32xf32>
    %20 = arith.subf %1, %19 : vector<4x8x32xf32>
    %cst_14 = arith.constant 9.99999996E-13 : f32
    %21 = vector.broadcast %cst_14 : f32 to vector<4x8x1xf32>
    %22 = arith.addf %18, %21 : vector<4x8x1xf32>
    %23 = math.rsqrt %22 : vector<4x8x1xf32>
    %24 = vector.broadcast %23 : vector<4x8x1xf32> to vector<4x8x32xf32>
    %25 = arith.mulf %20, %24 : vector<4x8x32xf32>
    %26 = vector.shape_cast %5 : vector<32xf32> to vector<1x1x32xf32>
    %27 = vector.broadcast %26 : vector<1x1x32xf32> to vector<4x8x32xf32>
    %28 = arith.mulf %25, %27 : vector<4x8x32xf32>
    %29 = vector.shape_cast %7 : vector<32xf32> to vector<1x1x32xf32>
    %30 = vector.broadcast %29 : vector<1x1x32xf32> to vector<4x8x32xf32>
    %31 = arith.addf %28, %30 : vector<4x8x32xf32>
    %32 = vector.shape_cast %31 : vector<4x8x32xf32> to vector<32x32xf32>
    %cst_15 = arith.constant 1.000000e+00 : f32
    %33 = vector.broadcast %cst_15 : f32 to vector<4x8xf32>
    %34 = arith.subf %33, %3 : vector<4x8xf32>
    %35 = vector.shape_cast %34 : vector<4x8xf32> to vector<4x1x8xf32>
    %cst_16 = arith.constant -1.000000e+04 : f32
    %36 = vector.broadcast %cst_16 : f32 to vector<4x1x8xf32>
    %37 = arith.mulf %35, %36 : vector<4x1x8xf32>
    %38 = arith.truncf %32 : vector<32x32xf32> to vector<32x32xbf16>
    %cst_17 = arith.constant 0.000000e+00 : f32
    %39 = vector.broadcast %cst_17 : f32 to vector<32x32xf32>
    %c0_18 = arith.constant 0 : index
    %c0_19 = arith.constant 0 : index
    %c0_20 = arith.constant 0 : index
    %c0_21 = arith.constant 0 : index
    %40 = vector.load %arg4[%c0_18, %c0_19, %c0_20, %c0_21] : memref<1x12x32x16xbf16, #tpu.memory_space<vmem>>, vector<1x1x32x16xbf16>
    %41 = vector.shape_cast %40 : vector<1x1x32x16xbf16> to vector<32x16xbf16>
    %cst_22 = arith.constant dense<0.000000e+00> : vector<32x16xf32>
    %42 = tpu.matmul %38, %41, %cst_22 {dimension_numbers = #tpu.dot_dimension_numbers<[1], [0], [0], [1], [0, 0, 1, 1], [], []>} : vector<32x32xbf16>, vector<32x16xbf16>, vector<32x16xf32> -> vector<32x16xf32>
    %c0_23 = arith.constant 0 : index
    %c0_24 = arith.constant 0 : index
    %c0_25 = arith.constant 0 : index
    %43 = vector.load %arg5[%c0_23, %c0_24, %c0_25] : memref<1x12x16xf32, #tpu.memory_space<vmem>>, vector<1x1x16xf32>
    %44 = vector.shape_cast %43 : vector<1x1x16xf32> to vector<16xf32>
    %45 = vector.shape_cast %44 : vector<16xf32> to vector<1x16xf32>
    %46 = vector.broadcast %45 : vector<1x16xf32> to vector<32x16xf32>
    %47 = arith.addf %42, %46 : vector<32x16xf32>
    %c0_26 = arith.constant 0 : index
    %c2 = arith.constant 2 : index
    %c0_27 = arith.constant 0 : index
    %c0_28 = arith.constant 0 : index
    %48 = vector.load %arg4[%c0_26, %c2, %c0_27, %c0_28] : memref<1x12x32x16xbf16, #tpu.memory_space<vmem>>, vector<1x1x32x16xbf16>
    %49 = vector.shape_cast %48 : vector<1x1x32x16xbf16> to vector<32x16xbf16>
    %cst_29 = arith.constant dense<0.000000e+00> : vector<32x16xf32>
    %50 = tpu.matmul %38, %49, %cst_29 {dimension_numbers = #tpu.dot_dimension_numbers<[1], [0], [0], [1], [0, 0, 1, 1], [], []>} : vector<32x32xbf16>, vector<32x16xbf16>, vector<32x16xf32> -> vector<32x16xf32>
    %c0_30 = arith.constant 0 : index
    %c2_31 = arith.constant 2 : index
    %c0_32 = arith.constant 0 : index
    %51 = vector.load %arg5[%c0_30, %c2_31, %c0_32] : memref<1x12x16xf32, #tpu.memory_space<vmem>>, vector<1x1x16xf32>
    %52 = vector.shape_cast %51 : vector<1x1x16xf32> to vector<16xf32>
    %53 = vector.shape_cast %52 : vector<16xf32> to vector<1x16xf32>
    %54 = vector.broadcast %53 : vector<1x16xf32> to vector<32x16xf32>
    %55 = arith.addf %50, %54 : vector<32x16xf32>
    %c0_33 = arith.constant 0 : index
    %c4 = arith.constant 4 : index
    %c0_34 = arith.constant 0 : index
    %c0_35 = arith.constant 0 : index
    %56 = vector.load %arg4[%c0_33, %c4, %c0_34, %c0_35] : memref<1x12x32x16xbf16, #tpu.memory_space<vmem>>, vector<1x1x32x16xbf16>
    %57 = vector.shape_cast %56 : vector<1x1x32x16xbf16> to vector<32x16xbf16>
    %cst_36 = arith.constant dense<0.000000e+00> : vector<32x16xf32>
    %58 = tpu.matmul %38, %57, %cst_36 {dimension_numbers = #tpu.dot_dimension_numbers<[1], [0], [0], [1], [0, 0, 1, 1], [], []>} : vector<32x32xbf16>, vector<32x16xbf16>, vector<32x16xf32> -> vector<32x16xf32>
    %c0_37 = arith.constant 0 : index
    %c4_38 = arith.constant 4 : index
    %c0_39 = arith.constant 0 : index
    %59 = vector.load %arg5[%c0_37, %c4_38, %c0_39] : memref<1x12x16xf32, #tpu.memory_space<vmem>>, vector<1x1x16xf32>
    %60 = vector.shape_cast %59 : vector<1x1x16xf32> to vector<16xf32>
    %61 = vector.shape_cast %60 : vector<16xf32> to vector<1x16xf32>
    %62 = vector.broadcast %61 : vector<1x16xf32> to vector<32x16xf32>
    %63 = arith.addf %58, %62 : vector<32x16xf32>
    %64 = vector.shape_cast %47 : vector<32x16xf32> to vector<4x8x16xf32>
    %65 = vector.shape_cast %55 : vector<32x16xf32> to vector<4x8x16xf32>
    %66 = vector.shape_cast %63 : vector<32x16xf32> to vector<4x8x16xf32>
    "tpu.trace_start"() <{level = 10 : i32, message = "bqd,bkd->bqk"}> : () -> ()
    %cst_40 = arith.constant dense<0.000000e+00> : vector<4x8x8xf32>
    %67 = tpu.matmul %64, %65, %cst_40 {dimension_numbers = #tpu.dot_dimension_numbers<[2], [2], [1], [1], [0, 0, 0, 1, 1, 1], [0], [0]>} : vector<4x8x16xf32>, vector<4x8x16xf32>, vector<4x8x8xf32> -> vector<4x8x8xf32>
    "tpu.trace_stop"() : () -> ()
    %68 = vector.broadcast %37 : vector<4x1x8xf32> to vector<4x8x8xf32>
    %69 = arith.addf %67, %68 : vector<4x8x8xf32>
    %cst_41 = arith.constant dense<0xFF800000> : vector<4x8xf32>
    %70 = vector.multi_reduction <maximumf>, %69, %cst_41 [2] : vector<4x8x8xf32> to vector<4x8xf32>
    %71 = vector.shape_cast %70 : vector<4x8xf32> to vector<4x8x1xf32>
    %72 = vector.broadcast %71 : vector<4x8x1xf32> to vector<4x8x8xf32>
    %73 = arith.subf %69, %72 : vector<4x8x8xf32>
    %74 = math.exp %73 : vector<4x8x8xf32>
    %cst_42 = arith.constant dense<0.000000e+00> : vector<4x8xf32>
    %75 = vector.multi_reduction <add>, %74, %cst_42 [2] : vector<4x8x8xf32> to vector<4x8xf32>
    %76 = vector.shape_cast %75 : vector<4x8xf32> to vector<4x8x1xf32>
    %77 = tpu.reciprocal %76 {approx = true} : vector<4x8x1xf32> -> vector<4x8x1xf32>
    %78 = arith.mulf %76, %77 : vector<4x8x1xf32>
    %cst_43 = arith.constant 2.000000e+00 : f32
    %79 = vector.broadcast %cst_43 : f32 to vector<4x8x1xf32>
    %80 = arith.subf %79, %78 : vector<4x8x1xf32>
    %81 = arith.mulf %77, %80 : vector<4x8x1xf32>
    %82 = vector.broadcast %81 : vector<4x8x1xf32> to vector<4x8x8xf32>
    %83 = arith.mulf %74, %82 : vector<4x8x8xf32>
    "tpu.trace_start"() <{level = 10 : i32, message = "bqk,bkd->bqd"}> : () -> ()
    %cst_44 = arith.constant dense<0.000000e+00> : vector<4x8x16xf32>
    %84 = tpu.matmul %83, %66, %cst_44 {dimension_numbers = #tpu.dot_dimension_numbers<[2], [1], [1], [2], [0, 0, 0, 1, 1, 2], [0], [0]>} : vector<4x8x8xf32>, vector<4x8x16xf32>, vector<4x8x16xf32> -> vector<4x8x16xf32>
    "tpu.trace_stop"() : () -> ()
    %85 = vector.shape_cast %84 : vector<4x8x16xf32> to vector<32x16xf32>
    %86 = arith.truncf %85 : vector<32x16xf32> to vector<32x16xbf16>
    %c0_45 = arith.constant 0 : index
    %c0_46 = arith.constant 0 : index
    %c0_47 = arith.constant 0 : index
    %c0_48 = arith.constant 0 : index
    %87 = vector.load %arg6[%c0_45, %c0_46, %c0_47, %c0_48] : memref<1x4x16x32xbf16, #tpu.memory_space<vmem>>, vector<1x1x16x32xbf16>
    %88 = vector.shape_cast %87 : vector<1x1x16x32xbf16> to vector<16x32xbf16>
    %cst_49 = arith.constant dense<0.000000e+00> : vector<32x32xf32>
    %89 = tpu.matmul %86, %88, %cst_49 {dimension_numbers = #tpu.dot_dimension_numbers<[1], [0], [0], [1], [0, 0, 1, 1], [], []>} : vector<32x16xbf16>, vector<16x32xbf16>, vector<32x32xf32> -> vector<32x32xf32>
    %90 = arith.addf %39, %89 : vector<32x32xf32>
    %c0_50 = arith.constant 0 : index
    %c1_51 = arith.constant 1 : index
    %c0_52 = arith.constant 0 : index
    %c0_53 = arith.constant 0 : index
    %91 = vector.load %arg4[%c0_50, %c1_51, %c0_52, %c0_53] : memref<1x12x32x16xbf16, #tpu.memory_space<vmem>>, vector<1x1x32x16xbf16>
    %92 = vector.shape_cast %91 : vector<1x1x32x16xbf16> to vector<32x16xbf16>
    %cst_54 = arith.constant dense<0.000000e+00> : vector<32x16xf32>
    %93 = tpu.matmul %38, %92, %cst_54 {dimension_numbers = #tpu.dot_dimension_numbers<[1], [0], [0], [1], [0, 0, 1, 1], [], []>} : vector<32x32xbf16>, vector<32x16xbf16>, vector<32x16xf32> -> vector<32x16xf32>
    %c0_55 = arith.constant 0 : index
    %c1_56 = arith.constant 1 : index
    %c0_57 = arith.constant 0 : index
    %94 = vector.load %arg5[%c0_55, %c1_56, %c0_57] : memref<1x12x16xf32, #tpu.memory_space<vmem>>, vector<1x1x16xf32>
    %95 = vector.shape_cast %94 : vector<1x1x16xf32> to vector<16xf32>
    %96 = vector.shape_cast %95 : vector<16xf32> to vector<1x16xf32>
    %97 = vector.broadcast %96 : vector<1x16xf32> to vector<32x16xf32>
    %98 = arith.addf %93, %97 : vector<32x16xf32>
    %c0_58 = arith.constant 0 : index
    %c3 = arith.constant 3 : index
    %c0_59 = arith.constant 0 : index
    %c0_60 = arith.constant 0 : index
    %99 = vector.load %arg4[%c0_58, %c3, %c0_59, %c0_60] : memref<1x12x32x16xbf16, #tpu.memory_space<vmem>>, vector<1x1x32x16xbf16>
    %100 = vector.shape_cast %99 : vector<1x1x32x16xbf16> to vector<32x16xbf16>
    %cst_61 = arith.constant dense<0.000000e+00> : vector<32x16xf32>
    %101 = tpu.matmul %38, %100, %cst_61 {dimension_numbers = #tpu.dot_dimension_numbers<[1], [0], [0], [1], [0, 0, 1, 1], [], []>} : vector<32x32xbf16>, vector<32x16xbf16>, vector<32x16xf32> -> vector<32x16xf32>
    %c0_62 = arith.constant 0 : index
    %c3_63 = arith.constant 3 : index
    %c0_64 = arith.constant 0 : index
    %102 = vector.load %arg5[%c0_62, %c3_63, %c0_64] : memref<1x12x16xf32, #tpu.memory_space<vmem>>, vector<1x1x16xf32>
    %103 = vector.shape_cast %102 : vector<1x1x16xf32> to vector<16xf32>
    %104 = vector.shape_cast %103 : vector<16xf32> to vector<1x16xf32>
    %105 = vector.broadcast %104 : vector<1x16xf32> to vector<32x16xf32>
    %106 = arith.addf %101, %105 : vector<32x16xf32>
    %c0_65 = arith.constant 0 : index
    %c5 = arith.constant 5 : index
    %c0_66 = arith.constant 0 : index
    %c0_67 = arith.constant 0 : index
    %107 = vector.load %arg4[%c0_65, %c5, %c0_66, %c0_67] : memref<1x12x32x16xbf16, #tpu.memory_space<vmem>>, vector<1x1x32x16xbf16>
    %108 = vector.shape_cast %107 : vector<1x1x32x16xbf16> to vector<32x16xbf16>
    %cst_68 = arith.constant dense<0.000000e+00> : vector<32x16xf32>
    %109 = tpu.matmul %38, %108, %cst_68 {dimension_numbers = #tpu.dot_dimension_numbers<[1], [0], [0], [1], [0, 0, 1, 1], [], []>} : vector<32x32xbf16>, vector<32x16xbf16>, vector<32x16xf32> -> vector<32x16xf32>
    %c0_69 = arith.constant 0 : index
    %c5_70 = arith.constant 5 : index
    %c0_71 = arith.constant 0 : index
    %110 = vector.load %arg5[%c0_69, %c5_70, %c0_71] : memref<1x12x16xf32, #tpu.memory_space<vmem>>, vector<1x1x16xf32>
    %111 = vector.shape_cast %110 : vector<1x1x16xf32> to vector<16xf32>
    %112 = vector.shape_cast %111 : vector<16xf32> to vector<1x16xf32>
    %113 = vector.broadcast %112 : vector<1x16xf32> to vector<32x16xf32>
    %114 = arith.addf %109, %113 : vector<32x16xf32>
    %115 = vector.shape_cast %98 : vector<32x16xf32> to vector<4x8x16xf32>
    %116 = vector.shape_cast %106 : vector<32x16xf32> to vector<4x8x16xf32>
    %117 = vector.shape_cast %114 : vector<32x16xf32> to vector<4x8x16xf32>
    "tpu.trace_start"() <{level = 10 : i32, message = "bqd,bkd->bqk"}> : () -> ()
    %cst_72 = arith.constant dense<0.000000e+00> : vector<4x8x8xf32>
    %118 = tpu.matmul %115, %116, %cst_72 {dimension_numbers = #tpu.dot_dimension_numbers<[2], [2], [1], [1], [0, 0, 0, 1, 1, 1], [0], [0]>} : vector<4x8x16xf32>, vector<4x8x16xf32>, vector<4x8x8xf32> -> vector<4x8x8xf32>
    "tpu.trace_stop"() : () -> ()
    %119 = vector.broadcast %37 : vector<4x1x8xf32> to vector<4x8x8xf32>
    %120 = arith.addf %118, %119 : vector<4x8x8xf32>
    %cst_73 = arith.constant dense<0xFF800000> : vector<4x8xf32>
    %121 = vector.multi_reduction <maximumf>, %120, %cst_73 [2] : vector<4x8x8xf32> to vector<4x8xf32>
    %122 = vector.shape_cast %121 : vector<4x8xf32> to vector<4x8x1xf32>
    %123 = vector.broadcast %122 : vector<4x8x1xf32> to vector<4x8x8xf32>
    %124 = arith.subf %120, %123 : vector<4x8x8xf32>
    %125 = math.exp %124 : vector<4x8x8xf32>
    %cst_74 = arith.constant dense<0.000000e+00> : vector<4x8xf32>
    %126 = vector.multi_reduction <add>, %125, %cst_74 [2] : vector<4x8x8xf32> to vector<4x8xf32>
    %127 = vector.shape_cast %126 : vector<4x8xf32> to vector<4x8x1xf32>
    %128 = tpu.reciprocal %127 {approx = true} : vector<4x8x1xf32> -> vector<4x8x1xf32>
    %129 = arith.mulf %127, %128 : vector<4x8x1xf32>
    %cst_75 = arith.constant 2.000000e+00 : f32
    %130 = vector.broadcast %cst_75 : f32 to vector<4x8x1xf32>
    %131 = arith.subf %130, %129 : vector<4x8x1xf32>
    %132 = arith.mulf %128, %131 : vector<4x8x1xf32>
    %133 = vector.broadcast %132 : vector<4x8x1xf32> to vector<4x8x8xf32>
    %134 = arith.mulf %125, %133 : vector<4x8x8xf32>
    "tpu.trace_start"() <{level = 10 : i32, message = "bqk,bkd->bqd"}> : () -> ()
    %cst_76 = arith.constant dense<0.000000e+00> : vector<4x8x16xf32>
    %135 = tpu.matmul %134, %117, %cst_76 {dimension_numbers = #tpu.dot_dimension_numbers<[2], [1], [1], [2], [0, 0, 0, 1, 1, 2], [0], [0]>} : vector<4x8x8xf32>, vector<4x8x16xf32>, vector<4x8x16xf32> -> vector<4x8x16xf32>
    "tpu.trace_stop"() : () -> ()
    %136 = vector.shape_cast %135 : vector<4x8x16xf32> to vector<32x16xf32>
    %137 = arith.truncf %136 : vector<32x16xf32> to vector<32x16xbf16>
    %c0_77 = arith.constant 0 : index
    %c1_78 = arith.constant 1 : index
    %c0_79 = arith.constant 0 : index
    %c0_80 = arith.constant 0 : index
    %138 = vector.load %arg6[%c0_77, %c1_78, %c0_79, %c0_80] : memref<1x4x16x32xbf16, #tpu.memory_space<vmem>>, vector<1x1x16x32xbf16>
    %139 = vector.shape_cast %138 : vector<1x1x16x32xbf16> to vector<16x32xbf16>
    %cst_81 = arith.constant dense<0.000000e+00> : vector<32x32xf32>
    %140 = tpu.matmul %137, %139, %cst_81 {dimension_numbers = #tpu.dot_dimension_numbers<[1], [0], [0], [1], [0, 0, 1, 1], [], []>} : vector<32x16xbf16>, vector<16x32xbf16>, vector<32x32xf32> -> vector<32x32xf32>
    %141 = arith.addf %90, %140 : vector<32x32xf32>
    %c0_82 = arith.constant 0 : index
    %c0_83 = arith.constant 0 : index
    %c0_84 = arith.constant 0 : index
    %c0_85 = arith.constant 0 : index
    %142 = vector.load %arg10[%c0_82, %c0_83, %c0_84, %c0_85] : memref<1x2x6x32xf32, #tpu.memory_space<vmem>>, vector<1x1x1x32xf32>
    %143 = vector.shape_cast %142 : vector<1x1x1x32xf32> to vector<32xf32>
    %144 = vector.shape_cast %143 : vector<32xf32> to vector<1x32xf32>
    %145 = vector.broadcast %144 : vector<1x32xf32> to vector<32x32xf32>
    %146 = arith.addf %141, %145 : vector<32x32xf32>
    %147 = arith.addf %32, %146 : vector<32x32xf32>
    %c0_86 = arith.constant 0 : index
    %c0_87 = arith.constant 0 : index
    %c1_88 = arith.constant 1 : index
    %c0_89 = arith.constant 0 : index
    %148 = vector.load %arg10[%c0_86, %c0_87, %c1_88, %c0_89] : memref<1x2x6x32xf32, #tpu.memory_space<vmem>>, vector<1x1x1x32xf32>
    %149 = vector.shape_cast %148 : vector<1x1x1x32xf32> to vector<32xf32>
    %c0_90 = arith.constant 0 : index
    %c0_91 = arith.constant 0 : index
    %c2_92 = arith.constant 2 : index
    %c0_93 = arith.constant 0 : index
    %150 = vector.load %arg10[%c0_90, %c0_91, %c2_92, %c0_93] : memref<1x2x6x32xf32, #tpu.memory_space<vmem>>, vector<1x1x1x32xf32>
    %151 = vector.shape_cast %150 : vector<1x1x1x32xf32> to vector<32xf32>
    %cst_94 = arith.constant dense<0.000000e+00> : vector<32xf32>
    %152 = vector.multi_reduction <add>, %147, %cst_94 [1] : vector<32x32xf32> to vector<32xf32>
    %153 = vector.shape_cast %152 : vector<32xf32> to vector<32x1xf32>
    %cst_95 = arith.constant 3.200000e+01 : f32
    %154 = vector.broadcast %cst_95 : f32 to vector<32x1xf32>
    %155 = arith.divf %153, %154 : vector<32x1xf32>
    %156 = vector.broadcast %155 : vector<32x1xf32> to vector<32x32xf32>
    %157 = arith.subf %147, %156 : vector<32x32xf32>
    %158 = arith.mulf %157, %157 : vector<32x32xf32>
    %cst_96 = arith.constant dense<0.000000e+00> : vector<32xf32>
    %159 = vector.multi_reduction <add>, %158, %cst_96 [1] : vector<32x32xf32> to vector<32xf32>
    %160 = vector.shape_cast %159 : vector<32xf32> to vector<32x1xf32>
    %cst_97 = arith.constant 3.200000e+01 : f32
    %161 = vector.broadcast %cst_97 : f32 to vector<32x1xf32>
    %162 = arith.divf %160, %161 : vector<32x1xf32>
    %163 = vector.broadcast %155 : vector<32x1xf32> to vector<32x32xf32>
    %164 = arith.subf %147, %163 : vector<32x32xf32>
    %cst_98 = arith.constant 9.99999996E-13 : f32
    %165 = vector.broadcast %cst_98 : f32 to vector<32x1xf32>
    %166 = arith.addf %162, %165 : vector<32x1xf32>
    %167 = math.rsqrt %166 : vector<32x1xf32>
    %168 = vector.broadcast %167 : vector<32x1xf32> to vector<32x32xf32>
    %169 = arith.mulf %164, %168 : vector<32x32xf32>
    %170 = vector.shape_cast %149 : vector<32xf32> to vector<1x32xf32>
    %171 = vector.broadcast %170 : vector<1x32xf32> to vector<32x32xf32>
    %172 = arith.mulf %169, %171 : vector<32x32xf32>
    %173 = vector.shape_cast %151 : vector<32xf32> to vector<1x32xf32>
    %174 = vector.broadcast %173 : vector<1x32xf32> to vector<32x32xf32>
    %175 = arith.addf %172, %174 : vector<32x32xf32>
    %176 = arith.truncf %175 : vector<32x32xf32> to vector<32x32xbf16>
    %c0_99 = arith.constant 0 : index
    %c0_100 = arith.constant 0 : index
    %c0_101 = arith.constant 0 : index
    %c0_102 = arith.constant 0 : index
    %177 = vector.load %arg7[%c0_99, %c0_100, %c0_101, %c0_102] : memref<1x2x32x128xbf16, #tpu.memory_space<vmem>>, vector<1x1x32x128xbf16>
    %178 = vector.shape_cast %177 : vector<1x1x32x128xbf16> to vector<32x128xbf16>
    %cst_103 = arith.constant dense<0.000000e+00> : vector<32x128xf32>
    %179 = tpu.matmul %176, %178, %cst_103 {dimension_numbers = #tpu.dot_dimension_numbers<[1], [0], [0], [1], [0, 0, 1, 1], [], []>} : vector<32x32xbf16>, vector<32x128xbf16>, vector<32x128xf32> -> vector<32x128xf32>
    %c0_104 = arith.constant 0 : index
    %c0_105 = arith.constant 0 : index
    %c0_106 = arith.constant 0 : index
    %180 = vector.load %arg8[%c0_104, %c0_105, %c0_106] : memref<1x2x128xf32, #tpu.memory_space<vmem>>, vector<1x1x128xf32>
    %181 = vector.shape_cast %180 : vector<1x1x128xf32> to vector<128xf32>
    %182 = vector.shape_cast %181 : vector<128xf32> to vector<1x128xf32>
    %183 = vector.broadcast %182 : vector<1x128xf32> to vector<32x128xf32>
    %184 = arith.addf %179, %183 : vector<32x128xf32>
    %185 = arith.mulf %184, %184 : vector<32x128xf32>
    %186 = arith.mulf %184, %185 : vector<32x128xf32>
    %cst_107 = arith.constant 4.471500e-02 : f32
    %187 = vector.broadcast %cst_107 : f32 to vector<32x128xf32>
    %188 = arith.mulf %187, %186 : vector<32x128xf32>
    %189 = arith.addf %184, %188 : vector<32x128xf32>
    %cst_108 = arith.constant 0.797884583 : f32
    %190 = vector.broadcast %cst_108 : f32 to vector<32x128xf32>
    %191 = arith.mulf %190, %189 : vector<32x128xf32>
    %192 = math.tanh %191 : vector<32x128xf32>
    %cst_109 = arith.constant 1.000000e+00 : f32
    %193 = vector.broadcast %cst_109 : f32 to vector<32x128xf32>
    %194 = arith.addf %193, %192 : vector<32x128xf32>
    %cst_110 = arith.constant 5.000000e-01 : f32
    %195 = vector.broadcast %cst_110 : f32 to vector<32x128xf32>
    %196 = arith.mulf %195, %194 : vector<32x128xf32>
    %197 = arith.mulf %184, %196 : vector<32x128xf32>
    %198 = arith.truncf %197 : vector<32x128xf32> to vector<32x128xbf16>
    %c0_111 = arith.constant 0 : index
    %c0_112 = arith.constant 0 : index
    %c0_113 = arith.constant 0 : index
    %c0_114 = arith.constant 0 : index
    %199 = vector.load %arg9[%c0_111, %c0_112, %c0_113, %c0_114] : memref<1x2x128x32xbf16, #tpu.memory_space<vmem>>, vector<1x1x128x32xbf16>
    %200 = vector.shape_cast %199 : vector<1x1x128x32xbf16> to vector<128x32xbf16>
    %cst_115 = arith.constant dense<0.000000e+00> : vector<32x32xf32>
    %201 = tpu.matmul %198, %200, %cst_115 {dimension_numbers = #tpu.dot_dimension_numbers<[1], [0], [0], [1], [0, 0, 1, 1], [], []>} : vector<32x128xbf16>, vector<128x32xbf16>, vector<32x32xf32> -> vector<32x32xf32>
    %c0_116 = arith.constant 0 : index
    %c0_117 = arith.constant 0 : index
    %c3_118 = arith.constant 3 : index
    %c0_119 = arith.constant 0 : index
    %202 = vector.load %arg10[%c0_116, %c0_117, %c3_118, %c0_119] : memref<1x2x6x32xf32, #tpu.memory_space<vmem>>, vector<1x1x1x32xf32>
    %203 = vector.shape_cast %202 : vector<1x1x1x32xf32> to vector<32xf32>
    %204 = vector.shape_cast %203 : vector<32xf32> to vector<1x32xf32>
    %205 = vector.broadcast %204 : vector<1x32xf32> to vector<32x32xf32>
    %206 = arith.addf %201, %205 : vector<32x32xf32>
    %207 = arith.addf %175, %206 : vector<32x32xf32>
    %c0_120 = arith.constant 0 : index
    %c0_121 = arith.constant 0 : index
    %c4_122 = arith.constant 4 : index
    %c0_123 = arith.constant 0 : index
    %208 = vector.load %arg10[%c0_120, %c0_121, %c4_122, %c0_123] : memref<1x2x6x32xf32, #tpu.memory_space<vmem>>, vector<1x1x1x32xf32>
    %209 = vector.shape_cast %208 : vector<1x1x1x32xf32> to vector<32xf32>
    %c0_124 = arith.constant 0 : index
    %c0_125 = arith.constant 0 : index
    %c5_126 = arith.constant 5 : index
    %c0_127 = arith.constant 0 : index
    %210 = vector.load %arg10[%c0_124, %c0_125, %c5_126, %c0_127] : memref<1x2x6x32xf32, #tpu.memory_space<vmem>>, vector<1x1x1x32xf32>
    %211 = vector.shape_cast %210 : vector<1x1x1x32xf32> to vector<32xf32>
    %cst_128 = arith.constant dense<0.000000e+00> : vector<32xf32>
    %212 = vector.multi_reduction <add>, %207, %cst_128 [1] : vector<32x32xf32> to vector<32xf32>
    %213 = vector.shape_cast %212 : vector<32xf32> to vector<32x1xf32>
    %cst_129 = arith.constant 3.200000e+01 : f32
    %214 = vector.broadcast %cst_129 : f32 to vector<32x1xf32>
    %215 = arith.divf %213, %214 : vector<32x1xf32>
    %216 = vector.broadcast %215 : vector<32x1xf32> to vector<32x32xf32>
    %217 = arith.subf %207, %216 : vector<32x32xf32>
    %218 = arith.mulf %217, %217 : vector<32x32xf32>
    %cst_130 = arith.constant dense<0.000000e+00> : vector<32xf32>
    %219 = vector.multi_reduction <add>, %218, %cst_130 [1] : vector<32x32xf32> to vector<32xf32>
    %220 = vector.shape_cast %219 : vector<32xf32> to vector<32x1xf32>
    %cst_131 = arith.constant 3.200000e+01 : f32
    %221 = vector.broadcast %cst_131 : f32 to vector<32x1xf32>
    %222 = arith.divf %220, %221 : vector<32x1xf32>
    %223 = vector.broadcast %215 : vector<32x1xf32> to vector<32x32xf32>
    %224 = arith.subf %207, %223 : vector<32x32xf32>
    %cst_132 = arith.constant 9.99999996E-13 : f32
    %225 = vector.broadcast %cst_132 : f32 to vector<32x1xf32>
    %226 = arith.addf %222, %225 : vector<32x1xf32>
    %227 = math.rsqrt %226 : vector<32x1xf32>
    %228 = vector.broadcast %227 : vector<32x1xf32> to vector<32x32xf32>
    %229 = arith.mulf %224, %228 : vector<32x32xf32>
    %230 = vector.shape_cast %209 : vector<32xf32> to vector<1x32xf32>
    %231 = vector.broadcast %230 : vector<1x32xf32> to vector<32x32xf32>
    %232 = arith.mulf %229, %231 : vector<32x32xf32>
    %233 = vector.shape_cast %211 : vector<32xf32> to vector<1x32xf32>
    %234 = vector.broadcast %233 : vector<1x32xf32> to vector<32x32xf32>
    %235 = arith.addf %232, %234 : vector<32x32xf32>
    %236 = arith.truncf %235 : vector<32x32xf32> to vector<32x32xbf16>
    %cst_133 = arith.constant 0.000000e+00 : f32
    %237 = vector.broadcast %cst_133 : f32 to vector<32x32xf32>
    %c0_134 = arith.constant 0 : index
    %c6 = arith.constant 6 : index
    %c0_135 = arith.constant 0 : index
    %c0_136 = arith.constant 0 : index
    %238 = vector.load %arg4[%c0_134, %c6, %c0_135, %c0_136] : memref<1x12x32x16xbf16, #tpu.memory_space<vmem>>, vector<1x1x32x16xbf16>
    %239 = vector.shape_cast %238 : vector<1x1x32x16xbf16> to vector<32x16xbf16>
    %cst_137 = arith.constant dense<0.000000e+00> : vector<32x16xf32>
    %240 = tpu.matmul %236, %239, %cst_137 {dimension_numbers = #tpu.dot_dimension_numbers<[1], [0], [0], [1], [0, 0, 1, 1], [], []>} : vector<32x32xbf16>, vector<32x16xbf16>, vector<32x16xf32> -> vector<32x16xf32>
    %c0_138 = arith.constant 0 : index
    %c6_139 = arith.constant 6 : index
    %c0_140 = arith.constant 0 : index
    %241 = vector.load %arg5[%c0_138, %c6_139, %c0_140] : memref<1x12x16xf32, #tpu.memory_space<vmem>>, vector<1x1x16xf32>
    %242 = vector.shape_cast %241 : vector<1x1x16xf32> to vector<16xf32>
    %243 = vector.shape_cast %242 : vector<16xf32> to vector<1x16xf32>
    %244 = vector.broadcast %243 : vector<1x16xf32> to vector<32x16xf32>
    %245 = arith.addf %240, %244 : vector<32x16xf32>
    %c0_141 = arith.constant 0 : index
    %c8 = arith.constant 8 : index
    %c0_142 = arith.constant 0 : index
    %c0_143 = arith.constant 0 : index
    %246 = vector.load %arg4[%c0_141, %c8, %c0_142, %c0_143] : memref<1x12x32x16xbf16, #tpu.memory_space<vmem>>, vector<1x1x32x16xbf16>
    %247 = vector.shape_cast %246 : vector<1x1x32x16xbf16> to vector<32x16xbf16>
    %cst_144 = arith.constant dense<0.000000e+00> : vector<32x16xf32>
    %248 = tpu.matmul %236, %247, %cst_144 {dimension_numbers = #tpu.dot_dimension_numbers<[1], [0], [0], [1], [0, 0, 1, 1], [], []>} : vector<32x32xbf16>, vector<32x16xbf16>, vector<32x16xf32> -> vector<32x16xf32>
    %c0_145 = arith.constant 0 : index
    %c8_146 = arith.constant 8 : index
    %c0_147 = arith.constant 0 : index
    %249 = vector.load %arg5[%c0_145, %c8_146, %c0_147] : memref<1x12x16xf32, #tpu.memory_space<vmem>>, vector<1x1x16xf32>
    %250 = vector.shape_cast %249 : vector<1x1x16xf32> to vector<16xf32>
    %251 = vector.shape_cast %250 : vector<16xf32> to vector<1x16xf32>
    %252 = vector.broadcast %251 : vector<1x16xf32> to vector<32x16xf32>
    %253 = arith.addf %248, %252 : vector<32x16xf32>
    %c0_148 = arith.constant 0 : index
    %c10 = arith.constant 10 : index
    %c0_149 = arith.constant 0 : index
    %c0_150 = arith.constant 0 : index
    %254 = vector.load %arg4[%c0_148, %c10, %c0_149, %c0_150] : memref<1x12x32x16xbf16, #tpu.memory_space<vmem>>, vector<1x1x32x16xbf16>
    %255 = vector.shape_cast %254 : vector<1x1x32x16xbf16> to vector<32x16xbf16>
    %cst_151 = arith.constant dense<0.000000e+00> : vector<32x16xf32>
    %256 = tpu.matmul %236, %255, %cst_151 {dimension_numbers = #tpu.dot_dimension_numbers<[1], [0], [0], [1], [0, 0, 1, 1], [], []>} : vector<32x32xbf16>, vector<32x16xbf16>, vector<32x16xf32> -> vector<32x16xf32>
    %c0_152 = arith.constant 0 : index
    %c10_153 = arith.constant 10 : index
    %c0_154 = arith.constant 0 : index
    %257 = vector.load %arg5[%c0_152, %c10_153, %c0_154] : memref<1x12x16xf32, #tpu.memory_space<vmem>>, vector<1x1x16xf32>
    %258 = vector.shape_cast %257 : vector<1x1x16xf32> to vector<16xf32>
    %259 = vector.shape_cast %258 : vector<16xf32> to vector<1x16xf32>
    %260 = vector.broadcast %259 : vector<1x16xf32> to vector<32x16xf32>
    %261 = arith.addf %256, %260 : vector<32x16xf32>
    %262 = vector.shape_cast %245 : vector<32x16xf32> to vector<4x8x16xf32>
    %263 = vector.shape_cast %253 : vector<32x16xf32> to vector<4x8x16xf32>
    %264 = vector.shape_cast %261 : vector<32x16xf32> to vector<4x8x16xf32>
    "tpu.trace_start"() <{level = 10 : i32, message = "bqd,bkd->bqk"}> : () -> ()
    %cst_155 = arith.constant dense<0.000000e+00> : vector<4x8x8xf32>
    %265 = tpu.matmul %262, %263, %cst_155 {dimension_numbers = #tpu.dot_dimension_numbers<[2], [2], [1], [1], [0, 0, 0, 1, 1, 1], [0], [0]>} : vector<4x8x16xf32>, vector<4x8x16xf32>, vector<4x8x8xf32> -> vector<4x8x8xf32>
    "tpu.trace_stop"() : () -> ()
    %266 = vector.broadcast %37 : vector<4x1x8xf32> to vector<4x8x8xf32>
    %267 = arith.addf %265, %266 : vector<4x8x8xf32>
    %cst_156 = arith.constant dense<0xFF800000> : vector<4x8xf32>
    %268 = vector.multi_reduction <maximumf>, %267, %cst_156 [2] : vector<4x8x8xf32> to vector<4x8xf32>
    %269 = vector.shape_cast %268 : vector<4x8xf32> to vector<4x8x1xf32>
    %270 = vector.broadcast %269 : vector<4x8x1xf32> to vector<4x8x8xf32>
    %271 = arith.subf %267, %270 : vector<4x8x8xf32>
    %272 = math.exp %271 : vector<4x8x8xf32>
    %cst_157 = arith.constant dense<0.000000e+00> : vector<4x8xf32>
    %273 = vector.multi_reduction <add>, %272, %cst_157 [2] : vector<4x8x8xf32> to vector<4x8xf32>
    %274 = vector.shape_cast %273 : vector<4x8xf32> to vector<4x8x1xf32>
    %275 = tpu.reciprocal %274 {approx = true} : vector<4x8x1xf32> -> vector<4x8x1xf32>
    %276 = arith.mulf %274, %275 : vector<4x8x1xf32>
    %cst_158 = arith.constant 2.000000e+00 : f32
    %277 = vector.broadcast %cst_158 : f32 to vector<4x8x1xf32>
    %278 = arith.subf %277, %276 : vector<4x8x1xf32>
    %279 = arith.mulf %275, %278 : vector<4x8x1xf32>
    %280 = vector.broadcast %279 : vector<4x8x1xf32> to vector<4x8x8xf32>
    %281 = arith.mulf %272, %280 : vector<4x8x8xf32>
    "tpu.trace_start"() <{level = 10 : i32, message = "bqk,bkd->bqd"}> : () -> ()
    %cst_159 = arith.constant dense<0.000000e+00> : vector<4x8x16xf32>
    %282 = tpu.matmul %281, %264, %cst_159 {dimension_numbers = #tpu.dot_dimension_numbers<[2], [1], [1], [2], [0, 0, 0, 1, 1, 2], [0], [0]>} : vector<4x8x8xf32>, vector<4x8x16xf32>, vector<4x8x16xf32> -> vector<4x8x16xf32>
    "tpu.trace_stop"() : () -> ()
    %283 = vector.shape_cast %282 : vector<4x8x16xf32> to vector<32x16xf32>
    %284 = arith.truncf %283 : vector<32x16xf32> to vector<32x16xbf16>
    %c0_160 = arith.constant 0 : index
    %c2_161 = arith.constant 2 : index
    %c0_162 = arith.constant 0 : index
    %c0_163 = arith.constant 0 : index
    %285 = vector.load %arg6[%c0_160, %c2_161, %c0_162, %c0_163] : memref<1x4x16x32xbf16, #tpu.memory_space<vmem>>, vector<1x1x16x32xbf16>
    %286 = vector.shape_cast %285 : vector<1x1x16x32xbf16> to vector<16x32xbf16>
    %cst_164 = arith.constant dense<0.000000e+00> : vector<32x32xf32>
    %287 = tpu.matmul %284, %286, %cst_164 {dimension_numbers = #tpu.dot_dimension_numbers<[1], [0], [0], [1], [0, 0, 1, 1], [], []>} : vector<32x16xbf16>, vector<16x32xbf16>, vector<32x32xf32> -> vector<32x32xf32>
    %288 = arith.addf %237, %287 : vector<32x32xf32>
    %c0_165 = arith.constant 0 : index
    %c7 = arith.constant 7 : index
    %c0_166 = arith.constant 0 : index
    %c0_167 = arith.constant 0 : index
    %289 = vector.load %arg4[%c0_165, %c7, %c0_166, %c0_167] : memref<1x12x32x16xbf16, #tpu.memory_space<vmem>>, vector<1x1x32x16xbf16>
    %290 = vector.shape_cast %289 : vector<1x1x32x16xbf16> to vector<32x16xbf16>
    %cst_168 = arith.constant dense<0.000000e+00> : vector<32x16xf32>
    %291 = tpu.matmul %236, %290, %cst_168 {dimension_numbers = #tpu.dot_dimension_numbers<[1], [0], [0], [1], [0, 0, 1, 1], [], []>} : vector<32x32xbf16>, vector<32x16xbf16>, vector<32x16xf32> -> vector<32x16xf32>
    %c0_169 = arith.constant 0 : index
    %c7_170 = arith.constant 7 : index
    %c0_171 = arith.constant 0 : index
    %292 = vector.load %arg5[%c0_169, %c7_170, %c0_171] : memref<1x12x16xf32, #tpu.memory_space<vmem>>, vector<1x1x16xf32>
    %293 = vector.shape_cast %292 : vector<1x1x16xf32> to vector<16xf32>
    %294 = vector.shape_cast %293 : vector<16xf32> to vector<1x16xf32>
    %295 = vector.broadcast %294 : vector<1x16xf32> to vector<32x16xf32>
    %296 = arith.addf %291, %295 : vector<32x16xf32>
    %c0_172 = arith.constant 0 : index
    %c9 = arith.constant 9 : index
    %c0_173 = arith.constant 0 : index
    %c0_174 = arith.constant 0 : index
    %297 = vector.load %arg4[%c0_172, %c9, %c0_173, %c0_174] : memref<1x12x32x16xbf16, #tpu.memory_space<vmem>>, vector<1x1x32x16xbf16>
    %298 = vector.shape_cast %297 : vector<1x1x32x16xbf16> to vector<32x16xbf16>
    %cst_175 = arith.constant dense<0.000000e+00> : vector<32x16xf32>
    %299 = tpu.matmul %236, %298, %cst_175 {dimension_numbers = #tpu.dot_dimension_numbers<[1], [0], [0], [1], [0, 0, 1, 1], [], []>} : vector<32x32xbf16>, vector<32x16xbf16>, vector<32x16xf32> -> vector<32x16xf32>
    %c0_176 = arith.constant 0 : index
    %c9_177 = arith.constant 9 : index
    %c0_178 = arith.constant 0 : index
    %300 = vector.load %arg5[%c0_176, %c9_177, %c0_178] : memref<1x12x16xf32, #tpu.memory_space<vmem>>, vector<1x1x16xf32>
    %301 = vector.shape_cast %300 : vector<1x1x16xf32> to vector<16xf32>
    %302 = vector.shape_cast %301 : vector<16xf32> to vector<1x16xf32>
    %303 = vector.broadcast %302 : vector<1x16xf32> to vector<32x16xf32>
    %304 = arith.addf %299, %303 : vector<32x16xf32>
    %c0_179 = arith.constant 0 : index
    %c11 = arith.constant 11 : index
    %c0_180 = arith.constant 0 : index
    %c0_181 = arith.constant 0 : index
    %305 = vector.load %arg4[%c0_179, %c11, %c0_180, %c0_181] : memref<1x12x32x16xbf16, #tpu.memory_space<vmem>>, vector<1x1x32x16xbf16>
    %306 = vector.shape_cast %305 : vector<1x1x32x16xbf16> to vector<32x16xbf16>
    %cst_182 = arith.constant dense<0.000000e+00> : vector<32x16xf32>
    %307 = tpu.matmul %236, %306, %cst_182 {dimension_numbers = #tpu.dot_dimension_numbers<[1], [0], [0], [1], [0, 0, 1, 1], [], []>} : vector<32x32xbf16>, vector<32x16xbf16>, vector<32x16xf32> -> vector<32x16xf32>
    %c0_183 = arith.constant 0 : index
    %c11_184 = arith.constant 11 : index
    %c0_185 = arith.constant 0 : index
    %308 = vector.load %arg5[%c0_183, %c11_184, %c0_185] : memref<1x12x16xf32, #tpu.memory_space<vmem>>, vector<1x1x16xf32>
    %309 = vector.shape_cast %308 : vector<1x1x16xf32> to vector<16xf32>
    %310 = vector.shape_cast %309 : vector<16xf32> to vector<1x16xf32>
    %311 = vector.broadcast %310 : vector<1x16xf32> to vector<32x16xf32>
    %312 = arith.addf %307, %311 : vector<32x16xf32>
    %313 = vector.shape_cast %296 : vector<32x16xf32> to vector<4x8x16xf32>
    %314 = vector.shape_cast %304 : vector<32x16xf32> to vector<4x8x16xf32>
    %315 = vector.shape_cast %312 : vector<32x16xf32> to vector<4x8x16xf32>
    "tpu.trace_start"() <{level = 10 : i32, message = "bqd,bkd->bqk"}> : () -> ()
    %cst_186 = arith.constant dense<0.000000e+00> : vector<4x8x8xf32>
    %316 = tpu.matmul %313, %314, %cst_186 {dimension_numbers = #tpu.dot_dimension_numbers<[2], [2], [1], [1], [0, 0, 0, 1, 1, 1], [0], [0]>} : vector<4x8x16xf32>, vector<4x8x16xf32>, vector<4x8x8xf32> -> vector<4x8x8xf32>
    "tpu.trace_stop"() : () -> ()
    %317 = vector.broadcast %37 : vector<4x1x8xf32> to vector<4x8x8xf32>
    %318 = arith.addf %316, %317 : vector<4x8x8xf32>
    %cst_187 = arith.constant dense<0xFF800000> : vector<4x8xf32>
    %319 = vector.multi_reduction <maximumf>, %318, %cst_187 [2] : vector<4x8x8xf32> to vector<4x8xf32>
    %320 = vector.shape_cast %319 : vector<4x8xf32> to vector<4x8x1xf32>
    %321 = vector.broadcast %320 : vector<4x8x1xf32> to vector<4x8x8xf32>
    %322 = arith.subf %318, %321 : vector<4x8x8xf32>
    %323 = math.exp %322 : vector<4x8x8xf32>
    %cst_188 = arith.constant dense<0.000000e+00> : vector<4x8xf32>
    %324 = vector.multi_reduction <add>, %323, %cst_188 [2] : vector<4x8x8xf32> to vector<4x8xf32>
    %325 = vector.shape_cast %324 : vector<4x8xf32> to vector<4x8x1xf32>
    %326 = tpu.reciprocal %325 {approx = true} : vector<4x8x1xf32> -> vector<4x8x1xf32>
    %327 = arith.mulf %325, %326 : vector<4x8x1xf32>
    %cst_189 = arith.constant 2.000000e+00 : f32
    %328 = vector.broadcast %cst_189 : f32 to vector<4x8x1xf32>
    %329 = arith.subf %328, %327 : vector<4x8x1xf32>
    %330 = arith.mulf %326, %329 : vector<4x8x1xf32>
    %331 = vector.broadcast %330 : vector<4x8x1xf32> to vector<4x8x8xf32>
    %332 = arith.mulf %323, %331 : vector<4x8x8xf32>
    "tpu.trace_start"() <{level = 10 : i32, message = "bqk,bkd->bqd"}> : () -> ()
    %cst_190 = arith.constant dense<0.000000e+00> : vector<4x8x16xf32>
    %333 = tpu.matmul %332, %315, %cst_190 {dimension_numbers = #tpu.dot_dimension_numbers<[2], [1], [1], [2], [0, 0, 0, 1, 1, 2], [0], [0]>} : vector<4x8x8xf32>, vector<4x8x16xf32>, vector<4x8x16xf32> -> vector<4x8x16xf32>
    "tpu.trace_stop"() : () -> ()
    %334 = vector.shape_cast %333 : vector<4x8x16xf32> to vector<32x16xf32>
    %335 = arith.truncf %334 : vector<32x16xf32> to vector<32x16xbf16>
    %c0_191 = arith.constant 0 : index
    %c3_192 = arith.constant 3 : index
    %c0_193 = arith.constant 0 : index
    %c0_194 = arith.constant 0 : index
    %336 = vector.load %arg6[%c0_191, %c3_192, %c0_193, %c0_194] : memref<1x4x16x32xbf16, #tpu.memory_space<vmem>>, vector<1x1x16x32xbf16>
    %337 = vector.shape_cast %336 : vector<1x1x16x32xbf16> to vector<16x32xbf16>
    %cst_195 = arith.constant dense<0.000000e+00> : vector<32x32xf32>
    %338 = tpu.matmul %335, %337, %cst_195 {dimension_numbers = #tpu.dot_dimension_numbers<[1], [0], [0], [1], [0, 0, 1, 1], [], []>} : vector<32x16xbf16>, vector<16x32xbf16>, vector<32x32xf32> -> vector<32x32xf32>
    %339 = arith.addf %288, %338 : vector<32x32xf32>
    %c0_196 = arith.constant 0 : index
    %c1_197 = arith.constant 1 : index
    %c0_198 = arith.constant 0 : index
    %c0_199 = arith.constant 0 : index
    %340 = vector.load %arg10[%c0_196, %c1_197, %c0_198, %c0_199] : memref<1x2x6x32xf32, #tpu.memory_space<vmem>>, vector<1x1x1x32xf32>
    %341 = vector.shape_cast %340 : vector<1x1x1x32xf32> to vector<32xf32>
    %342 = vector.shape_cast %341 : vector<32xf32> to vector<1x32xf32>
    %343 = vector.broadcast %342 : vector<1x32xf32> to vector<32x32xf32>
    %344 = arith.addf %339, %343 : vector<32x32xf32>
    %345 = arith.addf %235, %344 : vector<32x32xf32>
    %c0_200 = arith.constant 0 : index
    %c1_201 = arith.constant 1 : index
    %c1_202 = arith.constant 1 : index
    %c0_203 = arith.constant 0 : index
    %346 = vector.load %arg10[%c0_200, %c1_201, %c1_202, %c0_203] : memref<1x2x6x32xf32, #tpu.memory_space<vmem>>, vector<1x1x1x32xf32>
    %347 = vector.shape_cast %346 : vector<1x1x1x32xf32> to vector<32xf32>
    %c0_204 = arith.constant 0 : index
    %c1_205 = arith.constant 1 : index
    %c2_206 = arith.constant 2 : index
    %c0_207 = arith.constant 0 : index
    %348 = vector.load %arg10[%c0_204, %c1_205, %c2_206, %c0_207] : memref<1x2x6x32xf32, #tpu.memory_space<vmem>>, vector<1x1x1x32xf32>
    %349 = vector.shape_cast %348 : vector<1x1x1x32xf32> to vector<32xf32>
    %cst_208 = arith.constant dense<0.000000e+00> : vector<32xf32>
    %350 = vector.multi_reduction <add>, %345, %cst_208 [1] : vector<32x32xf32> to vector<32xf32>
    %351 = vector.shape_cast %350 : vector<32xf32> to vector<32x1xf32>
    %cst_209 = arith.constant 3.200000e+01 : f32
    %352 = vector.broadcast %cst_209 : f32 to vector<32x1xf32>
    %353 = arith.divf %351, %352 : vector<32x1xf32>
    %354 = vector.broadcast %353 : vector<32x1xf32> to vector<32x32xf32>
    %355 = arith.subf %345, %354 : vector<32x32xf32>
    %356 = arith.mulf %355, %355 : vector<32x32xf32>
    %cst_210 = arith.constant dense<0.000000e+00> : vector<32xf32>
    %357 = vector.multi_reduction <add>, %356, %cst_210 [1] : vector<32x32xf32> to vector<32xf32>
    %358 = vector.shape_cast %357 : vector<32xf32> to vector<32x1xf32>
    %cst_211 = arith.constant 3.200000e+01 : f32
    %359 = vector.broadcast %cst_211 : f32 to vector<32x1xf32>
    %360 = arith.divf %358, %359 : vector<32x1xf32>
    %361 = vector.broadcast %353 : vector<32x1xf32> to vector<32x32xf32>
    %362 = arith.subf %345, %361 : vector<32x32xf32>
    %cst_212 = arith.constant 9.99999996E-13 : f32
    %363 = vector.broadcast %cst_212 : f32 to vector<32x1xf32>
    %364 = arith.addf %360, %363 : vector<32x1xf32>
    %365 = math.rsqrt %364 : vector<32x1xf32>
    %366 = vector.broadcast %365 : vector<32x1xf32> to vector<32x32xf32>
    %367 = arith.mulf %362, %366 : vector<32x32xf32>
    %368 = vector.shape_cast %347 : vector<32xf32> to vector<1x32xf32>
    %369 = vector.broadcast %368 : vector<1x32xf32> to vector<32x32xf32>
    %370 = arith.mulf %367, %369 : vector<32x32xf32>
    %371 = vector.shape_cast %349 : vector<32xf32> to vector<1x32xf32>
    %372 = vector.broadcast %371 : vector<1x32xf32> to vector<32x32xf32>
    %373 = arith.addf %370, %372 : vector<32x32xf32>
    %374 = arith.truncf %373 : vector<32x32xf32> to vector<32x32xbf16>
    %c0_213 = arith.constant 0 : index
    %c1_214 = arith.constant 1 : index
    %c0_215 = arith.constant 0 : index
    %c0_216 = arith.constant 0 : index
    %375 = vector.load %arg7[%c0_213, %c1_214, %c0_215, %c0_216] : memref<1x2x32x128xbf16, #tpu.memory_space<vmem>>, vector<1x1x32x128xbf16>
    %376 = vector.shape_cast %375 : vector<1x1x32x128xbf16> to vector<32x128xbf16>
    %cst_217 = arith.constant dense<0.000000e+00> : vector<32x128xf32>
    %377 = tpu.matmul %374, %376, %cst_217 {dimension_numbers = #tpu.dot_dimension_numbers<[1], [0], [0], [1], [0, 0, 1, 1], [], []>} : vector<32x32xbf16>, vector<32x128xbf16>, vector<32x128xf32> -> vector<32x128xf32>
    %c0_218 = arith.constant 0 : index
    %c1_219 = arith.constant 1 : index
    %c0_220 = arith.constant 0 : index
    %378 = vector.load %arg8[%c0_218, %c1_219, %c0_220] : memref<1x2x128xf32, #tpu.memory_space<vmem>>, vector<1x1x128xf32>
    %379 = vector.shape_cast %378 : vector<1x1x128xf32> to vector<128xf32>
    %380 = vector.shape_cast %379 : vector<128xf32> to vector<1x128xf32>
    %381 = vector.broadcast %380 : vector<1x128xf32> to vector<32x128xf32>
    %382 = arith.addf %377, %381 : vector<32x128xf32>
    %383 = arith.mulf %382, %382 : vector<32x128xf32>
    %384 = arith.mulf %382, %383 : vector<32x128xf32>
    %cst_221 = arith.constant 4.471500e-02 : f32
    %385 = vector.broadcast %cst_221 : f32 to vector<32x128xf32>
    %386 = arith.mulf %385, %384 : vector<32x128xf32>
    %387 = arith.addf %382, %386 : vector<32x128xf32>
    %cst_222 = arith.constant 0.797884583 : f32
    %388 = vector.broadcast %cst_222 : f32 to vector<32x128xf32>
    %389 = arith.mulf %388, %387 : vector<32x128xf32>
    %390 = math.tanh %389 : vector<32x128xf32>
    %cst_223 = arith.constant 1.000000e+00 : f32
    %391 = vector.broadcast %cst_223 : f32 to vector<32x128xf32>
    %392 = arith.addf %391, %390 : vector<32x128xf32>
    %cst_224 = arith.constant 5.000000e-01 : f32
    %393 = vector.broadcast %cst_224 : f32 to vector<32x128xf32>
    %394 = arith.mulf %393, %392 : vector<32x128xf32>
    %395 = arith.mulf %382, %394 : vector<32x128xf32>
    %396 = arith.truncf %395 : vector<32x128xf32> to vector<32x128xbf16>
    %c0_225 = arith.constant 0 : index
    %c1_226 = arith.constant 1 : index
    %c0_227 = arith.constant 0 : index
    %c0_228 = arith.constant 0 : index
    %397 = vector.load %arg9[%c0_225, %c1_226, %c0_227, %c0_228] : memref<1x2x128x32xbf16, #tpu.memory_space<vmem>>, vector<1x1x128x32xbf16>
    %398 = vector.shape_cast %397 : vector<1x1x128x32xbf16> to vector<128x32xbf16>
    %cst_229 = arith.constant dense<0.000000e+00> : vector<32x32xf32>
    %399 = tpu.matmul %396, %398, %cst_229 {dimension_numbers = #tpu.dot_dimension_numbers<[1], [0], [0], [1], [0, 0, 1, 1], [], []>} : vector<32x128xbf16>, vector<128x32xbf16>, vector<32x32xf32> -> vector<32x32xf32>
    %c0_230 = arith.constant 0 : index
    %c1_231 = arith.constant 1 : index
    %c3_232 = arith.constant 3 : index
    %c0_233 = arith.constant 0 : index
    %400 = vector.load %arg10[%c0_230, %c1_231, %c3_232, %c0_233] : memref<1x2x6x32xf32, #tpu.memory_space<vmem>>, vector<1x1x1x32xf32>
    %401 = vector.shape_cast %400 : vector<1x1x1x32xf32> to vector<32xf32>
    %402 = vector.shape_cast %401 : vector<32xf32> to vector<1x32xf32>
    %403 = vector.broadcast %402 : vector<1x32xf32> to vector<32x32xf32>
    %404 = arith.addf %399, %403 : vector<32x32xf32>
    %405 = arith.addf %373, %404 : vector<32x32xf32>
    %c0_234 = arith.constant 0 : index
    %c1_235 = arith.constant 1 : index
    %c4_236 = arith.constant 4 : index
    %c0_237 = arith.constant 0 : index
    %406 = vector.load %arg10[%c0_234, %c1_235, %c4_236, %c0_237] : memref<1x2x6x32xf32, #tpu.memory_space<vmem>>, vector<1x1x1x32xf32>
    %407 = vector.shape_cast %406 : vector<1x1x1x32xf32> to vector<32xf32>
    %c0_238 = arith.constant 0 : index
    %c1_239 = arith.constant 1 : index
    %c5_240 = arith.constant 5 : index
    %c0_241 = arith.constant 0 : index
    %408 = vector.load %arg10[%c0_238, %c1_239, %c5_240, %c0_241] : memref<1x2x6x32xf32, #tpu.memory_space<vmem>>, vector<1x1x1x32xf32>
    %409 = vector.shape_cast %408 : vector<1x1x1x32xf32> to vector<32xf32>
    %cst_242 = arith.constant dense<0.000000e+00> : vector<32xf32>
    %410 = vector.multi_reduction <add>, %405, %cst_242 [1] : vector<32x32xf32> to vector<32xf32>
    %411 = vector.shape_cast %410 : vector<32xf32> to vector<32x1xf32>
    %cst_243 = arith.constant 3.200000e+01 : f32
    %412 = vector.broadcast %cst_243 : f32 to vector<32x1xf32>
    %413 = arith.divf %411, %412 : vector<32x1xf32>
    %414 = vector.broadcast %413 : vector<32x1xf32> to vector<32x32xf32>
    %415 = arith.subf %405, %414 : vector<32x32xf32>
    %416 = arith.mulf %415, %415 : vector<32x32xf32>
    %cst_244 = arith.constant dense<0.000000e+00> : vector<32xf32>
    %417 = vector.multi_reduction <add>, %416, %cst_244 [1] : vector<32x32xf32> to vector<32xf32>
    %418 = vector.shape_cast %417 : vector<32xf32> to vector<32x1xf32>
    %cst_245 = arith.constant 3.200000e+01 : f32
    %419 = vector.broadcast %cst_245 : f32 to vector<32x1xf32>
    %420 = arith.divf %418, %419 : vector<32x1xf32>
    %421 = vector.broadcast %413 : vector<32x1xf32> to vector<32x32xf32>
    %422 = arith.subf %405, %421 : vector<32x32xf32>
    %cst_246 = arith.constant 9.99999996E-13 : f32
    %423 = vector.broadcast %cst_246 : f32 to vector<32x1xf32>
    %424 = arith.addf %420, %423 : vector<32x1xf32>
    %425 = math.rsqrt %424 : vector<32x1xf32>
    %426 = vector.broadcast %425 : vector<32x1xf32> to vector<32x32xf32>
    %427 = arith.mulf %422, %426 : vector<32x32xf32>
    %428 = vector.shape_cast %407 : vector<32xf32> to vector<1x32xf32>
    %429 = vector.broadcast %428 : vector<1x32xf32> to vector<32x32xf32>
    %430 = arith.mulf %427, %429 : vector<32x32xf32>
    %431 = vector.shape_cast %409 : vector<32xf32> to vector<1x32xf32>
    %432 = vector.broadcast %431 : vector<1x32xf32> to vector<32x32xf32>
    %433 = arith.addf %430, %432 : vector<32x32xf32>
    %434 = vector.shape_cast %433 : vector<32x32xf32> to vector<4x8x32xf32>
    %435 = vector.shape_cast %3 : vector<4x8xf32> to vector<4x8x1xf32>
    %436 = vector.broadcast %435 : vector<4x8x1xf32> to vector<4x8x32xf32>
    %437 = arith.mulf %434, %436 : vector<4x8x32xf32>
    %cst_247 = arith.constant dense<0.000000e+00> : vector<4x32xf32>
    %438 = vector.multi_reduction <add>, %437, %cst_247 [1] : vector<4x8x32xf32> to vector<4x32xf32>
    %cst_248 = arith.constant dense<0.000000e+00> : vector<4x1xf32>
    %439 = vector.multi_reduction <add>, %435, %cst_248 [1] : vector<4x8x1xf32> to vector<4x1xf32>
    %cst_249 = arith.constant 9.99999974E-5 : f32
    %440 = vector.broadcast %cst_249 : f32 to vector<4x1xf32>
    %441 = arith.maximumf %439, %440 : vector<4x1xf32>
    %442 = tpu.reciprocal %441 {approx = true} : vector<4x1xf32> -> vector<4x1xf32>
    %443 = arith.mulf %441, %442 : vector<4x1xf32>
    %cst_250 = arith.constant 2.000000e+00 : f32
    %444 = vector.broadcast %cst_250 : f32 to vector<4x1xf32>
    %445 = arith.subf %444, %443 : vector<4x1xf32>
    %446 = arith.mulf %442, %445 : vector<4x1xf32>
    %447 = vector.broadcast %446 : vector<4x1xf32> to vector<4x32xf32>
    %448 = arith.mulf %438, %447 : vector<4x32xf32>
    %c0_251 = arith.constant 0 : index
    %c0_252 = arith.constant 0 : index
    %c0_253 = arith.constant 0 : index
    %449 = vector.load %arg11[%c0_251, %c0_252, %c0_253] : memref<1x4x32xf32, #tpu.memory_space<vmem>>, vector<1x4x32xf32>
    %450 = vector.shape_cast %449 : vector<1x4x32xf32> to vector<4x32xf32>
    %451 = vector.shape_cast %448 : vector<4x32xf32> to vector<1x4x32xf32>
    tpu.vector_store %arg11[%c0_251, %c0_252, %c0_253], %451 {strides = array<i32>} : memref<1x4x32xf32, #tpu.memory_space<vmem>>, vector<1x4x32xf32>,
    return
  }
  func.func @transform_0(%arg0: i32) -> (i32, i32, i32, i32) {
    %c0_i32 = arith.constant 0 : i32
    %c0_i32_0 = arith.constant 0 : i32
    %c0_i32_1 = arith.constant 0 : i32
    %c0_i32_2 = arith.constant 0 : i32
    return %arg0, %c0_i32, %c0_i32_0, %c0_i32_1 : i32, i32, i32, i32
  }
  func.func @transform_1(%arg0: i32) -> (i32, i32, i32) {
    %c0_i32 = arith.constant 0 : i32
    %c0_i32_0 = arith.constant 0 : i32
    %c0_i32_1 = arith.constant 0 : i32
    return %arg0, %c0_i32, %c0_i32_0 : i32, i32, i32
  }
  func.func @transform_2(%arg0: i32) -> (i32, i32, i32) {
    %c0_i32 = arith.constant 0 : i32
    %c0_i32_0 = arith.constant 0 : i32
    %c0_i32_1 = arith.constant 0 : i32
    return %arg0, %c0_i32, %c0_i32_0 : i32, i32, i32
  }
  func.func @transform_3(%arg0: i32) -> (i32, i32, i32, i32) {
    %c0_i32 = arith.constant 0 : i32
    %c0_i32_0 = arith.constant 0 : i32
    %c0_i32_1 = arith.constant 0 : i32
    %c0_i32_2 = arith.constant 0 : i32
    return %arg0, %c0_i32, %c0_i32_0, %c0_i32_1 : i32, i32, i32, i32
  }
  func.func @transform_4(%arg0: i32) -> (i32, i32, i32) {
    %c0_i32 = arith.constant 0 : i32
    %c0_i32_0 = arith.constant 0 : i32
    %c0_i32_1 = arith.constant 0 : i32
    return %arg0, %c0_i32, %c0_i32_0 : i32, i32, i32
  }
  func.func @transform_5(%arg0: i32) -> (i32, i32, i32, i32) {
    %c0_i32 = arith.constant 0 : i32
    %c0_i32_0 = arith.constant 0 : i32
    %c0_i32_1 = arith.constant 0 : i32
    %c0_i32_2 = arith.constant 0 : i32
    return %arg0, %c0_i32, %c0_i32_0, %c0_i32_1 : i32, i32, i32, i32
  }
  func.func @transform_6(%arg0: i32) -> (i32, i32, i32, i32) {
    %c0_i32 = arith.constant 0 : i32
    %c0_i32_0 = arith.constant 0 : i32
    %c0_i32_1 = arith.constant 0 : i32
    %c0_i32_2 = arith.constant 0 : i32
    return %arg0, %c0_i32, %c0_i32_0, %c0_i32_1 : i32, i32, i32, i32
  }
  func.func @transform_7(%arg0: i32) -> (i32, i32, i32) {
    %c0_i32 = arith.constant 0 : i32
    %c0_i32_0 = arith.constant 0 : i32
    %c0_i32_1 = arith.constant 0 : i32
    return %arg0, %c0_i32, %c0_i32_0 : i32, i32, i32
  }
  func.func @transform_8(%arg0: i32) -> (i32, i32, i32, i32) {
    %c0_i32 = arith.constant 0 : i32
    %c0_i32_0 = arith.constant 0 : i32
    %c0_i32_1 = arith.constant 0 : i32
    %c0_i32_2 = arith.constant 0 : i32
    return %arg0, %c0_i32, %c0_i32_0, %c0_i32_1 : i32, i32, i32, i32
  }
  func.func @transform_9(%arg0: i32) -> (i32, i32, i32, i32) {
    %c0_i32 = arith.constant 0 : i32
    %c0_i32_0 = arith.constant 0 : i32
    %c0_i32_1 = arith.constant 0 : i32
    %c0_i32_2 = arith.constant 0 : i32
    return %arg0, %c0_i32, %c0_i32_0, %c0_i32_1 : i32, i32, i32, i32
  }
  func.func @transform_10(%arg0: i32) -> (i32, i32, i32) {
    %c0_i32 = arith.constant 0 : i32
    %c0_i32_0 = arith.constant 0 : i32
    %c0_i32_1 = arith.constant 0 : i32
    return %arg0, %c0_i32, %c0_i32_0 : i32, i32, i32
  }
}

</mosaic_0001>

<bundles_post_ra>
// kernel: custom_bert_forward.1
= control target key start
LH: loop header
LB: loop body
LE: loop exit
PB: predicated region body
PF: predicated region fallthrough
CT: control target
= control target key end

     0   :  { %s6489_s13 = smov 0   ;;  %s7120_s0 = inlined_call_operand.vmem [shape: f32[2,4,8,32], index: 0, kind: input, shape index: {}]   ;;  %s7121_s1 = inlined_call_operand.vmem [shape: f32[2,4,8], index: 1, kind: input, shape index: {}]   ;;  %s7122_s2 = inlined_call_operand.vmem [shape: f32[2,2,32], index: 2, kind: input, shape index: {}]   ;;  %s7123_s3 = inlined_call_operand.vmem [shape: bf16[2,12,32,16], index: 3, kind: input, shape index: {}]   ;;  %s7124_s4 = inlined_call_operand.vmem [shape: f32[2,12,16], index: 4, kind: input, shape index: {}]   ;;  %s7125_s5 = inlined_call_operand.vmem [shape: bf16[2,4,16,32], index: 5, kind: input, shape index: {}]   ;;  %s7126_s6 = inlined_call_operand.vmem [shape: bf16[2,2,32,128], index: 6, kind: input, shape index: {}]   ;;  %s7127_s7 = inlined_call_operand.vmem [shape: f32[2,2,128], index: 7, kind: input, shape index: {}]   ;;  %s7128_s8 = inlined_call_operand.vmem [shape: bf16[2,2,128,32], index: 8, kind: input, shape index: {}]   ;;  %s7129_s9 = inlined_call_operand.vmem [shape: f32[2,2,6,32], index: 9, kind: input, shape index: {}]   ;;  %s7130_s10 = inlined_call_operand.vmem [shape: f32[2,4,32], index: 10, kind: output, shape index: {}]  }
   0x1 LB: > { %s5472_s14 = sadd.s32 4294967295, %s6429_s13   ;;  %p5476_p0 = scmp.ge.s32.totalorder %s6429_s13, 1  ;;  %s6429_s13 = sphi %s6489_s13, %s20_s13  }
   0x2   : > { %p399_p1 = scmp.lt.s32.totalorder %s6429_s13, 3 }
   0x4   : > { %p400_p2 = pnand %p5476_p0, %p399_p1 }
   0x5   : > { %p478_p3 = scmp.lt.s32.totalorder (!%p400_p2), %s5472_s14, 1  ;;  %vm537_vm0 = vcmask (!%p400_p2), 261120   ;;  %vm6432_vm1 = vmmov (!%p400_p2), 0   ;;  %vm885_vm2 = vcmask (!%p400_p2), 130048   ;;  %vm1190_vm3 = vcmask (!%p400_p2), 64512  }
   0x6   : > { %403 = sbr.rel (%p400_p2) target bundleno = 6522 (0x197a), region = 60  ;;  %vm5302_vm4 = vcmask (!%p400_p2), 1041409   ;;  %vm5304_vm5 = vcmask (!%p400_p2), 1042434   ;;  %vm5306_vm6 = vcmask (!%p400_p2), 1043459   ;;  %vm5309_vm7 = vcmask (!%p400_p2), 257024  }
   0xd   : > { %s7132_s14 = smov (!%p478_p3, %s5472_s14), 1 }
   0xe   : > { %s5732_s15 = sshll.u32 %s7132_s14, 5  ;;  %s6234_s16 = smul.u32 192, %s7132_s14 }
   0xf   : > { %s482_s19 = scalar_lea.vmem %s7120_s0, %s5732_s15  ;;  %s5736_s23 = sshll.u32 %s7132_s14, 7 }
  0x10   : > { %v530_v0 = vld [vmem:[%s482_s19] sm:$0xff]  ;;  %v532_v1 = vld [vmem:[%s482_s19 + $0x10] sm:$0xff]  ;;  %v531_v2 = vld [vmem:[%s482_s19 + $0x8] sm:$0xff]  ;;  %s6507_s22 = scalar_lea.vmem %s7123_s3, %s6234_s16  ;;  %s6517_s26 = scalar_lea.vmem %s7125_s5, %s5732_s15 }
  0x11   : > { %v538_v3 = vsel %vm537_vm0, %v530_v0, 0.0  ;;  %v544_v4 = vsel %vm537_vm0, %v532_v1, 0.0  ;;  %v533_v5 = vld [vmem:[%s482_s19 + $0x18] sm:$0xff]  ;;  %v541_v6 = vsel %vm537_vm0, %v531_v2, 0.0  ;;  %s6522_s29 = scalar_lea.vmem %s7126_s6, %s5732_s15  ;;  %s6527_s12 = scalar_lea.vmem %s7128_s8, %s5736_s23  ;;  %v6246_v28 = vld [vmem:[%s6507_s22] sm:$0xff]   ;;  %v6248_v30 = vld [vmem:[%s6507_s22 + $0x8] sm:$0xff]  }
  0x12   : > { %539 = vadd.xlane.f32.xlu0 %v538_v3  ;;  %545 = vadd.xlane.f32.xlu1 %v544_v4  ;;  %v547_v7 = vsel %vm537_vm0, %v533_v5, 0.0  ;;  %v6247_v29 = vld [vmem:[%s6507_s22 + $0x20] sm:$0xff]   ;;  %v6249_v31 = vld [vmem:[%s6507_s22 + $0x28] sm:$0xff]   ;;  %s5480_s15 = sshll.u32 %s7132_s14, 1  ;;  %s5733_s19 = sshll.u32 %s7132_s14, 4 }
  0x13   : > { %5890 = vmatprep.subr.bf16.mxu0 %v6246_v28  ;;  %5898 = vmatprep.subr.bf16.mxu1 %v6247_v29  ;;  %v6250_v32 = vld [vmem:[%s6507_s22 + $0x40] sm:$0xff]   ;;  %s490_s18 = scalar_lea.vmem %s7122_s2, %s5480_s15  ;;  %s6585_s23 = scalar_lea.vmem %s7124_s4, %s5733_s19 }
  0x14   : > { %5891 = vmatpush3.bf16.msra.mxu0 %v6246_v28  ;;  %5899 = vmatpush3.bf16.msra.mxu1 %v6247_v29  ;;  %v5494_v47 = vld [vmem:[%s490_s18] ss:$0 sm:$0xff]  ;;  %v5495_v52 = vld [vmem:[%s490_s18 + $0x1] ss:$0 sm:$0xff]  ;;  %v5505_v3 = vld [vmem:[%s6585_s23 + $0x2] ss:$0 sm:$0xff]  ;;  %s6769_s16 = scalar_lea.vmem %s7129_s9, %s5733_s19  ;;  %s6816_s19 = scalar_lea.vmem %s7127_s7, %s5480_s15 }
  0x15   : > { %5892 = vmatprep.subr.bf16.mxu0 %v6248_v30  ;;  %5900 = vmatprep.subr.bf16.mxu1 %v6249_v31  ;;  %s5479_s24 = sshll.u32 %s7132_s14, 2 }
  0x16   : > { %542 = vadd.xlane.f32.xlu0 %v541_v6  ;;  %548 = vadd.xlane.f32.xlu1 %v547_v7  ;;  %v5496_v6 = vld [vmem:[%s6585_s23] ss:$0 sm:$0xff]  ;;  %s6622_s28 = scalar_lea.vmem %s7121_s1, %s5479_s24 }
  0x18   : > { %5893 = vmatpush3.bf16.msra.mxu0 %v6248_v30  ;;  %5901 = vmatpush3.bf16.msra.mxu1 %v6249_v31  ;;  %v6433_v30 = vmov 1966171168  }
  0x19   : > { %5906 = vmatprep.subr.bf16.mxu0 %v6250_v32  ;;  %v610_v31 = vunpack.c.l.s4 %v6433_v30 }
  0x9f   : > { %v540_v8 = vpop.xlane.xlu0 %539  ;;  %v546_v9 = vpop.xlane.xlu1 %545 }
  0xa0   : > { %v551_v10 = vmul.f32 0.03125, %v540_v8  ;;  %v553_v11 = vmul.f32 0.03125, %v546_v9 }
  0xa2   : > { %v555_v12 = vsub.f32 %v530_v0, %v551_v10  ;;  %v557_v13 = vsub.f32 %v532_v1, %v553_v11  ;;  %v6251_v1 = vld [vmem:[%s6507_s22 + $0x48] sm:$0xff]  }
  0xa3   : > { %v543_v14 = vpop.xlane.xlu0 %542  ;;  %v549_v15 = vpop.xlane.xlu1 %548 }
  0xa4   : > { %v552_v16 = vmul.f32 0.03125, %v543_v14  ;;  %v554_v17 = vmul.f32 0.03125, %v549_v15  ;;  %v559_v18 = vmul.f32 %v555_v12, %v555_v12  ;;  %v561_v19 = vmul.f32 %v557_v13, %v557_v13 }
  0xa6   : > { %v556_v20 = vsub.f32 %v531_v2, %v552_v16  ;;  %v558_v21 = vsub.f32 %v533_v5, %v554_v17  ;;  %v563_v22 = vsel %vm537_vm0, %v559_v18, 0.0  ;;  %v569_v23 = vsel %vm537_vm0, %v561_v19, 0.0  ;;  %v5514_v18 = vld [vmem:[%s6585_s23 + $0x4] ss:$0 sm:$0xff] }
  0xa7   : > { %564 = vadd.xlane.f32.xlu0 %v563_v22  ;;  %v6431_v2 = vmov 0.0  }
  0xa8   : > { %v560_v24 = vmul.f32 %v556_v20, %v556_v20  ;;  %v562_v25 = vmul.f32 %v558_v21, %v558_v21  ;;  %5914 = vmatprep.subr.mxu1 %v6431_v2 }
  0xaa   : > { %v566_v26 = vsel %vm537_vm0, %v560_v24, 0.0  ;;  %v572_v27 = vsel %vm537_vm0, %v562_v25, 0.0 }
  0xab   : > { %570 = vadd.xlane.f32.xlu0 %v569_v23  ;;  %567 = vadd.xlane.f32.xlu1 %v566_v26 }
  0xaf   : > { %573 = vadd.xlane.f32.xlu1 %v572_v27 }
 0x134   : > { %v565_v33 = vpop.xlane.xlu0 %564 }
 0x135   : > { %v575_v34 = vmul.f32 0.03125, %v565_v33  ;;  %v611_v33 = vunpack.c.0.s8 %v610_v31 }
 0x137   : > { %v579_v35 = vadd.f32 1e-12, %v575_v34 }
 0x138   : > { %v568_v36 = vpop.xlane.xlu1 %567  ;;  %v571_v37 = vpop.xlane.xlu0 %570 }
 0x139   : > { %6294 = vrsqrt.f32 %v579_v35  ;;  %v576_v38 = vmul.f32 0.03125, %v568_v36  ;;  %v577_v39 = vmul.f32 0.03125, %v571_v37  ;;  %v534_v35 = vld [vmem:[%s6622_s28] sm:$0xf] }
 0x13a   : > { %v607_v36 = vsub.f32 1.0, %v534_v35 }
 0x13b   : > { %v580_v40 = vadd.f32 1e-12, %v576_v38  ;;  %v581_v41 = vadd.f32 1e-12, %v577_v39 }
 0x13c   : > { %v574_v42 = vpop.xlane.xlu1 %573 }
 0x13d   : > { %6296 = vrsqrt.f32 %v580_v40  ;;  %v578_v43 = vmul.f32 0.03125, %v574_v42 }
 0x13e   : > { %6298 = vrsqrt.f32 %v581_v41 }
 0x13f   : > { %v582_v44 = vadd.f32 1e-12, %v578_v43 }
 0x141   : > { %6300 = vrsqrt.f32 %v582_v44 }
 0x143   : > { %v6295_v45 = vpop.eup %6294 }
 0x144   : > { %v587_v46 = vmul.f32 %v6295_v45, %v555_v12 }
 0x146   : > { %v595_v50 = vmul.f32 %v5494_v47, %v587_v46 }
 0x147   : > { %v6297_v48 = vpop.eup %6296 }
 0x148   : > { %v6299_v49 = vpop.eup %6298  ;;  %v588_v51 = vmul.f32 %v6297_v48, %v556_v20  ;;  %v6544_v56 = vadd.f32 %v5495_v52, %v595_v50 }
 0x149   : > { %v589_v53 = vmul.f32 %v6299_v49, %v557_v13 }
 0x14a   : > { %v596_v54 = vmul.f32 %v5494_v47, %v588_v51 }
 0x14b   : > { %v6301_v55 = vpop.eup %6300  ;;  %v597_v58 = vmul.f32 %v5494_v47, %v589_v53 }
 0x14c   : > { %v6546_v57 = vadd.f32 %v5495_v52, %v596_v54  ;;  %v590_v59 = vmul.f32 %v6301_v55, %v558_v21 }
 0x14d   : > { %v6552_v62 = vadd.f32 %v5495_v52, %v597_v58 }
 0x14e   : > { %v598_v60 = vmul.f32 %v5494_v47, %v590_v59  ;;  %v6550_v61 = vpack.c.bf16 %v6546_v57, %v6544_v56 }
 0x150   : > { %v6554_v63 = vadd.f32 %v5495_v52, %v598_v60  ;;  %5894 = vmatprep.mubr.msk.bf16.mxu0 %vm537_vm0, %v6550_v61  ;;  %5902 = vmatprep.mubr.msk.bf16.mxu1 %vm537_vm0, %v6550_v61 }
 0x152   : > { %v6562_v0 = vpack.c.bf16 %v6554_v63, %v6552_v62 }
 0x154   : > { %5895 = vmatmul.mubr.msk.bf16.vlgmr.msra.gmra.mrb[0].mxu0 %vm537_vm0, %v6562_v0  ;;  %5903 = vmatmul.mubr.msk.bf16.vlgmr.msra.gmra.mrb[0].mxu1 %vm537_vm0, %v6562_v0 }
 0x155   : > { %5907 = vmatpush3.bf16.msra.mxu0 %v6250_v32  ;;  %5910 = vmatprep.mubr.msk.bf16.mxu0 %vm537_vm0, %v6550_v61  ;;  %v612_v32 = vlaneseq }
 0x156   : > { %5908 = vmatprep.subr.bf16.mxu0 %v6251_v1  ;;  %5916 = vmatprep.mubr.msk.f32.mxu1 %vm6432_vm1, %v6431_v2 }
 0x157   : > { %v6624_v34 = vshrl.u32 %v612_v32, 7 }
 0x159   : > { %5909 = vmatpush3.bf16.msra.mxu0 %v6251_v1  ;;  %v614_v37 = vsub.s32 %v611_v33, %v6624_v34  ;;  %v6629_v42 = vsub.s32 0, %v6624_v34 }
 0x15a   : > { %5924 = vmatprep.subr.mxu0 %v6431_v2 }
 0x15b   : > { %v615_v38 = vrot.slane %v607_v36, %v614_v37 }
 0x15c   : > { %5911 = vmatmul.mubr.msk.bf16.vlgmr.msra.gmra.mrb[4].mxu0 %vm537_vm0, %v6562_v0 }
 0x15d   : > { %5926 = vmatprep.mubr.msk.f32.mxu0 %vm6432_vm1, %v6431_v2  ;;  %v623_v39 = vrot.slane %v615_v38, %v614_v37  ;;  %v616_v40 = vcombine.high %v615_v38, %v615_v38 }
 0x15f   : > { %v631_v41 = vcombine.high %v623_v39, %v623_v39  ;;  %v637_v43 = vmul.f32 -10000.0, %v623_v39  ;;  %v630_v44 = vrot.slane %v616_v40, %v614_v37 }
 0x161   : > { %v639_v45 = vmul.f32 -10000.0, %v631_v41  ;;  %v6632_v46 = vrot.slane %v637_v43, %v6629_v42  ;;  %v638_v47 = vmul.f32 -10000.0, %v630_v44  ;;  %v632_v48 = vcombine.high %v630_v44, %v630_v44 }
 0x163   : > { %v6635_v49 = vrot.slane %v639_v45, %v6629_v42  ;;  %v6639_v55 = vrot.slane %v638_v47, %v6629_v42  ;;  %v640_v58 = vmul.f32 -10000.0, %v632_v48 }
 0x227   : > { %v5896_v4 = vpop.f32.mrb[0].mxu0  ;;  %v5904_v5 = vpop.f32.mrb[0].mxu1 }
 0x228   : > { %v784_v7 = vadd.f32 %v5904_v5, %v5505_v3  ;;  %v704_v8 = vpop.f32.mrb[1].mxu0  ;;  %v775_v9 = vpop.f32.mrb[1].mxu1  ;;  %v713_v15 = vadd.f32 %v5896_v4, %v5496_v6  ;;  %v6645_v5 = vrot.slane %v640_v58, %v6629_v42 }
 0x229   : > { %v776_v10 = vadd.f32 %v5505_v3, %v775_v9  ;;  %v5897_v11 = vpop.f32.mrb[2].mxu0  ;;  %v5905_v12 = vpop.f32.mrb[2].mxu1  ;;  %v705_v16 = vadd.f32 %v5496_v6, %v704_v8 }
 0x22a   : > { %v707_v13 = vpop.f32.mrb[3].mxu0  ;;  %v778_v14 = vpop.f32.mrb[3].mxu1  ;;  %5925 = vmatpush3.xpose.msk.msra.mxu0 %vm885_vm2, %v784_v7  ;;  %v787_v23 = vadd.f32 %v5905_v12, %v5505_v3  ;;  %v716_v28 = vadd.f32 %v5897_v11, %v5496_v6 }
 0x22b   : > { %5915 = vmatpush3.xpose.msk.msra.mxu1 %vm885_vm2, %v776_v10  ;;  %5934 = vmatprep.subr.mxu0 %v6431_v2  ;;  %v779_v17 = vadd.f32 %v5505_v3, %v778_v14  ;;  %v708_v20 = vadd.f32 %v5496_v6, %v707_v13 }
 0x22c   : > { %5919 = vmatprep.subr.mxu1 %v6431_v2 }
 0x22d   : > { %5927 = vmatmul.mubr.msk.f32.vlgmr.msra.gmra.mrb[8].mxu0 %vm885_vm2, %v713_v15 }
 0x22e   : > { %5917 = vmatmul.mubr.msk.f32.vlgmr.msra.gmra.mrb[4].mxu1 %vm885_vm2, %v705_v16  ;;  %5936 = vmatprep.mubr.msk.f32.mxu0 %vm6432_vm1, %v6431_v2 }
 0x22f   : > { %v5912_v19 = vpop.f32.mrb[4].mxu0  ;;  %5920 = vmatpush3.xpose.msk.msra.mxu1 %vm885_vm2, %v779_v17  ;;  %5921 = vmatprep.mubr.msk.f32.mxu1 %vm6432_vm1, %v6431_v2 }
 0x230   : > { %v6601_v21 = vadd.f32 %v5912_v19, %v5514_v18  ;;  %v846_v22 = vpop.f32.mrb[5].mxu0  ;;  %5929 = vmatprep.subr.mxu1 %v6431_v2 }
 0x231   : > { %v847_v24 = vadd.f32 %v5514_v18, %v846_v22  ;;  %v5913_v25 = vpop.f32.mrb[6].mxu0 }
 0x232   : > { %v6604_v26 = vadd.f32 %v5913_v25, %v5514_v18  ;;  %v849_v27 = vpop.f32.mrb[7].mxu0  ;;  %5922 = vmatmul.mubr.msk.f32.vlgmr.msra.gmra.mrb[6].mxu1 %vm885_vm2, %v708_v20 }
 0x233   : > { %5930 = vmatpush3.xpose.msk.msra.mxu1 %vm885_vm2, %v787_v23  ;;  %5935 = vmatpush3.msra.mxu0 %v847_v24  ;;  %v850_v29 = vadd.f32 %v5514_v18, %v849_v27 }
 0x234   : > { %5931 = vmatprep.mubr.msk.f32.mxu1 %vm6432_vm1, %v6431_v2  ;;  %5939 = vmatprep.subr.mxu1 %v6431_v2 }
 0x235   : > { %5944 = vmatprep.subr.mxu0 %v6431_v2 }
 0x236   : > { %5932 = vmatmul.mubr.msk.f32.vlgmr.msra.gmra.mrb[8].mxu1 %vm885_vm2, %v716_v28 }
 0x237   : > { %5940 = vmatpush3.msra.mxu1 %v850_v29  ;;  %5941 = vmatprep.mubr.msk.f32.mxu1 %vm6432_vm1, %v6431_v2 }
 0x238   : > { %5949 = vmatprep.subr.mxu1 %v6431_v2 }
 0x300   : > { %v1110_v50 = vpop.f32.mrb[8].mxu0 }
 0x301   : > { %v958_v51 = vpop.f32.mrb[4].mxu1  ;;  %v5928_v52 = vpop.f32.mrb[9].mxu0  ;;  %v1111_v59 = vadd.f32 %v1110_v50, %v6635_v49 }
 0x302   : > { %v959_v53 = vadd.f32 %v958_v51, %v6632_v46  ;;  %v5918_v54 = vpop.f32.mrb[5].mxu1  ;;  %v6252_v52 = vld [vmem:[%s6507_s22 + $0x10] sm:$0xff]  }
 0x303   : > { %v1197_v6 = vsel %vm1190_vm3, %v1111_v59, -inf }
 0x304   : > { %v1191_v60 = vsel %vm1190_vm3, %v959_v53, -inf }
 0x305   : > { %1192 = vmax.xlane.f32.xlu1 %v1191_v60  ;;  %v1034_v1 = vpop.f32.mrb[6].mxu1 }
 0x306   : > { %v1035_v3 = vadd.f32 %v1034_v1, %v6639_v55  ;;  %v5923_v4 = vpop.f32.mrb[7].mxu1 }
 0x308   : > { %v1194_v7 = vsel %vm1190_vm3, %v1035_v3, -inf }
 0x309   : > { %1198 = vmax.xlane.f32.xlu1 %v1197_v6  ;;  %1195 = vmax.xlane.f32.xlu0 %v1194_v7  ;;  %v1186_v8 = vpop.f32.mrb[8].mxu1  ;;  %v6253_v6 = vld [vmem:[%s6507_s22 + $0x18] sm:$0xff]   ;;  %v6254_v7 = vld [vmem:[%s6507_s22 + $0x30] sm:$0xff]  }
 0x30a   : > { %v1187_v9 = vadd.f32 %v1186_v8, %v6645_v5  ;;  %v5933_v10 = vpop.f32.mrb[9].mxu1 }
 0x30b   : > { %v6256_v10 = vld [vmem:[%s6507_s22 + $0x50] sm:$0xff]  }
 0x30c   : > { %v1200_v11 = vsel %vm1190_vm3, %v1187_v9, -inf }
 0x30d   : > { %1201 = vmax.xlane.f32.xlu0 %v1200_v11  ;;  %v6257_v11 = vld [vmem:[%s6507_s22 + $0x58] sm:$0xff]  }
 0x392   : > { %v1193_v12 = vpop.xlane.xlu1 %1192 }
 0x393   : > { %v1203_v13 = vsub.f32 %v959_v53, %v1193_v12 }
 0x395   : > { %v1207_v14 = vmul.f32 1.442695, %v1203_v13 }
 0x396   : > { %v1199_v15 = vpop.xlane.xlu1 %1198  ;;  %v1196_v16 = vpop.xlane.xlu0 %1195 }
 0x397   : > { %6302 = vpow2.f32 %v1207_v14  ;;  %v1205_v17 = vsub.f32 %v1111_v59, %v1199_v15  ;;  %v1204_v18 = vsub.f32 %v1035_v3, %v1196_v16 }
 0x399   : > { %v1211_v19 = vmul.f32 1.442695, %v1205_v17  ;;  %v1209_v20 = vmul.f32 1.442695, %v1204_v18 }
 0x39a   : > { %v1202_v22 = vpop.xlane.xlu0 %1201 }
 0x39b   : > { %6304 = vpow2.f32 %v1211_v19  ;;  %v1206_v23 = vsub.f32 %v1187_v9, %v1202_v22  ;;  %v6255_v9 = vld [vmem:[%s6507_s22 + $0x38] sm:$0xff]  }
 0x39c   : > { %6306 = vpow2.f32 %v1209_v20 }
 0x39d   : > { %v1213_v24 = vmul.f32 1.442695, %v1206_v23 }
 0x39f   : > { %6308 = vpow2.f32 %v1213_v24  ;;  %v5544_v24 = vld [vmem:[%s6585_s23 + $0x3] ss:$0 sm:$0xff] }
 0x3a1   : > { %v6303_v25 = vpop.eup %6302 }
 0x3a2   : > { %v1215_v27 = vsel %vm1190_vm3, %v6303_v25, 0.0 }
 0x3a3   : > { %1216 = vadd.xlane.f32.xlu1 %v1215_v27  ;;  %v5535_v27 = vld [vmem:[%s6585_s23 + $0x1] ss:$0 sm:$0xff] }
 0x3a5   : > { %v6305_v28 = vpop.eup %6304 }
 0x3a6   : > { %v6307_v29 = vpop.eup %6306  ;;  %v1221_v30 = vsel %vm1190_vm3, %v6305_v28, 0.0 }
 0x3a7   : > { %1222 = vadd.xlane.f32.xlu1 %v1221_v30  ;;  %v1218_v31 = vsel %vm1190_vm3, %v6307_v29, 0.0  ;;  %v5553_v30 = vld [vmem:[%s6585_s23 + $0x5] ss:$0 sm:$0xff] }
 0x3a8   : > { %1219 = vadd.xlane.f32.xlu0 %v1218_v31 }
 0x3a9   : > { %v6309_v32 = vpop.eup %6308 }
 0x3aa   : > { %v1224_v33 = vsel %vm1190_vm3, %v6309_v32, 0.0 }
 0x3ac   : > { %1225 = vadd.xlane.f32.xlu0 %v1224_v33 }
 0x430   : > { %v1217_v35 = vpop.xlane.xlu1 %1216 }
 0x431   : > { %6310 = vrcp.f32 %v1217_v35 }
 0x434   : > { %v1223_v36 = vpop.xlane.xlu1 %1222 }
 0x435   : > { %6312 = vrcp.f32 %v1223_v36  ;;  %v1220_v37 = vpop.xlane.xlu0 %1219 }
 0x436   : > { %6314 = vrcp.f32 %v1220_v37 }
 0x439   : > { %v1226_v38 = vpop.xlane.xlu0 %1225 }
 0x43a   : > { %6316 = vrcp.f32 %v1226_v38 }
 0x43b   : > { %v6311_v39 = vpop.eup %6310 }
 0x43c   : > { %v1231_v40 = vmul.f32 %v6311_v39, %v1217_v35 }
 0x43e   : > { %v1235_v41 = vsub.f32 2.0, %v1231_v40 }
 0x43f   : > { %v6313_v43 = vpop.eup %6312 }
 0x440   : > { %v6315_v44 = vpop.eup %6314  ;;  %v1239_v45 = vmul.f32 %v6311_v39, %v1235_v41  ;;  %v1233_v47 = vmul.f32 %v6313_v43, %v1223_v36 }
 0x441   : > { %v1232_v48 = vmul.f32 %v6315_v44, %v1220_v37 }
 0x442   : > { %v1243_v50 = vmul.f32 %v6303_v25, %v1239_v45  ;;  %v1237_v51 = vsub.f32 2.0, %v1233_v47 }
 0x443   : > { %v1236_v53 = vsub.f32 2.0, %v1232_v48 }
 0x444   : > { %v6317_v54 = vpop.eup %6316  ;;  %v1241_v58 = vmul.f32 %v6313_v43, %v1237_v51  ;;  %5937 = vmatmul.mubr.msk.f32.vlgmr.msra.gmra.mrb[10].mxu0 %vm1190_vm3, %v1243_v50 }
 0x445   : > { %v1240_v59 = vmul.f32 %v6315_v44, %v1236_v53  ;;  %v1234_v60 = vmul.f32 %v6317_v54, %v1226_v38  ;;  %5945 = vmatpush3.msra.mxu0 %v6601_v21  ;;  %5946 = vmatprep.mubr.msk.f32.mxu0 %vm6432_vm1, %v6431_v2 }
 0x446   : > { %v1245_v1 = vmul.f32 %v6305_v28, %v1241_v58  ;;  %5954 = vmatprep.subr.bf16.mxu0 %v6252_v52 }
 0x447   : > { %v1244_v3 = vmul.f32 %v6307_v29, %v1240_v59  ;;  %v1238_v4 = vsub.f32 2.0, %v1234_v60 }
 0x448   : > { %5947 = vmatmul.mubr.msk.f32.vlgmr.msra.gmra.mrb[12].mxu0 %vm1190_vm3, %v1245_v1 }
 0x449   : > { %v1242_v8 = vmul.f32 %v6317_v54, %v1238_v4  ;;  %5942 = vmatmul.mubr.msk.f32.vlgmr.msra.gmra.mrb[10].mxu1 %vm1190_vm3, %v1244_v3  ;;  %5955 = vmatpush3.bf16.msra.mxu0 %v6252_v52 }
 0x44a   : > { %5950 = vmatpush3.msra.mxu1 %v6604_v26  ;;  %5958 = vmatprep.mubr.msk.bf16.mxu0 %vm537_vm0, %v6550_v61 }
 0x44b   : > { %v1246_v21 = vmul.f32 %v6309_v32, %v1242_v8  ;;  %5951 = vmatprep.mubr.msk.f32.mxu1 %vm6432_vm1, %v6431_v2  ;;  %5956 = vmatprep.subr.bf16.mxu0 %v6253_v6 }
 0x44c   : > { %5962 = vmatprep.subr.bf16.mxu1 %v6254_v7 }
 0x44d   : > { %5952 = vmatmul.mubr.msk.f32.vlgmr.msra.gmra.mrb[12].mxu1 %vm1190_vm3, %v1246_v21  ;;  %5957 = vmatpush3.bf16.msra.mxu0 %v6253_v6 }
 0x44e   : > { %5963 = vmatpush3.bf16.msra.mxu1 %v6254_v7  ;;  %5966 = vmatprep.mubr.msk.bf16.mxu1 %vm537_vm0, %v6550_v61 }
 0x44f   : > { %5964 = vmatprep.subr.bf16.mxu1 %v6255_v9  ;;  %5970 = vmatprep.subr.bf16.mxu0 %v6256_v10 }
 0x450   : > { %5959 = vmatmul.mubr.msk.bf16.vlgmr.msra.gmra.mrb[16].mxu0 %vm537_vm0, %v6562_v0 }
 0x451   : > { %5971 = vmatpush3.bf16.msra.mxu0 %v6256_v10  ;;  %5974 = vmatprep.mubr.msk.bf16.mxu0 %vm537_vm0, %v6550_v61 }
 0x452   : > { %5965 = vmatpush3.bf16.msra.mxu1 %v6255_v9  ;;  %5972 = vmatprep.subr.bf16.mxu0 %v6257_v11 }
 0x453   : > { %5978 = vmatprep.subr.mxu1 %v6431_v2 }
 0x455   : > { %5967 = vmatmul.mubr.msk.bf16.vlgmr.msra.gmra.mrb[16].mxu1 %vm537_vm0, %v6562_v0  ;;  %5973 = vmatpush3.bf16.msra.mxu0 %v6257_v11 }
 0x456   : > { %5988 = vmatprep.subr.mxu0 %v6431_v2  ;;  %5980 = vmatprep.mubr.msk.f32.mxu1 %vm6432_vm1, %v6431_v2 }
 0x458   : > { %5975 = vmatmul.mubr.msk.bf16.vlgmr.msra.gmra.mrb[20].mxu0 %vm537_vm0, %v6562_v0 }
 0x459   : > { %5990 = vmatprep.mubr.msk.f32.mxu0 %vm6432_vm1, %v6431_v2 }
 0x517   : > { %v6689_v61 = vpop.f32.mrb[10].mxu0 }
 0x518   : > { %v5938_v26 = vpop.f32.mrb[11].mxu0 }
 0x51b   : > { %v6691_v12 = vpop.f32.mrb[12].mxu0 }
 0x51c   : > { %v6693_v13 = vpop.f32.mrb[10].mxu1  ;;  %v5948_v14 = vpop.f32.mrb[13].mxu0 }
 0x51d   : > { %v1539_v15 = vpack.c.bf16 %v6693_v13, %v6689_v61  ;;  %v5943_v16 = vpop.f32.mrb[11].mxu1 }
 0x520   : > { %v6697_v17 = vpop.f32.mrb[12].mxu1 }
 0x521   : > { %v1540_v0 = vpack.c.bf16 %v6697_v17, %v6691_v12  ;;  %v5953_v18 = vpop.f32.mrb[13].mxu1 }
 0x523   : > { %v5960_v19 = vpop.f32.mrb[16].mxu0 }
 0x524   : > { %v1599_v20 = vpop.f32.mrb[17].mxu0  ;;  %v1608_v36 = vadd.f32 %v5960_v19, %v5535_v27 }
 0x525   : > { %v5961_v22 = vpop.f32.mrb[18].mxu0  ;;  %v1600_v39 = vadd.f32 %v5535_v27, %v1599_v20 }
 0x526   : > { %v1602_v23 = vpop.f32.mrb[19].mxu0  ;;  %v1611_v50 = vadd.f32 %v5961_v22, %v5535_v27 }
 0x527   : > { %v1603_v47 = vadd.f32 %v5535_v27, %v1602_v23 }
 0x528   : > { %v5968_v25 = vpop.f32.mrb[16].mxu1 }
 0x529   : > { %v1679_v28 = vadd.f32 %v5968_v25, %v5544_v24  ;;  %v1670_v29 = vpop.f32.mrb[17].mxu1 }
 0x52a   : > { %v1671_v31 = vadd.f32 %v5544_v24, %v1670_v29  ;;  %v5969_v32 = vpop.f32.mrb[18].mxu1 }
 0x52b   : > { %v1673_v33 = vpop.f32.mrb[19].mxu1  ;;  %5989 = vmatpush3.xpose.msk.msra.mxu0 %vm885_vm2, %v1679_v28  ;;  %v5976_v35 = vpop.f32.mrb[20].mxu0  ;;  %v1682_v48 = vadd.f32 %v5969_v32, %v5544_v24 }
 0x52c   : > { %v6705_v37 = vadd.f32 %v5976_v35, %v5553_v30  ;;  %5979 = vmatpush3.xpose.msk.msra.mxu1 %vm885_vm2, %v1671_v31  ;;  %v1741_v38 = vpop.f32.mrb[21].mxu0  ;;  %5998 = vmatprep.subr.mxu0 %v6431_v2  ;;  %v1674_v43 = vadd.f32 %v5544_v24, %v1673_v33 }
 0x52d   : > { %v1742_v40 = vadd.f32 %v5553_v30, %v1741_v38  ;;  %v5977_v41 = vpop.f32.mrb[22].mxu0  ;;  %5983 = vmatprep.subr.mxu1 %v6431_v2 }
 0x52e   : > { %v6710_v44 = vadd.f32 %v5977_v41, %v5553_v30  ;;  %5991 = vmatmul.mubr.msk.f32.vlgmr.msra.gmra.mrb[14].mxu0 %vm885_vm2, %v1608_v36  ;;  %v1744_v45 = vpop.f32.mrb[23].mxu0 }
 0x52f   : > { %5981 = vmatmul.mubr.msk.f32.vlgmr.msra.gmra.mrb[14].mxu1 %vm885_vm2, %v1600_v39  ;;  %5999 = vmatpush3.msra.mxu0 %v1742_v40  ;;  %v1745_v51 = vadd.f32 %v5553_v30, %v1744_v45 }
 0x530   : > { %5984 = vmatpush3.xpose.msk.msra.mxu1 %vm885_vm2, %v1674_v43  ;;  %5985 = vmatprep.mubr.msk.f32.mxu1 %vm6432_vm1, %v6431_v2 }
 0x531   : > { %5993 = vmatprep.subr.mxu1 %v6431_v2  ;;  %6000 = vmatprep.mubr.msk.f32.mxu0 %vm6432_vm1, %v6431_v2 }
 0x532   : > { %6008 = vmatprep.subr.mxu0 %v6431_v2 }
 0x533   : > { %5986 = vmatmul.mubr.msk.f32.vlgmr.msra.gmra.mrb[20].mxu1 %vm885_vm2, %v1603_v47 }
 0x534   : > { %5994 = vmatpush3.xpose.msk.msra.mxu1 %vm885_vm2, %v1682_v48  ;;  %5995 = vmatprep.mubr.msk.f32.mxu1 %vm6432_vm1, %v6431_v2 }
 0x535   : > { %6003 = vmatprep.subr.mxu1 %v6431_v2 }
 0x537   : > { %5996 = vmatmul.mubr.msk.f32.vlgmr.msra.gmra.mrb[22].mxu1 %vm885_vm2, %v1611_v50 }
 0x538   : > { %6004 = vmatpush3.msra.mxu1 %v1745_v51  ;;  %6005 = vmatprep.mubr.msk.f32.mxu1 %vm6432_vm1, %v6431_v2 }
 0x539   : > { %6013 = vmatprep.subr.mxu1 %v6431_v2 }
 0x601   : > { %v1980_v52 = vpop.f32.mrb[14].mxu0 }
 0x602   : > { %v1828_v53 = vpop.f32.mrb[14].mxu1  ;;  %v5992_v54 = vpop.f32.mrb[15].mxu0  ;;  %v1981_v60 = vadd.f32 %v1980_v52, %v6635_v49 }
 0x603   : > { %v1829_v58 = vadd.f32 %v1828_v53, %v6632_v46  ;;  %v5982_v59 = vpop.f32.mrb[15].mxu1 }
 0x604   : > { %v2066_v7 = vsel %vm1190_vm3, %v1981_v60, -inf }
 0x605   : > { %v2060_v1 = vsel %vm1190_vm3, %v1829_v58, -inf }
 0x606   : > { %2061 = vmax.xlane.f32.xlu0 %v2060_v1  ;;  %v1904_v3 = vpop.f32.mrb[20].mxu1 }
 0x607   : > { %v1905_v4 = vadd.f32 %v1904_v3, %v6639_v55  ;;  %v5987_v6 = vpop.f32.mrb[21].mxu1 }
 0x609   : > { %v2063_v8 = vsel %vm1190_vm3, %v1905_v4, -inf }
 0x60a   : > { %2067 = vmax.xlane.f32.xlu0 %v2066_v7  ;;  %2064 = vmax.xlane.f32.xlu1 %v2063_v8  ;;  %v2056_v21 = vpop.f32.mrb[22].mxu1 }
 0x60b   : > { %v2057_v9 = vadd.f32 %v2056_v21, %v6645_v5  ;;  %v5997_v10 = vpop.f32.mrb[23].mxu1 }
 0x60d   : > { %v2069_v11 = vsel %vm1190_vm3, %v2057_v9, -inf }
 0x60e   : > { %2070 = vmax.xlane.f32.xlu1 %v2069_v11  ;;  %v6259_v11 = vld [vmem:[%s6517_s26 + $0x8] sm:$0xff]  }
 0x693   : > { %v2062_v26 = vpop.xlane.xlu0 %2061 }
 0x694   : > { %v2072_v14 = vsub.f32 %v1829_v58, %v2062_v26 }
 0x696   : > { %v2076_v16 = vmul.f32 1.442695, %v2072_v14 }
 0x697   : > { %v2068_v18 = vpop.xlane.xlu0 %2067  ;;  %v2065_v19 = vpop.xlane.xlu1 %2064 }
 0x698   : > { %6318 = vpow2.f32 %v2076_v16  ;;  %v2074_v20 = vsub.f32 %v1981_v60, %v2068_v18  ;;  %v2073_v22 = vsub.f32 %v1905_v4, %v2065_v19  ;;  %v6258_v60 = vld [vmem:[%s6517_s26] sm:$0xff]  }
 0x69a   : > { %v2080_v23 = vmul.f32 1.442695, %v2074_v20  ;;  %v2078_v24 = vmul.f32 1.442695, %v2073_v22 }
 0x69b   : > { %v2071_v25 = vpop.xlane.xlu1 %2070 }
 0x69c   : > { %6320 = vpow2.f32 %v2080_v23  ;;  %v2075_v27 = vsub.f32 %v2057_v9, %v2071_v25  ;;  %v5578_v25 = vld [vmem:[%s6769_s16] ss:$0 sm:$0xff] }
 0x69d   : > { %6322 = vpow2.f32 %v2078_v24 }
 0x69e   : > { %v2082_v28 = vmul.f32 1.442695, %v2075_v27 }
 0x6a0   : > { %6324 = vpow2.f32 %v2082_v28 }
 0x6a2   : > { %v6319_v29 = vpop.eup %6318 }
 0x6a3   : > { %v2084_v30 = vsel %vm1190_vm3, %v6319_v29, 0.0 }
 0x6a4   : > { %2085 = vadd.xlane.f32.xlu0 %v2084_v30 }
 0x6a6   : > { %v6321_v31 = vpop.eup %6320 }
 0x6a7   : > { %v6323_v32 = vpop.eup %6322  ;;  %v2090_v33 = vsel %vm1190_vm3, %v6321_v31, 0.0 }
 0x6a8   : > { %2091 = vadd.xlane.f32.xlu0 %v2090_v33  ;;  %v2087_v35 = vsel %vm1190_vm3, %v6323_v32, 0.0 }
 0x6a9   : > { %2088 = vadd.xlane.f32.xlu1 %v2087_v35 }
 0x6aa   : > { %v6325_v36 = vpop.eup %6324 }
 0x6ab   : > { %v2093_v38 = vsel %vm1190_vm3, %v6325_v36, 0.0 }
 0x6ad   : > { %2094 = vadd.xlane.f32.xlu1 %v2093_v38 }
 0x731   : > { %v2086_v39 = vpop.xlane.xlu0 %2085 }
 0x732   : > { %6326 = vrcp.f32 %v2086_v39 }
 0x735   : > { %v2092_v40 = vpop.xlane.xlu0 %2091 }
 0x736   : > { %6328 = vrcp.f32 %v2092_v40  ;;  %v2089_v41 = vpop.xlane.xlu1 %2088 }
 0x737   : > { %6330 = vrcp.f32 %v2089_v41 }
 0x73a   : > { %v2095_v43 = vpop.xlane.xlu1 %2094 }
 0x73b   : > { %6332 = vrcp.f32 %v2095_v43 }
 0x73c   : > { %v6327_v45 = vpop.eup %6326 }
 0x73d   : > { %v2100_v47 = vmul.f32 %v6327_v45, %v2086_v39 }
 0x73f   : > { %v2104_v48 = vsub.f32 2.0, %v2100_v47 }
 0x740   : > { %v6329_v50 = vpop.eup %6328 }
 0x741   : > { %v6331_v51 = vpop.eup %6330  ;;  %v2108_v52 = vmul.f32 %v6327_v45, %v2104_v48  ;;  %v2102_v53 = vmul.f32 %v6329_v50, %v2092_v40 }
 0x742   : > { %v2101_v54 = vmul.f32 %v6331_v51, %v2089_v41 }
 0x743   : > { %v2112_v58 = vmul.f32 %v6319_v29, %v2108_v52  ;;  %v2106_v59 = vsub.f32 2.0, %v2102_v53 }
 0x744   : > { %v2105_v1 = vsub.f32 2.0, %v2101_v54 }
 0x745   : > { %v6333_v3 = vpop.eup %6332  ;;  %v2110_v4 = vmul.f32 %v6329_v50, %v2106_v59  ;;  %6001 = vmatmul.mubr.msk.f32.vlgmr.msra.gmra.mrb[24].mxu0 %vm1190_vm3, %v2112_v58 }
 0x746   : > { %v2109_v6 = vmul.f32 %v6331_v51, %v2105_v1  ;;  %v2103_v7 = vmul.f32 %v6333_v3, %v2095_v43  ;;  %6009 = vmatpush3.msra.mxu0 %v6705_v37  ;;  %6010 = vmatprep.mubr.msk.f32.mxu0 %vm6432_vm1, %v6431_v2 }
 0x747   : > { %v2114_v8 = vmul.f32 %v6321_v31, %v2110_v4  ;;  %6024 = vmatprep.subr.bf16.mxu0 %v6258_v60 }
 0x748   : > { %v2113_v21 = vmul.f32 %v6323_v32, %v2109_v6  ;;  %v2107_v9 = vsub.f32 2.0, %v2103_v7 }
 0x749   : > { %6011 = vmatmul.mubr.msk.f32.vlgmr.msra.gmra.mrb[26].mxu0 %vm1190_vm3, %v2114_v8 }
 0x74a   : > { %v2111_v10 = vmul.f32 %v6333_v3, %v2107_v9  ;;  %6006 = vmatmul.mubr.msk.f32.vlgmr.msra.gmra.mrb[24].mxu1 %vm1190_vm3, %v2113_v21  ;;  %6025 = vmatpush3.bf16.msra.mxu0 %v6258_v60 }
 0x74b   : > { %6014 = vmatpush3.msra.mxu1 %v6710_v44  ;;  %6026 = vmatprep.mubr.msk.bf16.mxu0 %vm885_vm2, %v1539_v15 }
 0x74c   : > { %v2115_v37 = vmul.f32 %v6325_v36, %v2111_v10  ;;  %6015 = vmatprep.mubr.msk.f32.mxu1 %vm6432_vm1, %v6431_v2  ;;  %6018 = vmatprep.subr.bf16.mxu1 %v6259_v11 }
 0x74d   : > { %6027 = vmatmul.mubr.msk.bf16.vlgmr.msra.gmra.mrb[28].mxu0 %vm885_vm2, %v1540_v0 }
 0x74e   : > { %6016 = vmatmul.mubr.msk.f32.vlgmr.msra.gmra.mrb[26].mxu1 %vm1190_vm3, %v2115_v37  ;;  %v6260_v37 = vld [vmem:[%s6522_s29] sm:$0xff]  }
 0x74f   : > { %6019 = vmatpush3.bf16.msra.mxu1 %v6259_v11  ;;  %v6261_v11 = vld [vmem:[%s6522_s29 + $0x8] sm:$0xff]  }
 0x750   : > { %6030 = vmatprep.subr.bf16.mxu1 %v6260_v37 }
 0x818   : > { %v2185_v44 = vpop.f32.mrb[24].mxu0 }
 0x819   : > { %v6002_v26 = vpop.f32.mrb[25].mxu0 }
 0x81c   : > { %v2331_v61 = vpop.f32.mrb[26].mxu0 }
 0x81d   : > { %v2258_v13 = vpop.f32.mrb[24].mxu1  ;;  %v6012_v15 = vpop.f32.mrb[27].mxu0 }
 0x81e   : > { %v2408_v14 = vpack.c.bf16 %v2258_v13, %v2185_v44  ;;  %v6007_v16 = vpop.f32.mrb[25].mxu1 }
 0x820   : > { %6020 = vmatprep.mubr.msk.bf16.mxu1 %vm885_vm2, %v2408_v14  ;;  %v6028_v18 = vpop.f32.mrb[28].mxu0 }
 0x821   : > { %v2404_v19 = vpop.f32.mrb[26].mxu1  ;;  %v2520_v12 = vpop.f32.mrb[29].mxu0 }
 0x822   : > { %v2409_v17 = vpack.c.bf16 %v2404_v19, %v2331_v61  ;;  %v6017_v0 = vpop.f32.mrb[27].mxu1  ;;  %v6029_v20 = vpop.f32.mrb[30].mxu0 }
 0x823   : > { %v2523_v22 = vpop.f32.mrb[31].mxu0 }
 0x824   : > { %6021 = vmatmul.mubr.msk.bf16.vlgmr.msra.gmra.mrb[28].mxu1 %vm885_vm2, %v2409_v17 }
 0x825   : > { %6031 = vmatpush3.bf16.msra.mxu1 %v6260_v37 }
 0x826   : > { %6032 = vmatprep.subr.bf16.mxu1 %v6261_v11 }
 0x829   : > { %6033 = vmatpush3.bf16.msra.mxu1 %v6261_v11 }
 0x8f7   : > { %v6022_v23 = vpop.f32.mrb[28].mxu1 }
 0x8f8   : > { %v2529_v24 = vadd.f32 %v6028_v18, %v6022_v23  ;;  %v2459_v27 = vpop.f32.mrb[29].mxu1 }
 0x8f9   : > { %v2521_v28 = vadd.f32 %v2520_v12, %v2459_v27  ;;  %v6023_v29 = vpop.f32.mrb[30].mxu1 }
 0x8fa   : > { %v2532_v30 = vadd.f32 %v6029_v20, %v6023_v29  ;;  %v2462_v31 = vpop.f32.mrb[31].mxu1  ;;  %v2542_v32 = vadd.f32 %v5578_v25, %v2529_v24  ;;  %v5580_v29 = vld [vmem:[%s6769_s16 + $0x2] ss:$0 sm:$0xff] }
 0x8fb   : > { %v2540_v33 = vadd.f32 %v5578_v25, %v2521_v28  ;;  %v2524_v35 = vadd.f32 %v2523_v22, %v2462_v31  ;;  %v5579_v22 = vld [vmem:[%s6769_s16 + $0x1] ss:$0 sm:$0xff] }
 0x8fc   : > { %v2543_v36 = vadd.f32 %v5578_v25, %v2532_v30  ;;  %v2546_v43 = vadd.f32 %v2542_v32, %v6552_v62 }
 0x8fd   : > { %v2541_v38 = vadd.f32 %v5578_v25, %v2524_v35  ;;  %v2544_v39 = vadd.f32 %v2540_v33, %v6544_v56 }
 0x8fe   : > { %v2547_v47 = vadd.f32 %v2543_v36, %v6554_v63  ;;  %v2556_v48 = vsel %vm537_vm0, %v2546_v43, 0.0 }
 0x8ff   : > { %v2550_v40 = vsel %vm537_vm0, %v2544_v39, 0.0  ;;  %v2545_v41 = vadd.f32 %v2541_v38, %v6546_v57 }
 0x900   : > { %2551 = vadd.xlane.f32.xlu0 %v2550_v40  ;;  %v2559_v50 = vsel %vm537_vm0, %v2547_v47, 0.0 }
 0x901   : > { %v2553_v45 = vsel %vm537_vm0, %v2545_v41, 0.0 }
 0x902   : > { %2554 = vadd.xlane.f32.xlu1 %v2553_v45 }
 0x904   : > { %2557 = vadd.xlane.f32.xlu0 %v2556_v48  ;;  %v6263_v48 = vld [vmem:[%s6527_s12 + $0x8] sm:$0xff]  }
 0x906   : > { %2560 = vadd.xlane.f32.xlu1 %v2559_v50  ;;  %v6264_v50 = vld [vmem:[%s6527_s12 + $0x10] sm:$0xff]  }
 0x98d   : > { %v2552_v51 = vpop.xlane.xlu0 %2551 }
 0x98e   : > { %v2562_v56 = vmul.f32 0.03125, %v2552_v51  ;;  %v6265_v51 = vld [vmem:[%s6527_s12 + $0x18] sm:$0xff]  }
 0x98f   : > { %v2555_v52 = vpop.xlane.xlu1 %2554 }
 0x990   : > { %v2566_v53 = vsub.f32 %v2544_v39, %v2562_v56  ;;  %v2563_v54 = vmul.f32 0.03125, %v2555_v52  ;;  %v6266_v56 = vld [vmem:[%s6527_s12 + $0x20] sm:$0xff]   ;;  %v6267_v52 = vld [vmem:[%s6527_s12 + $0x28] sm:$0xff]  }
 0x991   : > { %v2558_v57 = vpop.xlane.xlu0 %2557 }
 0x992   : > { %v2567_v58 = vsub.f32 %v2545_v41, %v2563_v54  ;;  %v2564_v62 = vmul.f32 0.03125, %v2558_v57  ;;  %v2570_v59 = vmul.f32 %v2566_v53, %v2566_v53  ;;  %v6269_v54 = vld [vmem:[%s6527_s12 + $0x38] sm:$0xff]   ;;  %v5581_v57 = vld [vmem:[%s6816_s19] ss:$0 sm:$0xff] }
 0x993   : > { %v2561_v60 = vpop.xlane.xlu1 %2560 }
 0x994   : > { %v2568_v1 = vsub.f32 %v2546_v43, %v2564_v62  ;;  %v2565_v63 = vmul.f32 0.03125, %v2561_v60  ;;  %v2574_v3 = vsel %vm537_vm0, %v2570_v59, 0.0  ;;  %v2571_v4 = vmul.f32 %v2567_v58, %v2567_v58 }
 0x995   : > { %2575 = vadd.xlane.f32.xlu0 %v2574_v3 }
 0x996   : > { %v2569_v6 = vsub.f32 %v2547_v47, %v2565_v63  ;;  %v2577_v7 = vsel %vm537_vm0, %v2571_v4, 0.0  ;;  %v2572_v8 = vmul.f32 %v2568_v1, %v2568_v1  ;;  %v6262_v47 = vld [vmem:[%s6527_s12] sm:$0xff]  }
 0x997   : > { %2578 = vadd.xlane.f32.xlu1 %v2577_v7  ;;  %6038 = vmatprep.subr.bf16.mxu1 %v6262_v47 }
 0x998   : > { %v2580_v21 = vsel %vm537_vm0, %v2572_v8, 0.0  ;;  %v2573_v9 = vmul.f32 %v2569_v6, %v2569_v6 }
 0x999   : > { %2581 = vadd.xlane.f32.xlu0 %v2580_v21 }
 0x99a   : > { %v2583_v10 = vsel %vm537_vm0, %v2573_v9, 0.0 }
 0x99b   : > { %2584 = vadd.xlane.f32.xlu1 %v2583_v10 }
 0xa22   : > { %v2576_v44 = vpop.xlane.xlu0 %2575 }
 0xa23   : > { %v2586_v26 = vmul.f32 0.03125, %v2576_v44 }
 0xa24   : > { %v2579_v61 = vpop.xlane.xlu1 %2578 }
 0xa25   : > { %v2590_v13 = vadd.f32 1e-12, %v2586_v26  ;;  %v2587_v15 = vmul.f32 0.03125, %v2579_v61 }
 0xa26   : > { %v2582_v14 = vpop.xlane.xlu0 %2581 }
 0xa27   : > { %6334 = vrsqrt.f32 %v2590_v13  ;;  %v2591_v16 = vadd.f32 1e-12, %v2587_v15  ;;  %v2588_v18 = vmul.f32 0.03125, %v2582_v14 }
 0xa28   : > { %v2585_v19 = vpop.xlane.xlu1 %2584 }
 0xa29   : > { %6336 = vrsqrt.f32 %v2591_v16  ;;  %v2592_v12 = vadd.f32 1e-12, %v2588_v18  ;;  %v2589_v17 = vmul.f32 0.03125, %v2585_v19 }
 0xa2b   : > { %6338 = vrsqrt.f32 %v2592_v12  ;;  %v2593_v0 = vadd.f32 1e-12, %v2589_v17 }
 0xa2d   : > { %6340 = vrsqrt.f32 %v2593_v0 }
 0xa31   : > { %v6335_v20 = vpop.eup %6334 }
 0xa32   : > { %v2598_v23 = vmul.f32 %v6335_v20, %v2566_v53  ;;  %v6268_v53 = vld [vmem:[%s6527_s12 + $0x30] sm:$0xff]  }
 0xa33   : > { %v6337_v24 = vpop.eup %6336 }
 0xa34   : > { %v2599_v25 = vmul.f32 %v6337_v24, %v2567_v58  ;;  %v2606_v27 = vmul.f32 %v5579_v22, %v2598_v23 }
 0xa35   : > { %v6339_v28 = vpop.eup %6338 }
 0xa36   : > { %v2600_v30 = vmul.f32 %v6339_v28, %v2568_v1  ;;  %v2607_v31 = vmul.f32 %v5579_v22, %v2599_v25  ;;  %v6788_v36 = vadd.f32 %v5580_v29, %v2606_v27 }
 0xa37   : > { %v6341_v32 = vpop.eup %6340 }
 0xa38   : > { %v2608_v33 = vmul.f32 %v5579_v22, %v2600_v30  ;;  %v2601_v35 = vmul.f32 %v6341_v32, %v2569_v6  ;;  %v6790_v38 = vadd.f32 %v5580_v29, %v2607_v31 }
 0xa3a   : > { %v2609_v39 = vmul.f32 %v5579_v22, %v2601_v35  ;;  %v2618_v40 = vpack.c.bf16 %v6790_v38, %v6788_v36  ;;  %v6795_v41 = vadd.f32 %v5580_v29, %v2608_v33 }
 0xa3c   : > { %6034 = vmatprep.mubr.msk.bf16.mxu1 %vm537_vm0, %v2618_v40  ;;  %v6797_v43 = vadd.f32 %v5580_v29, %v2609_v39 }
 0xa3e   : > { %v2619_v45 = vpack.c.bf16 %v6797_v43, %v6795_v41 }
 0xa40   : > { %6035 = vmatmul.mubr.msk.bf16.vlgmr.msra.gmra.mrb[32].mxu1 %vm537_vm0, %v2619_v45 }
 0xa41   : > { %6039 = vmatpush3.bf16.msra.mxu1 %v6262_v47 }
 0xa42   : > { %6040 = vmatprep.subr.bf16.mxu1 %v6263_v48 }
 0xa45   : > { %6041 = vmatpush3.bf16.msra.mxu1 %v6263_v48 }
 0xa46   : > { %6042 = vmatprep.subr.bf16.mxu1 %v6264_v50 }
 0xa49   : > { %6043 = vmatpush3.bf16.msra.mxu1 %v6264_v50  ;;  %v5586_v50 = vld [vmem:[%s6769_s16 + $0x3] ss:$0 sm:$0xff] }
 0xa4a   : > { %6044 = vmatprep.subr.bf16.mxu1 %v6265_v51 }
 0xa4d   : > { %6045 = vmatpush3.bf16.msra.mxu1 %v6265_v51 }
 0xa4e   : > { %6046 = vmatprep.subr.bf16.mxu1 %v6266_v56 }
 0xa51   : > { %6047 = vmatpush3.bf16.msra.mxu1 %v6266_v56 }
 0xa52   : > { %6048 = vmatprep.subr.bf16.mxu1 %v6267_v52 }
 0xa55   : > { %6049 = vmatpush3.bf16.msra.mxu1 %v6267_v52 }
 0xa56   : > { %6050 = vmatprep.subr.bf16.mxu1 %v6268_v53 }
 0xa59   : > { %6051 = vmatpush3.bf16.msra.mxu1 %v6268_v53 }
 0xa5a   : > { %6052 = vmatprep.subr.bf16.mxu1 %v6269_v54 }
 0xa5d   : > { %6053 = vmatpush3.bf16.msra.mxu1 %v6269_v54 }
 0xa5e   : > { %6092 = vmatprep.subr.mxu1 %v6431_v2 }
 0xb13   : > { %v6036_v58 = vpop.f32.mrb[32].mxu1 }
 0xb14   : > { %v2690_v62 = vadd.f32 %v6036_v58, %v5581_v57  ;;  %v2681_v59 = vpop.f32.mrb[33].mxu1 }
 0xb15   : > { %v2682_v60 = vadd.f32 %v5581_v57, %v2681_v59  ;;  %v6037_v1 = vpop.f32.mrb[34].mxu1 }
 0xb16   : > { %v2698_v63 = vmul.f32 %v2690_v62, %v2690_v62  ;;  %v2693_v3 = vadd.f32 %v6037_v1, %v5581_v57  ;;  %v2684_v4 = vpop.f32.mrb[35].mxu1 }
 0xb17   : > { %v2696_v6 = vmul.f32 %v2682_v60, %v2682_v60  ;;  %v2685_v7 = vadd.f32 %v5581_v57, %v2684_v4 }
 0xb18   : > { %v2702_v8 = vmul.f32 %v2698_v63, %v2690_v62  ;;  %v2699_v21 = vmul.f32 %v2693_v3, %v2693_v3 }
 0xb19   : > { %v2700_v9 = vmul.f32 %v2696_v6, %v2682_v60  ;;  %v2697_v10 = vmul.f32 %v2685_v7, %v2685_v7 }
 0xb1a   : > { %v2706_v37 = vmul.f32 0.044715, %v2702_v8  ;;  %v2703_v11 = vmul.f32 %v2699_v21, %v2693_v3 }
 0xb1b   : > { %v2704_v44 = vmul.f32 0.044715, %v2700_v9  ;;  %v2701_v26 = vmul.f32 %v2697_v10, %v2685_v7 }
 0xb1c   : > { %v2710_v61 = vadd.f32 %v2706_v37, %v2690_v62  ;;  %v2707_v13 = vmul.f32 0.044715, %v2703_v11 }
 0xb1d   : > { %v2708_v15 = vadd.f32 %v2704_v44, %v2682_v60  ;;  %v2705_v14 = vmul.f32 0.044715, %v2701_v26 }
 0xb1e   : > { %v2714_v16 = vmul.f32 0.7978846, %v2710_v61  ;;  %v2711_v18 = vadd.f32 %v2707_v13, %v2693_v3 }
 0xb1f   : > { %v2712_v19 = vmul.f32 0.7978846, %v2708_v15  ;;  %v2709_v12 = vadd.f32 %v2705_v14, %v2685_v7 }
 0xb20   : > { %6342 = vtanh.f32 %v2714_v16  ;;  %v2715_v17 = vmul.f32 0.7978846, %v2711_v18 }
 0xb21   : > { %6344 = vtanh.f32 %v2712_v19  ;;  %v2713_v0 = vmul.f32 0.7978846, %v2709_v12 }
 0xb22   : > { %6346 = vtanh.f32 %v2715_v17  ;;  %v6270_v17 = vld [vmem:[%s6507_s22 + $0x60] sm:$0xff]  }
 0xb23   : > { %6348 = vtanh.f32 %v2713_v0  ;;  %6058 = vmatprep.subr.bf16.mxu0 %v6270_v17  ;;  %v6271_v0 = vld [vmem:[%s6507_s22 + $0x68] sm:$0xff]  }
 0xb24   : > { %6059 = vmatpush3.bf16.msra.mxu0 %v6270_v17 }
 0xb25   : > { %6060 = vmatprep.subr.bf16.mxu0 %v6271_v0 }
 0xb28   : > { %6061 = vmatpush3.bf16.msra.mxu0 %v6271_v0 }
 0xb2a   : > { %v6343_v20 = vpop.eup %6342 }
 0xb2b   : > { %v6345_v22 = vpop.eup %6344  ;;  %v2722_v23 = vadd.f32 1.0, %v6343_v20  ;;  %v6272_v20 = vld [vmem:[%s6507_s22 + $0x80] sm:$0xff]  }
 0xb2c   : > { %v6347_v24 = vpop.eup %6346  ;;  %v2720_v25 = vadd.f32 1.0, %v6345_v22  ;;  %6066 = vmatprep.subr.bf16.mxu0 %v6272_v20 }
 0xb2d   : > { %v6349_v27 = vpop.eup %6348  ;;  %v2726_v28 = vmul.f32 0.5, %v2722_v23  ;;  %v2723_v29 = vadd.f32 1.0, %v6347_v24 }
 0xb2e   : > { %v2721_v30 = vadd.f32 1.0, %v6349_v27  ;;  %v2724_v31 = vmul.f32 0.5, %v2720_v25 }
 0xb2f   : > { %v2727_v32 = vmul.f32 0.5, %v2723_v29  ;;  %v2730_v35 = vmul.f32 %v2726_v28, %v2690_v62 }
 0xb30   : > { %v2725_v33 = vmul.f32 0.5, %v2721_v30  ;;  %v2728_v40 = vmul.f32 %v2724_v31, %v2682_v60 }
 0xb31   : > { %v2731_v39 = vmul.f32 %v2727_v32, %v2693_v3 }
 0xb32   : > { %v2729_v45 = vmul.f32 %v2725_v33, %v2685_v7 }
 0xb33   : > { %v2733_v47 = vpack.c.bf16 %v2731_v39, %v2730_v35 }
 0xb34   : > { %v2732_v48 = vpack.c.bf16 %v2729_v45, %v2728_v40  ;;  %v5595_v40 = vld [vmem:[%s6769_s16 + $0x4] ss:$0 sm:$0xff] }
 0xb36   : > { %6054 = vmatprep.mubr.bf16.mxu1 %v2732_v48 }
 0xb37   : > { %6055 = vmatmul.mubr.bf16.vlgmr.msra.gmra.mrb[36].mxu1 %v2733_v47 }
 0xb38   : > { %6094 = vmatprep.mubr.msk.f32.mxu1 %vm6432_vm1, %v6431_v2 }
 0xc0a   : > { %v6056_v51 = vpop.f32.mrb[36].mxu1 }
 0xc0b   : > { %v2837_v56 = vpop.f32.mrb[37].mxu1  ;;  %v2846_v52 = vadd.f32 %v6056_v51, %v5586_v50 }
 0xc0c   : > { %v2838_v53 = vadd.f32 %v5586_v50, %v2837_v56  ;;  %v6057_v54 = vpop.f32.mrb[38].mxu1  ;;  %v5596_v56 = vld [vmem:[%s6769_s16 + $0x5] ss:$0 sm:$0xff] }
 0xc0d   : > { %v2840_v57 = vpop.f32.mrb[39].mxu1  ;;  %v2849_v58 = vadd.f32 %v6057_v54, %v5586_v50  ;;  %v2854_v63 = vadd.f32 %v2846_v52, %v6795_v41 }
 0xc0e   : > { %v2841_v59 = vadd.f32 %v5586_v50, %v2840_v57  ;;  %v2852_v62 = vadd.f32 %v2838_v53, %v6788_v36 }
 0xc0f   : > { %v2855_v4 = vadd.f32 %v2849_v58, %v6797_v43  ;;  %v2864_v6 = vsel %vm537_vm0, %v2854_v63, 0.0 }
 0xc10   : > { %v2858_v60 = vsel %vm537_vm0, %v2852_v62, 0.0  ;;  %v2853_v1 = vadd.f32 %v2841_v59, %v6790_v38 }
 0xc11   : > { %2859 = vadd.xlane.f32.xlu0 %v2858_v60  ;;  %v2867_v7 = vsel %vm537_vm0, %v2855_v4, 0.0 }
 0xc12   : > { %v2861_v3 = vsel %vm537_vm0, %v2853_v1, 0.0 }
 0xc13   : > { %2862 = vadd.xlane.f32.xlu1 %v2861_v3 }
 0xc15   : > { %2865 = vadd.xlane.f32.xlu0 %v2864_v6  ;;  %v6273_v6 = vld [vmem:[%s6507_s22 + $0x88] sm:$0xff]  }
 0xc17   : > { %2868 = vadd.xlane.f32.xlu1 %v2867_v7  ;;  %v6274_v7 = vld [vmem:[%s6507_s22 + $0xa0] sm:$0xff]  }
 0xc9e   : > { %v2860_v8 = vpop.xlane.xlu0 %2859 }
 0xc9f   : > { %v2870_v36 = vmul.f32 0.03125, %v2860_v8  ;;  %v6275_v8 = vld [vmem:[%s6507_s22 + $0xa8] sm:$0xff]  }
 0xca0   : > { %v2863_v21 = vpop.xlane.xlu1 %2862 }
 0xca1   : > { %v2874_v9 = vsub.f32 %v2852_v62, %v2870_v36  ;;  %v2871_v10 = vmul.f32 0.03125, %v2863_v21 }
 0xca2   : > { %v2866_v38 = vpop.xlane.xlu0 %2865 }
 0xca3   : > { %v2875_v37 = vsub.f32 %v2853_v1, %v2871_v10  ;;  %v2872_v41 = vmul.f32 0.03125, %v2866_v38  ;;  %v2878_v11 = vmul.f32 %v2874_v9, %v2874_v9  ;;  %v5610_v38 = vld [vmem:[%s6585_s23 + $0x8] ss:$0 sm:$0xff] }
 0xca4   : > { %v2869_v44 = vpop.xlane.xlu1 %2868 }
 0xca5   : > { %v2876_v26 = vsub.f32 %v2854_v63, %v2872_v41  ;;  %v2873_v43 = vmul.f32 0.03125, %v2869_v44  ;;  %v2882_v61 = vsel %vm537_vm0, %v2878_v11, 0.0  ;;  %v2879_v13 = vmul.f32 %v2875_v37, %v2875_v37  ;;  %v5601_v41 = vld [vmem:[%s6585_s23 + $0x6] ss:$0 sm:$0xff] }
 0xca6   : > { %2883 = vadd.xlane.f32.xlu0 %v2882_v61 }
 0xca7   : > { %v2877_v15 = vsub.f32 %v2855_v4, %v2873_v43  ;;  %v2885_v14 = vsel %vm537_vm0, %v2879_v13, 0.0  ;;  %v2880_v16 = vmul.f32 %v2876_v26, %v2876_v26 }
 0xca8   : > { %2886 = vadd.xlane.f32.xlu1 %v2885_v14 }
 0xca9   : > { %v2888_v18 = vsel %vm537_vm0, %v2880_v16, 0.0  ;;  %v2881_v19 = vmul.f32 %v2877_v15, %v2877_v15  ;;  %v5619_v16 = vld [vmem:[%s6585_s23 + $0xa] ss:$0 sm:$0xff] }
 0xcaa   : > { %2889 = vadd.xlane.f32.xlu0 %v2888_v18 }
 0xcab   : > { %v2891_v12 = vsel %vm537_vm0, %v2881_v19, 0.0 }
 0xcac   : > { %2892 = vadd.xlane.f32.xlu1 %v2891_v12 }
 0xd33   : > { %v2884_v22 = vpop.xlane.xlu0 %2883 }
 0xd34   : > { %v2894_v23 = vmul.f32 0.03125, %v2884_v22 }
 0xd35   : > { %v2887_v24 = vpop.xlane.xlu1 %2886 }
 0xd36   : > { %v2898_v25 = vadd.f32 1e-12, %v2894_v23  ;;  %v2895_v27 = vmul.f32 0.03125, %v2887_v24 }
 0xd37   : > { %v2890_v28 = vpop.xlane.xlu0 %2889 }
 0xd38   : > { %6350 = vrsqrt.f32 %v2898_v25  ;;  %v2899_v29 = vadd.f32 1e-12, %v2895_v27  ;;  %v2896_v30 = vmul.f32 0.03125, %v2890_v28 }
 0xd39   : > { %v2893_v31 = vpop.xlane.xlu1 %2892 }
 0xd3a   : > { %6352 = vrsqrt.f32 %v2899_v29  ;;  %v2900_v32 = vadd.f32 1e-12, %v2896_v30  ;;  %v2897_v33 = vmul.f32 0.03125, %v2893_v31 }
 0xd3c   : > { %6354 = vrsqrt.f32 %v2900_v32  ;;  %v2901_v35 = vadd.f32 1e-12, %v2897_v33 }
 0xd3e   : > { %6356 = vrsqrt.f32 %v2901_v35 }
 0xd42   : > { %v6351_v39 = vpop.eup %6350 }
 0xd43   : > { %v2906_v45 = vmul.f32 %v6351_v39, %v2874_v9 }
 0xd44   : > { %v6353_v47 = vpop.eup %6352 }
 0xd45   : > { %v2914_v48 = vmul.f32 %v5595_v40, %v2906_v45  ;;  %v2907_v50 = vmul.f32 %v6353_v47, %v2875_v37 }
 0xd46   : > { %v6355_v51 = vpop.eup %6354 }
 0xd47   : > { %v2915_v52 = vmul.f32 %v5595_v40, %v2907_v50  ;;  %v2908_v53 = vmul.f32 %v6355_v51, %v2876_v26  ;;  %v6839_v57 = vadd.f32 %v5596_v56, %v2914_v48 }
 0xd48   : > { %v6357_v54 = vpop.eup %6356 }
 0xd49   : > { %v6841_v58 = vadd.f32 %v5596_v56, %v2915_v52  ;;  %v2916_v59 = vmul.f32 %v5595_v40, %v2908_v53  ;;  %v2909_v62 = vmul.f32 %v6357_v54, %v2877_v15 }
 0xd4b   : > { %v2917_v60 = vmul.f32 %v5595_v40, %v2909_v62  ;;  %v6845_v1 = vpack.c.bf16 %v6841_v58, %v6839_v57  ;;  %v6847_v63 = vadd.f32 %v5596_v56, %v2916_v59 }
 0xd4d   : > { %v6849_v3 = vadd.f32 %v5596_v56, %v2917_v60  ;;  %6062 = vmatprep.mubr.msk.bf16.mxu0 %vm537_vm0, %v6845_v1 }
 0xd4f   : > { %v6855_v4 = vpack.c.bf16 %v6849_v3, %v6847_v63 }
 0xd51   : > { %6063 = vmatmul.mubr.msk.bf16.vlgmr.msra.gmra.mrb[32].mxu0 %vm537_vm0, %v6855_v4 }
 0xd52   : > { %6067 = vmatpush3.bf16.msra.mxu0 %v6272_v20  ;;  %6070 = vmatprep.mubr.msk.bf16.mxu0 %vm537_vm0, %v6845_v1 }
 0xd53   : > { %6068 = vmatprep.subr.bf16.mxu0 %v6273_v6 }
 0xd56   : > { %6069 = vmatpush3.bf16.msra.mxu0 %v6273_v6 }
 0xd57   : > { %6074 = vmatprep.subr.bf16.mxu0 %v6274_v7 }
 0xd59   : > { %6071 = vmatmul.mubr.msk.bf16.vlgmr.msra.gmra.mrb[36].mxu0 %vm537_vm0, %v6855_v4 }
 0xd5a   : > { %6075 = vmatpush3.bf16.msra.mxu0 %v6274_v7  ;;  %6078 = vmatprep.mubr.msk.bf16.mxu0 %vm537_vm0, %v6845_v1 }
 0xd5b   : > { %6076 = vmatprep.subr.bf16.mxu0 %v6275_v8 }
 0xd5e   : > { %6077 = vmatpush3.bf16.msra.mxu0 %v6275_v8 }
 0xd5f   : > { %6082 = vmatprep.subr.mxu0 %v6431_v2 }
 0xd61   : > { %6079 = vmatmul.mubr.msk.bf16.vlgmr.msra.gmra.mrb[40].mxu0 %vm537_vm0, %v6855_v4 }
 0xd62   : > { %6084 = vmatprep.mubr.msk.f32.mxu0 %vm6432_vm1, %v6431_v2 }
 0xe24   : > { %v6064_v36 = vpop.f32.mrb[32].mxu0 }
 0xe25   : > { %v2990_v21 = vpop.f32.mrb[33].mxu0  ;;  %v2999_v13 = vadd.f32 %v6064_v36, %v5601_v41 }
 0xe26   : > { %v6065_v9 = vpop.f32.mrb[34].mxu0  ;;  %v2991_v15 = vadd.f32 %v5601_v41, %v2990_v21 }
 0xe27   : > { %v2993_v10 = vpop.f32.mrb[35].mxu0  ;;  %v3002_v25 = vadd.f32 %v6065_v9, %v5601_v41 }
 0xe28   : > { %v2994_v19 = vadd.f32 %v5601_v41, %v2993_v10 }
 0xe2c   : > { %v6072_v37 = vpop.f32.mrb[36].mxu0 }
 0xe2d   : > { %v3070_v11 = vadd.f32 %v6072_v37, %v5610_v38  ;;  %v3061_v44 = vpop.f32.mrb[37].mxu0 }
 0xe2e   : > { %v3062_v26 = vadd.f32 %v5610_v38, %v3061_v44  ;;  %v6073_v43 = vpop.f32.mrb[38].mxu0 }
 0xe2f   : > { %v3064_v61 = vpop.f32.mrb[39].mxu0  ;;  %6093 = vmatpush3.xpose.msk.msra.mxu1 %vm885_vm2, %v3070_v11  ;;  %v3073_v0 = vadd.f32 %v6073_v43, %v5610_v38 }
 0xe30   : > { %6083 = vmatpush3.xpose.msk.msra.mxu0 %vm885_vm2, %v3062_v26  ;;  %6102 = vmatprep.subr.mxu1 %v6431_v2  ;;  %v3065_v14 = vadd.f32 %v5610_v38, %v3064_v61 }
 0xe31   : > { %6087 = vmatprep.subr.mxu0 %v6431_v2 }
 0xe32   : > { %6095 = vmatmul.mubr.msk.f32.vlgmr.msra.gmra.mrb[40].mxu1 %vm885_vm2, %v2999_v13 }
 0xe33   : > { %6085 = vmatmul.mubr.msk.f32.vlgmr.msra.gmra.mrb[44].mxu0 %vm885_vm2, %v2991_v15  ;;  %6104 = vmatprep.mubr.msk.f32.mxu1 %vm6432_vm1, %v6431_v2 }
 0xe34   : > { %v6080_v18 = vpop.f32.mrb[40].mxu0  ;;  %6088 = vmatpush3.xpose.msk.msra.mxu0 %vm885_vm2, %v3065_v14  ;;  %6089 = vmatprep.mubr.msk.f32.mxu0 %vm6432_vm1, %v6431_v2 }
 0xe35   : > { %v6887_v12 = vadd.f32 %v6080_v18, %v5619_v16  ;;  %v3132_v17 = vpop.f32.mrb[41].mxu0  ;;  %6097 = vmatprep.subr.mxu0 %v6431_v2 }
 0xe36   : > { %v3133_v20 = vadd.f32 %v5619_v16, %v3132_v17  ;;  %v6081_v22 = vpop.f32.mrb[42].mxu0 }
 0xe37   : > { %v6890_v23 = vadd.f32 %v6081_v22, %v5619_v16  ;;  %v3135_v24 = vpop.f32.mrb[43].mxu0  ;;  %6090 = vmatmul.mubr.msk.f32.vlgmr.msra.gmra.mrb[46].mxu0 %vm885_vm2, %v2994_v19 }
 0xe38   : > { %6098 = vmatpush3.xpose.msk.msra.mxu0 %vm885_vm2, %v3073_v0  ;;  %6103 = vmatpush3.msra.mxu1 %v3133_v20  ;;  %v3136_v27 = vadd.f32 %v5619_v16, %v3135_v24  ;;  %v6276_v20 = vld [vmem:[%s6507_s22 + $0x70] sm:$0xff]  }
 0xe39   : > { %6099 = vmatprep.mubr.msk.f32.mxu0 %vm6432_vm1, %v6431_v2  ;;  %6107 = vmatprep.subr.mxu0 %v6431_v2 }
 0xe3a   : > { %6112 = vmatprep.subr.mxu1 %v6431_v2 }
 0xe3b   : > { %6100 = vmatmul.mubr.msk.f32.vlgmr.msra.gmra.mrb[48].mxu0 %vm885_vm2, %v3002_v25 }
 0xe3c   : > { %6108 = vmatpush3.msra.mxu0 %v3136_v27  ;;  %6109 = vmatprep.mubr.msk.f32.mxu0 %vm6432_vm1, %v6431_v2 }
 0xe3d   : > { %6117 = vmatprep.subr.mxu0 %v6431_v2 }
 0xf05   : > { %v3371_v28 = vpop.f32.mrb[40].mxu1 }
 0xf06   : > { %v3372_v29 = vadd.f32 %v3371_v28, %v6635_v49  ;;  %v3219_v30 = vpop.f32.mrb[44].mxu0  ;;  %v6096_v31 = vpop.f32.mrb[41].mxu1  ;;  %v6277_v28 = vld [vmem:[%s6507_s22 + $0x78] sm:$0xff]  }
 0xf07   : > { %v3220_v32 = vadd.f32 %v3219_v30, %v6632_v46  ;;  %v6086_v33 = vpop.f32.mrb[45].mxu0  ;;  %v6280_v30 = vld [vmem:[%s6507_s22 + $0xb0] sm:$0xff]   ;;  %v6281_v31 = vld [vmem:[%s6507_s22 + $0xb8] sm:$0xff]  }
 0xf08   : > { %v3457_v35 = vsel %vm1190_vm3, %v3372_v29, -inf }
 0xf09   : > { %3458 = vmax.xlane.f32.xlu1 %v3457_v35  ;;  %v3451_v39 = vsel %vm1190_vm3, %v3220_v32, -inf }
 0xf0a   : > { %3452 = vmax.xlane.f32.xlu0 %v3451_v39  ;;  %v3295_v40 = vpop.f32.mrb[46].mxu0 }
 0xf0b   : > { %v6091_v45 = vpop.f32.mrb[47].mxu0  ;;  %v3296_v7 = vadd.f32 %v3295_v40, %v6639_v55 }
 0xf0d   : > { %v3454_v21 = vsel %vm1190_vm3, %v3296_v7, -inf }
 0xf0e   : > { %v3447_v47 = vpop.f32.mrb[48].mxu0 }
 0xf0f   : > { %v6101_v48 = vpop.f32.mrb[49].mxu0  ;;  %v3448_v60 = vadd.f32 %v3447_v47, %v6645_v5 }
 0xf11   : > { %v3460_v36 = vsel %vm1190_vm3, %v3448_v60, -inf }
 0xf96   : > { %v3459_v50 = vpop.xlane.xlu1 %3458 }
 0xf97   : > { %v3465_v51 = vsub.f32 %v3372_v29, %v3459_v50  ;;  %v3453_v56 = vpop.xlane.xlu0 %3452  ;;  %v6278_v29 = vld [vmem:[%s6507_s22 + $0x90] sm:$0xff]  }
 0xf98   : > { %v3463_v52 = vsub.f32 %v3220_v32, %v3453_v56 }
 0xf99   : > { %v3471_v53 = vmul.f32 1.442695, %v3465_v51 }
 0xf9a   : > { %v3467_v54 = vmul.f32 1.442695, %v3463_v52 }
 0xf9b   : > { %6358 = vpow2.f32 %v3471_v53 }
 0xf9c   : > { %6360 = vpow2.f32 %v3467_v54 }
 0xfa5   : > { %v6359_v59 = vpop.eup %6358 }
 0xfa6   : > { %v6361_v62 = vpop.eup %6360  ;;  %v3481_v6 = vsel %vm1190_vm3, %v6359_v59, 0.0 }
 0xfa7   : > { %3482 = vadd.xlane.f32.xlu1 %v3481_v6  ;;  %v3475_v8 = vsel %vm1190_vm3, %v6361_v62, 0.0  ;;  %v5651_v6 = vld [vmem:[%s6585_s23 + $0x9] ss:$0 sm:$0xff] }
 0xfa8   : > { %3476 = vadd.xlane.f32.xlu0 %v3475_v8  ;;  %v5642_v8 = vld [vmem:[%s6585_s23 + $0x7] ss:$0 sm:$0xff] }
 0xfab   : > { %3461 = vmax.xlane.f32.xlu1 %v3460_v36 }
 0xfac   : > { %3455 = vmax.xlane.f32.xlu0 %v3454_v21 }
0x1034   : > { %v3483_v9 = vpop.xlane.xlu1 %3482 }
0x1035   : > { %6362 = vrcp.f32 %v3483_v9  ;;  %v3477_v10 = vpop.xlane.xlu0 %3476 }
0x1036   : > { %6364 = vrcp.f32 %v3477_v10 }
0x1038   : > { %v3462_v38 = vpop.xlane.xlu1 %3461 }
0x1039   : > { %v3466_v37 = vsub.f32 %v3448_v60, %v3462_v38  ;;  %v3456_v41 = vpop.xlane.xlu0 %3455 }
0x103a   : > { %v3464_v11 = vsub.f32 %v3296_v7, %v3456_v41 }
0x103b   : > { %v3473_v44 = vmul.f32 1.442695, %v3466_v37 }
0x103c   : > { %v3469_v26 = vmul.f32 1.442695, %v3464_v11 }
0x103d   : > { %6366 = vpow2.f32 %v3473_v44  ;;  %v5660_v44 = vld [vmem:[%s6585_s23 + $0xb] ss:$0 sm:$0xff] }
0x103e   : > { %6368 = vpow2.f32 %v3469_v26 }
0x103f   : > { %v6363_v43 = vpop.eup %6362 }
0x1040   : > { %v6365_v61 = vpop.eup %6364  ;;  %v3493_v13 = vmul.f32 %v6363_v43, %v3483_v9 }
0x1041   : > { %v3491_v15 = vmul.f32 %v6365_v61, %v3477_v10 }
0x1042   : > { %v3497_v14 = vsub.f32 2.0, %v3493_v13 }
0x1043   : > { %v3495_v16 = vsub.f32 2.0, %v3491_v15 }
0x1044   : > { %v3501_v17 = vmul.f32 %v6363_v43, %v3497_v14 }
0x1045   : > { %v3499_v18 = vmul.f32 %v6365_v61, %v3495_v16 }
0x1046   : > { %v3505_v27 = vmul.f32 %v6359_v59, %v3501_v17 }
0x1047   : > { %v6367_v19 = vpop.eup %6366  ;;  %v3503_v0 = vmul.f32 %v6361_v62, %v3499_v18 }
0x1048   : > { %v6369_v22 = vpop.eup %6368  ;;  %v3484_v24 = vsel %vm1190_vm3, %v6367_v19, 0.0 }
0x1049   : > { %6105 = vmatmul.mubr.msk.f32.vlgmr.msra.gmra.mrb[42].mxu1 %vm1190_vm3, %v3503_v0  ;;  %3485 = vadd.xlane.f32.xlu1 %v3484_v24  ;;  %v3478_v25 = vsel %vm1190_vm3, %v6369_v22, 0.0 }
0x104a   : > { %6113 = vmatpush3.msra.mxu1 %v6887_v12  ;;  %3479 = vadd.xlane.f32.xlu0 %v3478_v25  ;;  %v6279_v12 = vld [vmem:[%s6507_s22 + $0x98] sm:$0xff]  }
0x104b   : > { %6114 = vmatprep.mubr.msk.f32.mxu1 %vm6432_vm1, %v6431_v2  ;;  %6122 = vmatprep.subr.bf16.mxu1 %v6276_v20 }
0x104d   : > { %6115 = vmatmul.mubr.msk.f32.vlgmr.msra.gmra.mrb[44].mxu1 %vm1190_vm3, %v3505_v27 }
0x104e   : > { %6123 = vmatpush3.bf16.msra.mxu1 %v6276_v20  ;;  %6126 = vmatprep.mubr.msk.bf16.mxu1 %vm537_vm0, %v6845_v1 }
0x104f   : > { %6124 = vmatprep.subr.bf16.mxu1 %v6277_v28 }
0x1052   : > { %6125 = vmatpush3.bf16.msra.mxu1 %v6277_v28 }
0x1053   : > { %6130 = vmatprep.subr.bf16.mxu1 %v6278_v29 }
0x1055   : > { %6127 = vmatmul.mubr.msk.bf16.vlgmr.msra.gmra.mrb[48].mxu1 %vm537_vm0, %v6855_v4 }
0x1056   : > { %6131 = vmatpush3.bf16.msra.mxu1 %v6278_v29  ;;  %6134 = vmatprep.mubr.msk.bf16.mxu1 %vm537_vm0, %v6845_v1 }
0x1057   : > { %6132 = vmatprep.subr.bf16.mxu1 %v6279_v12 }
0x105a   : > { %6133 = vmatpush3.bf16.msra.mxu1 %v6279_v12 }
0x105b   : > { %6138 = vmatprep.subr.bf16.mxu1 %v6280_v30 }
0x105d   : > { %6135 = vmatmul.mubr.msk.bf16.vlgmr.msra.gmra.mrb[52].mxu1 %vm537_vm0, %v6855_v4 }
0x105e   : > { %6139 = vmatpush3.bf16.msra.mxu1 %v6280_v30  ;;  %6142 = vmatprep.mubr.msk.bf16.mxu1 %vm537_vm0, %v6845_v1 }
0x105f   : > { %6140 = vmatprep.subr.bf16.mxu1 %v6281_v31 }
0x1062   : > { %6141 = vmatpush3.bf16.msra.mxu1 %v6281_v31 }
0x1063   : > { %6156 = vmatprep.subr.mxu1 %v6431_v2 }
0x1065   : > { %6143 = vmatmul.mubr.msk.bf16.vlgmr.msra.gmra.mrb[56].mxu1 %vm537_vm0, %v6855_v4 }
0x1066   : > { %6158 = vmatprep.mubr.msk.f32.mxu1 %vm6432_vm1, %v6431_v2 }
0x10d6   : > { %v3486_v32 = vpop.xlane.xlu1 %3485 }
0x10d7   : > { %6370 = vrcp.f32 %v3486_v32  ;;  %v3480_v33 = vpop.xlane.xlu0 %3479 }
0x10d8   : > { %6372 = vrcp.f32 %v3480_v33 }
0x10e1   : > { %v6371_v35 = vpop.eup %6370 }
0x10e2   : > { %v6373_v39 = vpop.eup %6372  ;;  %v3494_v40 = vmul.f32 %v6371_v35, %v3486_v32 }
0x10e3   : > { %v3492_v45 = vmul.f32 %v6373_v39, %v3480_v33 }
0x10e4   : > { %v3498_v47 = vsub.f32 2.0, %v3494_v40 }
0x10e5   : > { %v3496_v1 = vsub.f32 2.0, %v3492_v45 }
0x10e6   : > { %v3502_v50 = vmul.f32 %v6371_v35, %v3498_v47 }
0x10e7   : > { %v3500_v48 = vmul.f32 %v6373_v39, %v3496_v1 }
0x10e8   : > { %v3506_v4 = vmul.f32 %v6367_v19, %v3502_v50 }
0x10e9   : > { %v3504_v51 = vmul.f32 %v6369_v22, %v3500_v48 }
0x10eb   : > { %6110 = vmatmul.mubr.msk.f32.vlgmr.msra.gmra.mrb[50].mxu0 %vm1190_vm3, %v3504_v51 }
0x10ec   : > { %6118 = vmatpush3.msra.mxu0 %v6890_v23  ;;  %6119 = vmatprep.mubr.msk.f32.mxu0 %vm6432_vm1, %v6431_v2 }
0x10ed   : > { %6146 = vmatprep.subr.mxu0 %v6431_v2 }
0x10ef   : > { %6120 = vmatmul.mubr.msk.f32.vlgmr.msra.gmra.mrb[52].mxu0 %vm1190_vm3, %v3506_v4 }
0x10f0   : > { %6148 = vmatprep.mubr.msk.f32.mxu0 %vm6432_vm1, %v6431_v2 }
0x111c   : > { %v6948_v56 = vpop.f32.mrb[42].mxu1 }
0x111d   : > { %v6106_v52 = vpop.f32.mrb[43].mxu1 }
0x1120   : > { %v6950_v53 = vpop.f32.mrb[44].mxu1 }
0x1121   : > { %v6116_v54 = vpop.f32.mrb[45].mxu1 }
0x1128   : > { %v6128_v59 = vpop.f32.mrb[48].mxu1 }
0x1129   : > { %v3860_v23 = vpop.f32.mrb[49].mxu1  ;;  %v3869_v37 = vadd.f32 %v6128_v59, %v5642_v8 }
0x112a   : > { %v6129_v62 = vpop.f32.mrb[50].mxu1  ;;  %v3861_v41 = vadd.f32 %v5642_v8, %v3860_v23 }
0x112b   : > { %v3863_v60 = vpop.f32.mrb[51].mxu1  ;;  %v3872_v17 = vadd.f32 %v6129_v62, %v5642_v8 }
0x112c   : > { %v3864_v43 = vadd.f32 %v5642_v8, %v3863_v60 }
0x1130   : > { %v6136_v7 = vpop.f32.mrb[52].mxu1 }
0x1131   : > { %v3940_v36 = vadd.f32 %v6136_v7, %v5651_v6  ;;  %v3931_v21 = vpop.f32.mrb[53].mxu1 }
0x1132   : > { %v3932_v9 = vadd.f32 %v5651_v6, %v3931_v21  ;;  %v6137_v10 = vpop.f32.mrb[54].mxu1 }
0x1133   : > { %v3934_v38 = vpop.f32.mrb[55].mxu1  ;;  %6157 = vmatpush3.xpose.msk.msra.mxu1 %vm885_vm2, %v3940_v36  ;;  %v3943_v15 = vadd.f32 %v6137_v10, %v5651_v6 }
0x1134   : > { %6147 = vmatpush3.xpose.msk.msra.mxu0 %vm885_vm2, %v3932_v9  ;;  %6166 = vmatprep.subr.mxu1 %v6431_v2  ;;  %v3935_v11 = vadd.f32 %v5651_v6, %v3934_v38 }
0x1135   : > { %6151 = vmatprep.subr.mxu0 %v6431_v2 }
0x1136   : > { %6159 = vmatmul.mubr.msk.f32.vlgmr.msra.gmra.mrb[46].mxu1 %vm885_vm2, %v3869_v37 }
0x1137   : > { %6149 = vmatmul.mubr.msk.f32.vlgmr.msra.gmra.mrb[54].mxu0 %vm885_vm2, %v3861_v41  ;;  %6168 = vmatprep.mubr.msk.f32.mxu1 %vm6432_vm1, %v6431_v2 }
0x1138   : > { %v6144_v26 = vpop.f32.mrb[56].mxu1  ;;  %6152 = vmatpush3.xpose.msk.msra.mxu0 %vm885_vm2, %v3935_v11  ;;  %6153 = vmatprep.mubr.msk.f32.mxu0 %vm6432_vm1, %v6431_v2 }
0x1139   : > { %v6966_v61 = vadd.f32 %v6144_v26, %v5660_v44  ;;  %v4002_v13 = vpop.f32.mrb[57].mxu1  ;;  %6161 = vmatprep.subr.mxu0 %v6431_v2 }
0x113a   : > { %v4003_v14 = vadd.f32 %v5660_v44, %v4002_v13  ;;  %v6145_v16 = vpop.f32.mrb[58].mxu1 }
0x113b   : > { %v6969_v18 = vadd.f32 %v6145_v16, %v5660_v44  ;;  %v4005_v19 = vpop.f32.mrb[59].mxu1  ;;  %6154 = vmatmul.mubr.msk.f32.vlgmr.msra.gmra.mrb[56].mxu0 %vm885_vm2, %v3864_v43 }
0x113c   : > { %6162 = vmatpush3.xpose.msk.msra.mxu0 %vm885_vm2, %v3943_v15  ;;  %6167 = vmatpush3.msra.mxu1 %v4003_v14  ;;  %v4006_v0 = vadd.f32 %v5660_v44, %v4005_v19 }
0x113d   : > { %6163 = vmatprep.mubr.msk.f32.mxu0 %vm6432_vm1, %v6431_v2  ;;  %6171 = vmatprep.subr.mxu0 %v6431_v2 }
0x113e   : > { %6176 = vmatprep.subr.mxu1 %v6431_v2 }
0x113f   : > { %6164 = vmatmul.mubr.msk.f32.vlgmr.msra.gmra.mrb[58].mxu0 %vm885_vm2, %v3872_v17 }
0x1140   : > { %6172 = vmatpush3.msra.mxu0 %v4006_v0  ;;  %6173 = vmatprep.mubr.msk.f32.mxu0 %vm6432_vm1, %v6431_v2 }
0x1141   : > { %6181 = vmatprep.subr.mxu0 %v6431_v2 }
0x11be   : > { %v6981_v20 = vpop.f32.mrb[50].mxu0 }
0x11bf   : > { %v3799_v22 = vpack.c.bf16 %v6981_v20, %v6948_v56  ;;  %v6111_v24 = vpop.f32.mrb[51].mxu0 }
0x11c2   : > { %v6985_v25 = vpop.f32.mrb[52].mxu0 }
0x11c3   : > { %v3800_v27 = vpack.c.bf16 %v6985_v25, %v6950_v53  ;;  %v6121_v28 = vpop.f32.mrb[53].mxu0 }
0x1209   : > { %v4241_v29 = vpop.f32.mrb[46].mxu1 }
0x120a   : > { %v4089_v12 = vpop.f32.mrb[54].mxu0  ;;  %v6160_v30 = vpop.f32.mrb[47].mxu1  ;;  %v4242_v33 = vadd.f32 %v4241_v29, %v6635_v49 }
0x120b   : > { %v4090_v31 = vadd.f32 %v4089_v12, %v6632_v46  ;;  %v6150_v32 = vpop.f32.mrb[55].mxu0 }
0x120c   : > { %v4327_v47 = vsel %vm1190_vm3, %v4242_v33, -inf }
0x120d   : > { %v4321_v35 = vsel %vm1190_vm3, %v4090_v31, -inf }
0x120e   : > { %4322 = vmax.xlane.f32.xlu0 %v4321_v35  ;;  %v4165_v39 = vpop.f32.mrb[56].mxu0 }
0x120f   : > { %v4166_v40 = vadd.f32 %v4165_v39, %v6639_v55  ;;  %v6155_v45 = vpop.f32.mrb[57].mxu0 }
0x1211   : > { %v4324_v1 = vsel %vm1190_vm3, %v4166_v40, -inf }
0x1212   : > { %4328 = vmax.xlane.f32.xlu0 %v4327_v47  ;;  %4325 = vmax.xlane.f32.xlu1 %v4324_v1  ;;  %v4317_v48 = vpop.f32.mrb[58].mxu0  ;;  %v6283_v1 = vld [vmem:[%s6517_s26 + $0x10] sm:$0xff]  }
0x1213   : > { %v4318_v50 = vadd.f32 %v4317_v48, %v6645_v5  ;;  %v6165_v46 = vpop.f32.mrb[59].mxu0 }
0x1215   : > { %v4330_v51 = vsel %vm1190_vm3, %v4318_v50, -inf }
0x1216   : > { %4331 = vmax.xlane.f32.xlu1 %v4330_v51 }
0x129b   : > { %v4323_v49 = vpop.xlane.xlu0 %4322 }
0x129c   : > { %v4333_v4 = vsub.f32 %v4090_v31, %v4323_v49 }
0x129e   : > { %v4337_v52 = vmul.f32 1.442695, %v4333_v4 }
0x129f   : > { %v4329_v54 = vpop.xlane.xlu0 %4328  ;;  %v4326_v59 = vpop.xlane.xlu1 %4325 }
0x12a0   : > { %6374 = vpow2.f32 %v4337_v52  ;;  %v4335_v55 = vsub.f32 %v4242_v33, %v4329_v54  ;;  %v4334_v23 = vsub.f32 %v4166_v40, %v4326_v59  ;;  %v5686_v59 = vld [vmem:[%s6769_s16 + $0x8] ss:$0 sm:$0xff] }
0x12a2   : > { %v4341_v62 = vmul.f32 1.442695, %v4335_v55  ;;  %v4339_v60 = vmul.f32 1.442695, %v4334_v23 }
0x12a3   : > { %v4332_v6 = vpop.xlane.xlu1 %4331 }
0x12a4   : > { %6376 = vpow2.f32 %v4341_v62  ;;  %v4336_v7 = vsub.f32 %v4318_v50, %v4332_v6 }
0x12a5   : > { %6378 = vpow2.f32 %v4339_v60 }
0x12a6   : > { %v4343_v8 = vmul.f32 1.442695, %v4336_v7 }
0x12a8   : > { %6380 = vpow2.f32 %v4343_v8 }
0x12aa   : > { %v6375_v5 = vpop.eup %6374 }
0x12ab   : > { %v4345_v36 = vsel %vm1190_vm3, %v6375_v5, 0.0 }
0x12ac   : > { %4346 = vadd.xlane.f32.xlu0 %v4345_v36 }
0x12ae   : > { %v6377_v21 = vpop.eup %6376 }
0x12af   : > { %v6379_v9 = vpop.eup %6378  ;;  %v4351_v10 = vsel %vm1190_vm3, %v6377_v21, 0.0 }
0x12b0   : > { %4352 = vadd.xlane.f32.xlu0 %v4351_v10  ;;  %v4348_v38 = vsel %vm1190_vm3, %v6379_v9, 0.0 }
0x12b1   : > { %4349 = vadd.xlane.f32.xlu1 %v4348_v38 }
0x12b2   : > { %v6381_v37 = vpop.eup %6380 }
0x12b3   : > { %v4354_v41 = vsel %vm1190_vm3, %v6381_v37, 0.0 }
0x12b5   : > { %4355 = vadd.xlane.f32.xlu1 %v4354_v41 }
0x1339   : > { %v4347_v11 = vpop.xlane.xlu0 %4346 }
0x133a   : > { %6382 = vrcp.f32 %v4347_v11 }
0x133d   : > { %v4353_v44 = vpop.xlane.xlu0 %4352 }
0x133e   : > { %6384 = vrcp.f32 %v4353_v44  ;;  %v4350_v26 = vpop.xlane.xlu1 %4349 }
0x133f   : > { %6386 = vrcp.f32 %v4350_v26 }
0x1342   : > { %v4356_v43 = vpop.xlane.xlu1 %4355 }
0x1343   : > { %6388 = vrcp.f32 %v4356_v43 }
0x1344   : > { %v6383_v13 = vpop.eup %6382 }
0x1345   : > { %v4361_v15 = vmul.f32 %v6383_v13, %v4347_v11 }
0x1347   : > { %v4365_v14 = vsub.f32 2.0, %v4361_v15 }
0x1348   : > { %v6385_v16 = vpop.eup %6384 }
0x1349   : > { %v6387_v19 = vpop.eup %6386  ;;  %v4369_v17 = vmul.f32 %v6383_v13, %v4365_v14  ;;  %v4363_v0 = vmul.f32 %v6385_v16, %v4353_v44 }
0x134a   : > { %v4362_v24 = vmul.f32 %v6387_v19, %v4350_v26 }
0x134b   : > { %v4373_v28 = vmul.f32 %v6375_v5, %v4369_v17  ;;  %v4367_v29 = vsub.f32 2.0, %v4363_v0 }
0x134c   : > { %v4366_v12 = vsub.f32 2.0, %v4362_v24  ;;  %v6284_v24 = vld [vmem:[%s6522_s29 + $0x10] sm:$0xff]  }
0x134d   : > { %v6389_v30 = vpop.eup %6388  ;;  %v4371_v31 = vmul.f32 %v6385_v16, %v4367_v29  ;;  %6169 = vmatmul.mubr.msk.f32.vlgmr.msra.gmra.mrb[60].mxu1 %vm1190_vm3, %v4373_v28  ;;  %v6285_v28 = vld [vmem:[%s6522_s29 + $0x18] sm:$0xff]   ;;  %s528_s29 = scalar_lea.vmem %s7130_s10, %s5479_s24 }
0x134e   : > { %v4370_v32 = vmul.f32 %v6387_v19, %v4366_v12  ;;  %v4364_v33 = vmul.f32 %v6389_v30, %v4356_v43  ;;  %6177 = vmatpush3.msra.mxu1 %v6966_v61  ;;  %6178 = vmatprep.mubr.msk.f32.mxu1 %vm6432_vm1, %v6431_v2  ;;  %v6282_v61 = vld [vmem:[%s6517_s26 + $0x18] sm:$0xff]  }
0x134f   : > { %v4375_v35 = vmul.f32 %v6377_v21, %v4371_v31  ;;  %6186 = vmatprep.subr.bf16.mxu1 %v6282_v61 }
0x1350   : > { %v4374_v39 = vmul.f32 %v6379_v9, %v4370_v32  ;;  %v4368_v40 = vsub.f32 2.0, %v4364_v33 }
0x1351   : > { %6179 = vmatmul.mubr.msk.f32.vlgmr.msra.gmra.mrb[62].mxu1 %vm1190_vm3, %v4375_v35 }
0x1352   : > { %v4372_v45 = vmul.f32 %v6389_v30, %v4368_v40  ;;  %6174 = vmatmul.mubr.msk.f32.vlgmr.msra.gmra.mrb[60].mxu0 %vm1190_vm3, %v4374_v39  ;;  %6187 = vmatpush3.bf16.msra.mxu1 %v6282_v61 }
0x1353   : > { %6182 = vmatpush3.msra.mxu0 %v6969_v18  ;;  %6183 = vmatprep.mubr.msk.f32.mxu0 %vm6432_vm1, %v6431_v2 }
0x1354   : > { %v4376_v47 = vmul.f32 %v6381_v37, %v4372_v45  ;;  %6192 = vmatprep.subr.bf16.mxu1 %v6283_v1  ;;  %6198 = vmatprep.subr.bf16.mxu0 %v6284_v24 }
0x1356   : > { %6184 = vmatmul.mubr.msk.f32.vlgmr.msra.gmra.mrb[62].mxu0 %vm1190_vm3, %v4376_v47 }
0x1357   : > { %6199 = vmatpush3.bf16.msra.mxu0 %v6284_v24 }
0x1358   : > { %6200 = vmatprep.subr.bf16.mxu0 %v6285_v28 }
0x135b   : > { %6201 = vmatpush3.bf16.msra.mxu0 %v6285_v28 }
0x1420   : > { %v4446_v48 = vpop.f32.mrb[60].mxu1 }
0x1421   : > { %v6170_v50 = vpop.f32.mrb[61].mxu1 }
0x1424   : > { %v4592_v46 = vpop.f32.mrb[62].mxu1 }
0x1425   : > { %v4519_v51 = vpop.f32.mrb[60].mxu0  ;;  %v6180_v49 = vpop.f32.mrb[63].mxu1 }
0x1426   : > { %v4669_v4 = vpack.c.bf16 %v4519_v51, %v4446_v48  ;;  %v6175_v52 = vpop.f32.mrb[61].mxu0  ;;  %v5689_v48 = vld [vmem:[%s6769_s16 + $0x9] ss:$0 sm:$0xff] }
0x1427   : > { %v5690_v52 = vld [vmem:[%s6769_s16 + $0xa] ss:$0 sm:$0xff] }
0x1428   : > { %6188 = vmatprep.mubr.msk.bf16.mxu1 %vm885_vm2, %v4669_v4 }
0x1429   : > { %v4665_v18 = vpop.f32.mrb[62].mxu0 }
0x142a   : > { %v4670_v2 = vpack.c.bf16 %v4665_v18, %v4592_v46  ;;  %v6185_v54 = vpop.f32.mrb[63].mxu0 }
0x142c   : > { %6189 = vmatmul.mubr.msk.bf16.vlgmr.msra.gmra.mrb[64].mxu1 %vm885_vm2, %v4670_v2 }
0x142d   : > { %6194 = vmatprep.mubr.msk.bf16.mxu1 %vm885_vm2, %v3799_v22  ;;  %6193 = vmatpush3.bf16.msra.mxu1 %v6283_v1 }
0x1438   : > { %6195 = vmatmul.mubr.msk.bf16.vlgmr.msra.gmra.mrb[64].mxu1 %vm885_vm2, %v3800_v27 }
0x150b   : > { %v6196_v55 = vpop.f32.mrb[64].mxu1 }
0x150c   : > { %v4781_v23 = vpop.f32.mrb[65].mxu1  ;;  %v4804_v62 = vadd.f32 %v6196_v55, %v5686_v59 }
0x150d   : > { %v4802_v60 = vadd.f32 %v5686_v59, %v4781_v23  ;;  %v6197_v6 = vpop.f32.mrb[66].mxu1 }
0x150e   : > { %v4784_v7 = vpop.f32.mrb[67].mxu1  ;;  %v4805_v8 = vadd.f32 %v6197_v6, %v5686_v59  ;;  %v4808_v22 = vadd.f32 %v4804_v62, %v6847_v63 }
0x150f   : > { %v4803_v5 = vadd.f32 %v5686_v59, %v4784_v7  ;;  %v4806_v36 = vadd.f32 %v4802_v60, %v6839_v57 }
0x1510   : > { %v4809_v25 = vadd.f32 %v4805_v8, %v6849_v3  ;;  %v4818_v27 = vsel %vm537_vm0, %v4808_v22, 0.0 }
0x1511   : > { %v4812_v56 = vsel %vm537_vm0, %v4806_v36, 0.0  ;;  %v4807_v20 = vadd.f32 %v4803_v5, %v6841_v58 }
0x1512   : > { %4813 = vadd.xlane.f32.xlu0 %v4812_v56  ;;  %v4821_v21 = vsel %vm537_vm0, %v4809_v25, 0.0  ;;  %v6287_v56 = vld [vmem:[%s6527_s12 + $0x48] sm:$0xff]  }
0x1513   : > { %v4815_v53 = vsel %vm537_vm0, %v4807_v20, 0.0 }
0x1514   : > { %4816 = vadd.xlane.f32.xlu1 %v4815_v53  ;;  %v6290_v53 = vld [vmem:[%s6527_s12 + $0x60] sm:$0xff]  }
0x1516   : > { %4819 = vadd.xlane.f32.xlu0 %v4818_v27  ;;  %v6292_v27 = vld [vmem:[%s6527_s12 + $0x70] sm:$0xff]  }
0x1518   : > { %4822 = vadd.xlane.f32.xlu1 %v4821_v21  ;;  %v6293_v21 = vld [vmem:[%s6527_s12 + $0x78] sm:$0xff]  }
0x159f   : > { %v4814_v9 = vpop.xlane.xlu0 %4813 }
0x15a0   : > { %v4824_v57 = vmul.f32 0.03125, %v4814_v9  ;;  %v5695_v9 = vld [vmem:[%s6816_s19 + $0x1] ss:$0 sm:$0xff] }
0x15a1   : > { %v4817_v10 = vpop.xlane.xlu1 %4816 }
0x15a2   : > { %v4828_v38 = vsub.f32 %v4806_v36, %v4824_v57  ;;  %v4825_v37 = vmul.f32 0.03125, %v4817_v10  ;;  %v6286_v36 = vld [vmem:[%s6527_s12 + $0x40] sm:$0xff]  }
0x15a3   : > { %v4820_v58 = vpop.xlane.xlu0 %4819  ;;  %6206 = vmatprep.subr.bf16.mxu0 %v6286_v36 }
0x15a4   : > { %v4829_v41 = vsub.f32 %v4807_v20, %v4825_v37  ;;  %v4826_v63 = vmul.f32 0.03125, %v4820_v58  ;;  %v4832_v11 = vmul.f32 %v4828_v38, %v4828_v38  ;;  %v6288_v20 = vld [vmem:[%s6527_s12 + $0x50] sm:$0xff]  }
0x15a5   : > { %v4823_v44 = vpop.xlane.xlu1 %4822 }
0x15a6   : > { %v4830_v26 = vsub.f32 %v4808_v22, %v4826_v63  ;;  %v4827_v3 = vmul.f32 0.03125, %v4823_v44  ;;  %v4836_v43 = vsel %vm537_vm0, %v4832_v11, 0.0  ;;  %v4833_v13 = vmul.f32 %v4829_v41, %v4829_v41  ;;  %v6289_v22 = vld [vmem:[%s6527_s12 + $0x58] sm:$0xff]  }
0x15a7   : > { %4837 = vadd.xlane.f32.xlu0 %v4836_v43 }
0x15a8   : > { %v4831_v15 = vsub.f32 %v4809_v25, %v4827_v3  ;;  %v4839_v14 = vsel %vm537_vm0, %v4833_v13, 0.0  ;;  %v4834_v16 = vmul.f32 %v4830_v26, %v4830_v26  ;;  %v6291_v25 = vld [vmem:[%s6527_s12 + $0x68] sm:$0xff]  }
0x15a9   : > { %4840 = vadd.xlane.f32.xlu1 %v4839_v14 }
0x15aa   : > { %v4842_v19 = vsel %vm537_vm0, %v4834_v16, 0.0  ;;  %v4835_v17 = vmul.f32 %v4831_v15, %v4831_v15 }
0x15ab   : > { %4843 = vadd.xlane.f32.xlu0 %v4842_v19 }
0x15ac   : > { %v4845_v0 = vsel %vm537_vm0, %v4835_v17, 0.0 }
0x15ad   : > { %4846 = vadd.xlane.f32.xlu1 %v4845_v0 }
0x1634   : > { %v4838_v29 = vpop.xlane.xlu0 %4837 }
0x1635   : > { %v4848_v12 = vmul.f32 0.03125, %v4838_v29 }
0x1636   : > { %v4841_v30 = vpop.xlane.xlu1 %4840 }
0x1637   : > { %v4852_v31 = vadd.f32 1e-12, %v4848_v12  ;;  %v4849_v32 = vmul.f32 0.03125, %v4841_v30 }
0x1638   : > { %v4844_v33 = vpop.xlane.xlu0 %4843 }
0x1639   : > { %6390 = vrsqrt.f32 %v4852_v31  ;;  %v4853_v35 = vadd.f32 1e-12, %v4849_v32  ;;  %v4850_v39 = vmul.f32 0.03125, %v4844_v33 }
0x163a   : > { %v4847_v40 = vpop.xlane.xlu1 %4846 }
0x163b   : > { %6392 = vrsqrt.f32 %v4853_v35  ;;  %v4854_v45 = vadd.f32 1e-12, %v4850_v39  ;;  %v4851_v47 = vmul.f32 0.03125, %v4847_v40 }
0x163d   : > { %6394 = vrsqrt.f32 %v4854_v45  ;;  %v4855_v61 = vadd.f32 1e-12, %v4851_v47 }
0x163f   : > { %6396 = vrsqrt.f32 %v4855_v61 }
0x1643   : > { %v6391_v1 = vpop.eup %6390 }
0x1644   : > { %v4860_v50 = vmul.f32 %v6391_v1, %v4828_v38 }
0x1645   : > { %v6393_v46 = vpop.eup %6392 }
0x1646   : > { %v4861_v51 = vmul.f32 %v6393_v46, %v4829_v41  ;;  %v4868_v49 = vmul.f32 %v5689_v48, %v4860_v50 }
0x1647   : > { %v6395_v4 = vpop.eup %6394 }
0x1648   : > { %v4862_v18 = vmul.f32 %v6395_v4, %v4830_v26  ;;  %v4869_v2 = vmul.f32 %v5689_v48, %v4861_v51  ;;  %v7040_v23 = vadd.f32 %v5690_v52, %v4868_v49 }
0x1649   : > { %v6397_v54 = vpop.eup %6396 }
0x164a   : > { %v4870_v59 = vmul.f32 %v5689_v48, %v4862_v18  ;;  %v4863_v55 = vmul.f32 %v6397_v54, %v4831_v15  ;;  %v7042_v62 = vadd.f32 %v5690_v52, %v4869_v2 }
0x164c   : > { %v4871_v60 = vmul.f32 %v5689_v48, %v4863_v55  ;;  %v4880_v6 = vpack.c.bf16 %v7042_v62, %v7040_v23  ;;  %v7047_v7 = vadd.f32 %v5690_v52, %v4870_v59 }
0x164e   : > { %6202 = vmatprep.mubr.msk.bf16.mxu0 %vm537_vm0, %v4880_v6  ;;  %v7049_v8 = vadd.f32 %v5690_v52, %v4871_v60  ;;  %v5717_v60 = vld [vmem:[%s6769_s16 + $0xb] ss:$0 sm:$0xff] }
0x1650   : > { %v4881_v5 = vpack.c.bf16 %v7049_v8, %v7047_v7 }
0x1652   : > { %6203 = vmatmul.mubr.msk.bf16.vlgmr.msra.gmra.mrb[64].mxu0 %vm537_vm0, %v4881_v5 }
0x1653   : > { %6207 = vmatpush3.bf16.msra.mxu0 %v6286_v36 }
0x1654   : > { %6208 = vmatprep.subr.bf16.mxu0 %v6287_v56 }
0x1657   : > { %6209 = vmatpush3.bf16.msra.mxu0 %v6287_v56 }
0x1658   : > { %6210 = vmatprep.subr.bf16.mxu0 %v6288_v20 }
0x165b   : > { %6211 = vmatpush3.bf16.msra.mxu0 %v6288_v20 }
0x165c   : > { %6212 = vmatprep.subr.bf16.mxu0 %v6289_v22 }
0x165f   : > { %6213 = vmatpush3.bf16.msra.mxu0 %v6289_v22 }
0x1660   : > { %6214 = vmatprep.subr.bf16.mxu0 %v6290_v53 }
0x1663   : > { %6215 = vmatpush3.bf16.msra.mxu0 %v6290_v53 }
0x1664   : > { %6216 = vmatprep.subr.bf16.mxu0 %v6291_v25 }
0x1667   : > { %6217 = vmatpush3.bf16.msra.mxu0 %v6291_v25 }
0x1668   : > { %6218 = vmatprep.subr.bf16.mxu0 %v6292_v27 }
0x166b   : > { %6219 = vmatpush3.bf16.msra.mxu0 %v6292_v27 }
0x166c   : > { %6220 = vmatprep.subr.bf16.mxu0 %v6293_v21 }
0x166f   : > { %6221 = vmatpush3.bf16.msra.mxu0 %v6293_v21 }
0x1725   : > { %v6204_v57 = vpop.f32.mrb[64].mxu0 }
0x1726   : > { %v4953_v10 = vadd.f32 %v6204_v57, %v5695_v9  ;;  %v4944_v38 = vpop.f32.mrb[65].mxu0 }
0x1727   : > { %v4945_v37 = vadd.f32 %v5695_v9, %v4944_v38  ;;  %v6205_v58 = vpop.f32.mrb[66].mxu0 }
0x1728   : > { %v4961_v41 = vmul.f32 %v4953_v10, %v4953_v10  ;;  %v4956_v63 = vadd.f32 %v6205_v58, %v5695_v9  ;;  %v4947_v11 = vpop.f32.mrb[67].mxu0 }
0x1729   : > { %v4959_v44 = vmul.f32 %v4945_v37, %v4945_v37  ;;  %v4948_v26 = vadd.f32 %v5695_v9, %v4947_v11 }
0x172a   : > { %v4965_v3 = vmul.f32 %v4961_v41, %v4953_v10  ;;  %v4962_v43 = vmul.f32 %v4956_v63, %v4956_v63  ;;  %v6422_v41 = vld [vmem:[%s6622_s28] sm:$0xf] }
0x172b   : > { %v4963_v13 = vmul.f32 %v4959_v44, %v4945_v37  ;;  %v4960_v15 = vmul.f32 %v4948_v26, %v4948_v26 }
0x172c   : > { %v4969_v14 = vmul.f32 0.044715, %v4965_v3  ;;  %v4966_v16 = vmul.f32 %v4962_v43, %v4956_v63 }
0x172d   : > { %v4967_v19 = vmul.f32 0.044715, %v4963_v13  ;;  %v4964_v17 = vmul.f32 %v4960_v15, %v4948_v26 }
0x172e   : > { %v4973_v0 = vadd.f32 %v4969_v14, %v4953_v10  ;;  %v4970_v24 = vmul.f32 0.044715, %v4966_v16 }
0x172f   : > { %v4971_v28 = vadd.f32 %v4967_v19, %v4945_v37  ;;  %v4968_v29 = vmul.f32 0.044715, %v4964_v17 }
0x1730   : > { %v4977_v12 = vmul.f32 0.7978846, %v4973_v0  ;;  %v4974_v30 = vadd.f32 %v4970_v24, %v4956_v63 }
0x1731   : > { %v4975_v31 = vmul.f32 0.7978846, %v4971_v28  ;;  %v4972_v32 = vadd.f32 %v4968_v29, %v4948_v26 }
0x1732   : > { %6398 = vtanh.f32 %v4977_v12  ;;  %v4978_v33 = vmul.f32 0.7978846, %v4974_v30 }
0x1733   : > { %6400 = vtanh.f32 %v4975_v31  ;;  %v4976_v35 = vmul.f32 0.7978846, %v4972_v32 }
0x1734   : > { %6402 = vtanh.f32 %v4978_v33  ;;  %v5213_v33 = vsub.s32 3, %v6624_v34 }
0x1735   : > { %6404 = vtanh.f32 %v4976_v35 }
0x1736   : > { %v5214_v35 = vrot.slane %v6422_v41, %v5213_v33 }
0x173c   : > { %v6399_v39 = vpop.eup %6398 }
0x173d   : > { %v6401_v40 = vpop.eup %6400  ;;  %v4985_v45 = vadd.f32 1.0, %v6399_v39  ;;  %v5193_v39 = vrot.slane %v6422_v41, %v6629_v42 }
0x173e   : > { %v6403_v47 = vpop.eup %6402  ;;  %v4983_v61 = vadd.f32 1.0, %v6401_v40 }
0x173f   : > { %v6405_v1 = vpop.eup %6404  ;;  %v4989_v48 = vmul.f32 0.5, %v4985_v45  ;;  %v4986_v50 = vadd.f32 1.0, %v6403_v47 }
0x1740   : > { %v4984_v46 = vadd.f32 1.0, %v6405_v1  ;;  %v4987_v51 = vmul.f32 0.5, %v4983_v61 }
0x1741   : > { %v4990_v49 = vmul.f32 0.5, %v4986_v50  ;;  %v4993_v52 = vmul.f32 %v4989_v48, %v4953_v10 }
0x1742   : > { %v4988_v4 = vmul.f32 0.5, %v4984_v46  ;;  %v4991_v2 = vmul.f32 %v4987_v51, %v4945_v37 }
0x1743   : > { %v4994_v18 = vmul.f32 %v4990_v49, %v4956_v63 }
0x1744   : > { %v4992_v54 = vmul.f32 %v4988_v4, %v4948_v26 }
0x1745   : > { %v4996_v59 = vpack.c.bf16 %v4994_v18, %v4993_v52 }
0x1746   : > { %v4995_v55 = vpack.c.bf16 %v4992_v54, %v4991_v2 }
0x1748   : > { %6222 = vmatprep.mubr.bf16.mxu0 %v4995_v55 }
0x1749   : > { %6223 = vmatmul.mubr.bf16.vlgmr.msra.gmra.mrb[68].mxu0 %v4996_v59 }
0x181c   : > { %v6224_v6 = vpop.f32.mrb[68].mxu0 }
0x181d   : > { %v5101_v5 = vpop.f32.mrb[69].mxu0  ;;  %v5110_v36 = vadd.f32 %v6224_v6, %v5717_v60 }
0x181e   : > { %v5102_v56 = vadd.f32 %v5717_v60, %v5101_v5  ;;  %v6225_v20 = vpop.f32.mrb[70].mxu0 }
0x181f   : > { %v5104_v22 = vpop.f32.mrb[71].mxu0  ;;  %v5113_v53 = vadd.f32 %v6225_v20, %v5717_v60  ;;  %v5118_v57 = vadd.f32 %v5110_v36, %v7047_v7 }
0x1820   : > { %v5105_v25 = vadd.f32 %v5717_v60, %v5104_v22  ;;  %v5116_v27 = vadd.f32 %v5102_v56, %v7040_v23  ;;  %v5199_v23 = vsub.s32 1, %v6624_v34 }
0x1821   : > { %v5119_v38 = vadd.f32 %v5113_v53, %v7049_v8  ;;  %v5128_v37 = vsel %vm537_vm0, %v5118_v57, 0.0 }
0x1822   : > { %v5122_v21 = vsel %vm537_vm0, %v5116_v27, 0.0  ;;  %v5117_v9 = vadd.f32 %v5105_v25, %v7042_v62  ;;  %v5200_v63 = vrot.slane %v6422_v41, %v5199_v23  ;;  %v5206_v62 = vsub.s32 2, %v6624_v34 }
0x1823   : > { %5123 = vadd.xlane.f32.xlu0 %v5122_v21  ;;  %v5131_v58 = vsel %vm537_vm0, %v5119_v38, 0.0 }
0x1824   : > { %v5125_v10 = vsel %vm537_vm0, %v5117_v9, 0.0  ;;  %v5207_v7 = vrot.slane %v6422_v41, %v5206_v62 }
0x1825   : > { %5126 = vadd.xlane.f32.xlu1 %v5125_v10 }
0x1827   : > { %5129 = vadd.xlane.f32.xlu0 %v5128_v37  ;;  %v5728_v37 = vld [vmem:[%s6769_s16 + $0xc] ss:$0 sm:$0xff] }
0x1829   : > { %5132 = vadd.xlane.f32.xlu1 %v5131_v58 }
0x183a   : > { %5202 = vbcast.lane.b32.xlu1 %v5200_v63, 256 }
0x183e   : > { %5209 = vbcast.lane.b32.xlu1 %v5207_v7, 256 }
0x18b0   : > { %v5124_v11 = vpop.xlane.xlu0 %5123 }
0x18b1   : > { %v5134_v26 = vmul.f32 0.03125, %v5124_v11  ;;  %v5729_v11 = vld [vmem:[%s6769_s16 + $0xd] ss:$0 sm:$0xff] }
0x18b2   : > { %v5127_v44 = vpop.xlane.xlu1 %5126 }
0x18b3   : > { %v5135_v3 = vmul.f32 0.03125, %v5127_v44  ;;  %v7075_v15 = vsub.f32 %v5116_v27, %v5134_v26 }
0x18b4   : > { %v5130_v8 = vpop.xlane.xlu0 %5129 }
0x18b5   : > { %v5136_v43 = vmul.f32 0.03125, %v5130_v8  ;;  %v7079_v19 = vsub.f32 %v5117_v9, %v5135_v3  ;;  %v5142_v29 = vmul.f32 %v7075_v15, %v7075_v15 }
0x18b6   : > { %v5133_v13 = vpop.xlane.xlu1 %5132 }
0x18b7   : > { %v7077_v14 = vsub.f32 %v5118_v57, %v5136_v43  ;;  %v5137_v16 = vmul.f32 0.03125, %v5133_v13  ;;  %v5143_v30 = vmul.f32 %v7079_v19, %v7079_v19  ;;  %v5146_v31 = vsel %vm537_vm0, %v5142_v29, 0.0 }
0x18b9   : > { %v7081_v17 = vsub.f32 %v5119_v38, %v5137_v16  ;;  %v5144_v0 = vmul.f32 %v7077_v14, %v7077_v14  ;;  %v5149_v32 = vsel %vm537_vm0, %v5143_v30, 0.0 }
0x18ba   : > { %v7097_v40 = vpop.permute.xlu1 %5202 }
0x18bb   : > { %v5152_v24 = vsel %vm537_vm0, %v5144_v0, 0.0  ;;  %v5145_v28 = vmul.f32 %v7081_v17, %v7081_v17  ;;  %v5256_v47 = vrot.slane %v7097_v40, 4 }
0x18bc   : > { %5153 = vadd.xlane.f32.xlu0 %v5152_v24 }
0x18bd   : > { %v5155_v12 = vsel %vm537_vm0, %v5145_v28, 0.0  ;;  %v5257_v1 = vadd.f32 %v5256_v47, %v7097_v40 }
0x18be   : > { %5156 = vadd.xlane.f32.xlu1 %v5155_v12  ;;  %v5210_v45 = vpop.permute.xlu1 %5209 }
0x18bf   : > { %v5262_v61 = vrot.slane %v5210_v45, 4  ;;  %v5258_v50 = vrot.slane %v5257_v1, 2 }
0x18c0   : > { %5147 = vadd.xlane.f32.xlu0 %v5146_v31 }
0x18c1   : > { %v5263_v48 = vadd.f32 %v5262_v61, %v5210_v45  ;;  %v5259_v18 = vadd.f32 %v5258_v50, %v5257_v1 }
0x18c2   : > { %5150 = vadd.xlane.f32.xlu1 %v5149_v32 }
0x18c3   : > { %v5264_v51 = vrot.slane %v5263_v48, 2  ;;  %v5260_v5 = vrot.slane %v5259_v18, 1 }
0x18c5   : > { %v5265_v2 = vadd.f32 %v5264_v51, %v5263_v48  ;;  %v5261_v21 = vadd.f32 %v5260_v5, %v5259_v18 }
0x18c7   : > { %v5266_v56 = vrot.slane %v5265_v2, 1  ;;  %v5275_v41 = vmax.f32 %v5261_v21, 0.0001 }
0x18c9   : > { %v5267_v9 = vadd.f32 %v5266_v56, %v5265_v2 }
0x18cb   : > { %v5276_v7 = vmax.f32 %v5267_v9, 0.0001 }
0x18d3   : > { %5216 = vbcast.lane.b32.xlu1 %v5214_v35, 256 }
0x18d6   : > { %5195 = vbcast.lane.b32.xlu0 %v5193_v39, 256 }
0x1949   : > { %v5154_v46 = vpop.xlane.xlu0 %5153 }
0x194a   : > { %v5160_v49 = vmul.f32 0.03125, %v5154_v46 }
0x194b   : > { %v5157_v4 = vpop.xlane.xlu1 %5156 }
0x194c   : > { %v5164_v34 = vadd.f32 1e-12, %v5160_v49  ;;  %v5161_v52 = vmul.f32 0.03125, %v5157_v4 }
0x194d   : > { %v5148_v42 = vpop.xlane.xlu0 %5147 }
0x194e   : > { %6406 = vrsqrt.f32 %v5164_v34  ;;  %v5165_v54 = vadd.f32 1e-12, %v5161_v52  ;;  %v5158_v59 = vmul.f32 0.03125, %v5148_v42 }
0x194f   : > { %v5151_v55 = vpop.xlane.xlu1 %5150 }
0x1950   : > { %6408 = vrsqrt.f32 %v5165_v54  ;;  %v5162_v60 = vadd.f32 1e-12, %v5158_v59  ;;  %v5159_v6 = vmul.f32 0.03125, %v5151_v55 }
0x1951   : > { %v5196_v36 = vpop.permute.xlu0 %5195 }
0x1952   : > { %6410 = vrsqrt.f32 %v5162_v60  ;;  %v5163_v20 = vadd.f32 1e-12, %v5159_v6  ;;  %v5250_v22 = vrot.slane %v5196_v36, 4 }
0x1953   : > { %v5217_v53 = vpop.permute.xlu1 %5216 }
0x1954   : > { %6412 = vrsqrt.f32 %v5163_v20  ;;  %v5251_v25 = vadd.f32 %v5250_v22, %v5196_v36  ;;  %v5268_v27 = vrot.slane %v5217_v53, 4 }
0x1955   : > { %6414 = vrcp.f32 %v5275_v41 }
0x1956   : > { %v5252_v57 = vrot.slane %v5251_v25, 2  ;;  %v5269_v10 = vadd.f32 %v5268_v27, %v5217_v53  ;;  %6416 = vrcp.f32 %v5276_v7 }
0x1958   : > { %v6407_v38 = vpop.eup %6406  ;;  %v5253_v58 = vadd.f32 %v5252_v57, %v5251_v25  ;;  %v5270_v23 = vrot.slane %v5269_v10, 2 }
0x1959   : > { %v5172_v63 = vmul.f32 %v6407_v38, %v7077_v14 }
0x195a   : > { %v6409_v62 = vpop.eup %6408  ;;  %v5254_v44 = vrot.slane %v5253_v58, 1  ;;  %v5271_v26 = vadd.f32 %v5270_v23, %v5269_v10 }
0x195b   : > { %v5180_v8 = vmul.f32 %v5728_v37, %v5172_v63  ;;  %v5173_v3 = vmul.f32 %v6409_v62, %v7081_v17 }
0x195c   : > { %v6411_v43 = vpop.eup %6410  ;;  %v5255_v13 = vadd.f32 %v5254_v44, %v5253_v58  ;;  %v5272_v16 = vrot.slane %v5271_v26, 1 }
0x195d   : > { %v5170_v0 = vmul.f32 %v6411_v43, %v7075_v15  ;;  %v5188_v24 = vadd.f32 %v5729_v11, %v5180_v8  ;;  %v5181_v28 = vmul.f32 %v5728_v37, %v5173_v3 }
0x195e   : > { %v6413_v29 = vpop.eup %6412  ;;  %v5274_v12 = vmax.f32 %v5255_v13, 0.0001  ;;  %v5273_v14 = vadd.f32 %v5272_v16, %v5271_v26 }
0x195f   : > { %v5171_v30 = vmul.f32 %v6413_v29, %v7079_v19  ;;  %v5178_v31 = vmul.f32 %v5728_v37, %v5170_v0  ;;  %v5220_v32 = vmul.f32 %v5210_v45, %v5188_v24  ;;  %v5189_v33 = vadd.f32 %v5729_v11, %v5181_v28  ;;  %v6415_v52 = vpop.eup %6414 }
0x1960   : > { %6418 = vrcp.f32 %v5274_v12  ;;  %v5277_v35 = vmax.f32 %v5273_v14, 0.0001  ;;  %v6417_v42 = vpop.eup %6416  ;;  %v5283_v6 = vmul.f32 %v6415_v52, %v5275_v41 }
0x1961   : > { %v5179_v17 = vmul.f32 %v5728_v37, %v5171_v30  ;;  %v5186_v39 = vadd.f32 %v5729_v11, %v5178_v31  ;;  %v5236_v47 = vsel %vm537_vm0, %v5220_v32, 0.0  ;;  %v5221_v61 = vmul.f32 %v5217_v53, %v5189_v33 }
0x1962   : > { %v5237_v1 = vrot.slane %v5236_v47, 4  ;;  %6420 = vrcp.f32 %v5277_v35  ;;  %v5284_v56 = vmul.f32 %v6417_v42, %v5276_v7  ;;  %v5287_v57 = vsub.f32 2.0, %v5283_v6 }
0x1963   : > { %v5187_v15 = vadd.f32 %v5729_v11, %v5179_v17  ;;  %v5218_v48 = vmul.f32 %v5196_v36, %v5186_v39  ;;  %v5243_v50 = vsel %vm537_vm0, %v5221_v61, 0.0 }
0x1964   : > { %v5238_v46 = vadd.f32 %v5237_v1, %v5236_v47  ;;  %v5244_v51 = vrot.slane %v5243_v50, 4  ;;  %v5288_v37 = vsub.f32 2.0, %v5284_v56  ;;  %v5291_v7 = vmul.f32 %v6415_v52, %v5287_v57 }
0x1965   : > { %v5219_v19 = vmul.f32 %v7097_v40, %v5187_v15  ;;  %v5222_v45 = vsel %vm537_vm0, %v5218_v48, 0.0 }
0x1966   : > { %v5239_v49 = vrot.slane %v5238_v46, 2  ;;  %v5223_v4 = vrot.slane %v5222_v45, 4  ;;  %v5245_v34 = vadd.f32 %v5244_v51, %v5243_v50  ;;  %v5292_v8 = vmul.f32 %v6417_v42, %v5288_v37 }
0x1967   : > { %v5229_v18 = vsel %vm537_vm0, %v5219_v19, 0.0 }
0x1968   : > { %v5230_v2 = vrot.slane %v5229_v18, 4  ;;  %v5224_v54 = vadd.f32 %v5223_v4, %v5222_v45  ;;  %v5246_v59 = vrot.slane %v5245_v34, 2  ;;  %v5240_v55 = vadd.f32 %v5239_v49, %v5238_v46 }
0x196a   : > { %v6419_v60 = vpop.eup %6418  ;;  %v5231_v5 = vadd.f32 %v5230_v2, %v5229_v18  ;;  %v5225_v36 = vrot.slane %v5224_v54, 2  ;;  %v5247_v25 = vadd.f32 %v5246_v59, %v5245_v34  ;;  %v5241_v27 = vrot.slane %v5240_v55, 1 }
0x196b   : > { %v5282_v20 = vmul.f32 %v6419_v60, %v5274_v12 }
0x196c   : > { %v6421_v40 = vpop.eup %6420  ;;  %v5232_v22 = vrot.slane %v5231_v5, 2  ;;  %v5226_v53 = vadd.f32 %v5225_v36, %v5224_v54  ;;  %v5248_v62 = vrot.slane %v5247_v25, 1  ;;  %v5242_v11 = vadd.f32 %v5241_v27, %v5240_v55 }
0x196d   : > { %v5286_v21 = vsub.f32 2.0, %v5282_v20  ;;  %v5285_v9 = vmul.f32 %v6421_v40, %v5277_v35 }
0x196e   : > { %v5233_v10 = vadd.f32 %v5232_v22, %v5231_v5  ;;  %v5227_v38 = vrot.slane %v5226_v53, 1  ;;  %v5249_v13 = vadd.f32 %v5248_v62, %v5247_v25  ;;  %v5296_v16 = vmul.f32 %v5292_v8, %v5242_v11 }
0x196f   : > { %v5289_v58 = vsub.f32 2.0, %v5285_v9  ;;  %v5290_v41 = vmul.f32 %v6419_v60, %v5286_v21 }
0x1970   : > { %v5234_v23 = vrot.slane %v5233_v10, 1  ;;  %v5228_v63 = vadd.f32 %v5227_v38, %v5226_v53 }
0x1971   : > { %v5293_v26 = vmul.f32 %v6421_v40, %v5289_v58 }
0x1972   : > { %v5235_v44 = vadd.f32 %v5234_v23, %v5233_v10  ;;  %v5294_v43 = vmul.f32 %v5290_v41, %v5228_v63 }
0x1973   : > { %v5297_v24 = vmul.f32 %v5293_v26, %v5249_v13 }
0x1974   : > { %v5295_v3 = vmul.f32 %v5291_v7, %v5235_v44 }
0x1976   : > { %v5303_v0 = vsel %vm5302_vm4, %v5295_v3, %v5294_v43 }
0x1977   : > { %v5305_v28 = vsel %vm5304_vm5, %v5296_v16, %v5303_v0 }
0x1978   : > { %v5307_v29 = vsel %vm5306_vm6, %v5297_v24, %v5305_v28 }
0x1979   : > { %5310 = vst.msk [vmem:[%s528_s29] sm:$0xf] %vm5309_vm7, %v5307_v29 }
0x197a PF: > { %s20_s13 = sadd.s32 1, %s6429_s13  }
0x197b   : > { %p17_p4 = scmp.ge.s32.totalorder %s20_s13, 4  }
0x197d   :  { %19 = sbr.rel (!%p17_p4) target bundleno = 1 (0x1), region = 134 }

</bundles_post_ra>
